<compile_context>
chip_gen: v6e
topology: v6e:2x2x1
jax: 0.10.0
libtpu: 0.0.40
codegen_flags: <defaults>
</compile_context>

<pallas_src>
import math

import jax
import jax.numpy as jnp
from jax.experimental import pallas as pl
from jax.experimental.pallas import tpu as pltpu

KSIZE = (16, 16, 16)     # Conv1d kernel_size per layer
POOL = (2, 2, 6)         # MaxPool1d size per layer
IN_CH = (3, 8, 16)       # in_channel == 3 branch
OUT_CH = (8, 16, 32)
B_TILE_MAX = 32          # ~0.5 MB VMEM per element per step -> 32 stays well under limits


def _pooled_taps(src_ref, n_rows, ksize, pool):
    """Fused MaxPool1d(pool) + im2col(ksize) over a batch-stacked scratch slab.

    src_ref holds conv outputs with a constant per-element block length that is a multiple
    of `pool`, so output row r / tap k maps to src rows pool*(r+k)+i and a single global
    strided read serves every batch element at once.  Returns (n_rows, ksize*C), ready for
    one MXU matmul.
    """
    pieces = []
    for k in range(ksize):
        tap = src_ref[pl.ds(pool * k, n_rows, stride=pool), :]
        for i in range(1, pool):
            tap = jnp.maximum(tap, src_ref[pl.ds(pool * k + i, n_rows, stride=pool), :])
        pieces.append(tap)
    return jnp.concatenate(pieces, axis=1)


def cellcnn_kernel(x_ref, w1_ref, b1_ref, w2_ref, b2_ref, w3_ref, b3_ref,
                   wl_ref, bl_ref, o_ref, s1_ref, s2_ref, s3_ref, s4_ref):
    cdt = x_ref.dtype                          # matmul-operand dtype (bf16)
    b_tile = o_ref.shape[1]
    m1 = x_ref.shape[1]                        # b_tile * a1
    a1 = m1 // b_tile                          # per-element block length, layer-1 rows
    a2 = a1 // POOL[0]
    a3 = a2 // POOL[1]
    a4 = a3 // POOL[2]
    m2, m3, m4 = b_tile * a2, b_tile * a3, b_tile * a4
    n_valid = o_ref.shape[2] // wl_ref.shape[1]   # valid pooled rows per element (= 6)

    # Layer 1: conv == one matmul on the wrapper-built im2col slab; f32 bias + ReLU epilogue.
    y1 = jnp.dot(x_ref[0], w1_ref[...], preferred_element_type=jnp.float32)
    s1_ref[pl.ds(0, m1), :] = jnp.maximum(y1 + b1_ref[...], 0.0)
    # TODO(synk): nn.Dropout(p=0.2) is identity in eval mode; training-mode mask not implemented.

    # Layer 2: fused maxpool(2) + im2col(16) from scratch -> one (m2, 128) x (128, 16) matmul.
    cols2 = _pooled_taps(s1_ref, m2, KSIZE[1], POOL[0]).astype(cdt)
    y2 = jnp.dot(cols2, w2_ref[...], preferred_element_type=jnp.float32)
    s2_ref[pl.ds(0, m2), :] = jnp.maximum(y2 + b2_ref[...], 0.0)

    # Layer 3: fused maxpool(2) + im2col(16) -> one (m3, 256) x (256, 32) matmul.
    cols3 = _pooled_taps(s2_ref, m3, KSIZE[2], POOL[1]).astype(cdt)
    y3 = jnp.dot(cols3, w3_ref[...], preferred_element_type=jnp.float32)
    s3_ref[...] = jnp.maximum(y3 + b3_ref[...], 0.0)

    # MaxPool1d(6) + Linear, again a single matmul for the whole batch tile.
    z3 = s3_ref[pl.ds(0, m4, stride=POOL[2]), :]
    for i in range(1, POOL[2]):
        z3 = jnp.maximum(z3, s3_ref[pl.ds(i, m4, stride=POOL[2]), :])
    y4 = jnp.dot(z3.astype(cdt), wl_ref[...], preferred_element_type=jnp.float32)
    s4_ref[...] = y4 + bl_ref[...]

    # Lane-dense output: pack the n_valid rows of each element along lanes ->
    # one (b_tile, n_valid*feat_dim) store instead of per-element (6, 32) partial stores.
    pieces = [s4_ref[pl.ds(j, b_tile, stride=a4), :] for j in range(n_valid)]
    o_ref[0] = jnp.concatenate(pieces, axis=1)


def _full_spec(a):
    zeros = (0,) * a.ndim
    return pl.BlockSpec(a.shape, lambda i, _z=zeros: _z)


def cellcnn_forward(x, params, b_tile=None, compute_dtype=jnp.bfloat16):
    """x: (B, L, C_in) -- the layout CellCNN.forward takes (it transposes internally)."""
    B, L, cin = x.shape
    w1, b1, w2, b2, w3, b3, wl, bl = params
    c1, c2, c3 = w1.shape[2], w2.shape[2], w3.shape[2]
    feat_dim = wl.shape[1]
    k1, k2, k3 = KSIZE
    p1, p2, p3 = POOL

    l1 = L - k1 + 1
    v1 = l1 // p1
    l2 = v1 - k2 + 1
    v2 = l2 // p2
    l3 = v2 - k3 + 1
    v3 = l3 // p3
    assert min(l1, l2, l3, v3) > 0, "sequence too short for CellCNN"

    # Constant per-element block length per stage; divisible by every pool stride so the
    # batch-stacked strided pooling/im2col never crosses element boundaries, and by 8 so
    # the stacked slabs stay sublane-aligned.
    unit = p1 * p2 * p3
    unit = unit * 8 // math.gcd(unit, 8)
    a1 = pl.cdiv(l1, unit) * unit
    a2 = a1 // p1
    a3 = a2 // p2
    a4 = a3 // p3

    if b_tile is None:
        # >= 2 grid steps whenever B >= 2 (both v7x TensorCores busy); <= 1 element of
        # batch-padding tail waste when B <= 2 * B_TILE_MAX.
        b_tile = max(1, min(B_TILE_MAX, pl.cdiv(B, 2)))
    nb = pl.cdiv(B, b_tile)
    bp = nb * b_tile

    # Layer-1 im2col hoisted to XLA (removes the width-3-lane shuffle from the kernel).
    cols1 = jnp.concatenate([x[:, k:k + l1, :] for k in range(k1)], axis=2)   # (B, l1, k1*cin)
    cols1 = jnp.pad(cols1, ((0, bp - B), (0, a1 - l1), (0, 0)))
    cols1 = cols1.astype(compute_dtype).reshape(nb, b_tile * a1, k1 * cin)

    # Host/XLA-side weight packing: (K, Cin, Cout) -> (K*Cin, Cout); bf16 MXU operands,
    # f32 biases for the epilogue.
    w1p = w1.reshape(-1, c1).astype(compute_dtype)
    w2p = w2.reshape(-1, c2).astype(compute_dtype)
    w3p = w3.reshape(-1, c3).astype(compute_dtype)
    wlp = wl.astype(compute_dtype)
    b1f, b2f, b3f, blf = (v.astype(jnp.float32) for v in (b1, b2, b3, bl))

    out = pl.pallas_call(
        cellcnn_kernel,
        out_shape=jax.ShapeDtypeStruct((nb, b_tile, v3 * feat_dim), jnp.float32),
        grid=(nb,),
        in_specs=[
            pl.BlockSpec((1, b_tile * a1, k1 * cin), lambda i: (i, 0, 0)),
            _full_spec(w1p), _full_spec(b1f),
            _full_spec(w2p), _full_spec(b2f),
            _full_spec(w3p), _full_spec(b3f),
            _full_spec(wlp), _full_spec(blf),
        ],
        out_specs=pl.BlockSpec((1, b_tile, v3 * feat_dim), lambda i: (i, 0, 0)),
        scratch_shapes=[
            pltpu.VMEM((b_tile * a1 + p1 * k2, c1), jnp.float32),   # conv1 out (+ tap pad)
            pltpu.VMEM((b_tile * a2 + p2 * k3, c2), jnp.float32),   # conv2 out (+ tap pad)
            pltpu.VMEM((b_tile * a3, c3), jnp.float32),             # conv3 out
            pltpu.VMEM((b_tile * a4, feat_dim), jnp.float32),       # linear out
        ],
        compiler_params=pltpu.CompilerParams(
            dimension_semantics=("parallel",)),   # batch blocks independent (v7x: 2 TCs)
    )(cols1, w1p, b1f, w2p, b2f, w3p, b3f, wlp, blf)

    return out.reshape(bp, v3, feat_dim)[:B]


def make_params(key, feat_dim=32):
    """Deterministic xavier-normal weights (as in CellCNN.init_weights) + small biases."""
    ks = jax.random.split(key, 8)

    def xavier_conv(k, cin, cout, ksz):
        std = (2.0 / (cin * ksz + cout * ksz)) ** 0.5
        w = jax.random.normal(k, (cout, cin, ksz), jnp.float32) * std  # torch layout
        return jnp.transpose(w, (2, 1, 0))                             # (K, Cin, Cout)

    w1 = xavier_conv(ks[0], IN_CH[0], OUT_CH[0], KSIZE[0])
    b1 = jax.random.normal(ks[1], (1, OUT_CH[0]), jnp.float32) * 0.01
    w2 = xavier_conv(ks[2], IN_CH[1], OUT_CH[1], KSIZE[1])
    b2 = jax.random.normal(ks[3], (1, OUT_CH[1]), jnp.float32) * 0.01
    w3 = xavier_conv(ks[4], IN_CH[2], OUT_CH[2], KSIZE[2])
    b3 = jax.random.normal(ks[5], (1, OUT_CH[2]), jnp.float32) * 0.01

    std_l = (2.0 / (OUT_CH[2] + feat_dim)) ** 0.5
    wl_t = jax.random.normal(ks[6], (feat_dim, OUT_CH[2]), jnp.float32) * std_l
    wl = jnp.transpose(wl_t)                                           # (32, feat_dim)
    bl = jax.random.normal(ks[7], (1, feat_dim), jnp.float32) * 0.01
    return (w1, b1, w2, b2, w3, b3, wl, bl)


def ref_forward(x, params):
    """Pure-JAX f32 reference with the same math (correctness check)."""
    w1, b1, w2, b2, w3, b3, wl, bl = params
    hp = jax.lax.Precision.HIGHEST

    def conv(h, w, b, ksz):
        lout = h.shape[0] - ksz + 1
        acc = jnp.zeros((lout, w.shape[2]), jnp.float32)
        for k in range(ksz):
            acc = acc + jnp.dot(h[k:k + lout], w[k], precision=hp)
        return acc + b

    def pool(h, p):
        n = h.shape[0] // p
        return jnp.max(h[: n * p].reshape(n, p, -1), axis=1)

    def one(xb):
        h = conv(xb, w1, b1, KSIZE[0]); h = jnp.maximum(h, 0.0); h = pool(h, POOL[0])
        h = conv(h, w2, b2, KSIZE[1]); h = jnp.maximum(h, 0.0); h = pool(h, POOL[1])
        h = conv(h, w3, b3, KSIZE[2]); h = jnp.maximum(h, 0.0); h = pool(h, POOL[2])
        return jnp.dot(h, wl, precision=hp) + bl

    return jax.vmap(one)(x)


if __name__ == "__main__":
    key = jax.random.PRNGKey(0)
    kx, kp = jax.random.split(key)

    B, L, CIN, FEAT_DIM = 2, 256, 3, 32
    x = jax.random.normal(kx, (B, L, CIN), jnp.float32)
    params = make_params(kp, feat_dim=FEAT_DIM)

    out = jax.block_until_ready(cellcnn_forward(x, params))
    ref = ref_forward(x, params)
    assert out.shape == ref.shape, (out.shape, ref.shape)
    max_err = float(jnp.max(jnp.abs(out - ref)))
    # bf16 matmul operands (f32 accumulate) vs an f32 reference: a few 1e-3 abs error expected.
    assert jnp.allclose(out, ref, atol=2e-2, rtol=2e-2), f"max_err={max_err}"

    print("KERNEL_OK")
</pallas_src>

<mosaic_0001>
module attributes {stable_mosaic.version = 11 : i64} {
  func.func @cellcnn_kernel(%arg0: i32, %arg1: memref<1x264x48xbf16, #tpu.memory_space<vmem>>, %arg2: memref<48x8xbf16, #tpu.memory_space<vmem>>, %arg3: memref<1x8xf32, #tpu.memory_space<vmem>>, %arg4: memref<128x16xbf16, #tpu.memory_space<vmem>>, %arg5: memref<1x16xf32, #tpu.memory_space<vmem>>, %arg6: memref<256x32xbf16, #tpu.memory_space<vmem>>, %arg7: memref<1x32xf32, #tpu.memory_space<vmem>>, %arg8: memref<32x32xbf16, #tpu.memory_space<vmem>>, %arg9: memref<1x32xf32, #tpu.memory_space<vmem>>, %arg10: memref<1x1x192xf32, #tpu.memory_space<vmem>>, %arg11: memref<296x8xf32, #tpu.memory_space<vmem>>, %arg12: memref<164x16xf32, #tpu.memory_space<vmem>>, %arg13: memref<66x32xf32, #tpu.memory_space<vmem>>, %arg14: memref<11x32xf32, #tpu.memory_space<vmem>>) attributes {dimension_semantics = [#tpu.dimension_semantics<parallel>], iteration_bounds = array<i64: 2>, scalar_prefetch = 0 : i64, scratch_operands = 4 : i64, tpu.core_type = #tpu.core_type<tc>, window_params = [{transform_indices = @transform_0, window_bounds = array<i64: 1, 264, 48>}, {pipeline_mode = #tpu.pipeline_mode<synchronous>, transform_indices = @transform_1, window_bounds = array<i64: 48, 8>}, {pipeline_mode = #tpu.pipeline_mode<synchronous>, transform_indices = @transform_2, window_bounds = array<i64: 1, 8>}, {pipeline_mode = #tpu.pipeline_mode<synchronous>, transform_indices = @transform_3, window_bounds = array<i64: 128, 16>}, {pipeline_mode = #tpu.pipeline_mode<synchronous>, transform_indices = @transform_4, window_bounds = array<i64: 1, 16>}, {pipeline_mode = #tpu.pipeline_mode<synchronous>, transform_indices = @transform_5, window_bounds = array<i64: 256, 32>}, {pipeline_mode = #tpu.pipeline_mode<synchronous>, transform_indices = @transform_6, window_bounds = array<i64: 1, 32>}, {pipeline_mode = #tpu.pipeline_mode<synchronous>, transform_indices = @transform_7, window_bounds = array<i64: 32, 32>}, {pipeline_mode = #tpu.pipeline_mode<synchronous>, transform_indices = @transform_8, window_bounds = array<i64: 1, 32>}, {transform_indices = @transform_9, window_bounds = array<i64: 1, 1, 192>}]} {
    %c0 = arith.constant 0 : index
    %c0_0 = arith.constant 0 : index
    %c0_1 = arith.constant 0 : index
    %0 = vector.load %arg1[%c0, %c0_0, %c0_1] : memref<1x264x48xbf16, #tpu.memory_space<vmem>>, vector<1x264x48xbf16>
    %1 = vector.shape_cast %0 : vector<1x264x48xbf16> to vector<264x48xbf16>
    %c0_2 = arith.constant 0 : index
    %c0_3 = arith.constant 0 : index
    %2 = vector.load %arg2[%c0_2, %c0_3] : memref<48x8xbf16, #tpu.memory_space<vmem>>, vector<48x8xbf16>
    %cst = arith.constant dense<0.000000e+00> : vector<264x8xf32>
    %3 = tpu.matmul %1, %2, %cst {dimension_numbers = #tpu.dot_dimension_numbers<[1], [0], [0], [1], [0, 0, 1, 1], [], []>} : vector<264x48xbf16>, vector<48x8xbf16>, vector<264x8xf32> -> vector<264x8xf32>
    %c0_4 = arith.constant 0 : index
    %c0_5 = arith.constant 0 : index
    %4 = vector.load %arg3[%c0_4, %c0_5] : memref<1x8xf32, #tpu.memory_space<vmem>>, vector<1x8xf32>
    %5 = vector.broadcast %4 : vector<1x8xf32> to vector<264x8xf32>
    %6 = arith.addf %3, %5 : vector<264x8xf32>
    %cst_6 = arith.constant 0.000000e+00 : f32
    %7 = vector.broadcast %cst_6 : f32 to vector<264x8xf32>
    %8 = arith.maximumf %6, %7 : vector<264x8xf32>
    %c0_7 = arith.constant 0 : index
    %c0_8 = arith.constant 0 : index
    %9 = vector.load %arg11[%c0_7, %c0_8] : memref<296x8xf32, #tpu.memory_space<vmem>>, vector<264x8xf32>
    tpu.vector_store %arg11[%c0_7, %c0_8], %8 {strides = array<i32>} : memref<296x8xf32, #tpu.memory_space<vmem>>, vector<264x8xf32>,
    %c0_9 = arith.constant 0 : index
    %c0_10 = arith.constant 0 : index
    %10 = tpu.strided_load %arg11[%c0_9, %c0_10] {strides = array<i32: 2, 1>} : memref<296x8xf32, #tpu.memory_space<vmem>>, vector<132x8xf32>
    %c1 = arith.constant 1 : index
    %c0_11 = arith.constant 0 : index
    %11 = tpu.strided_load %arg11[%c1, %c0_11] {strides = array<i32: 2, 1>} : memref<296x8xf32, #tpu.memory_space<vmem>>, vector<132x8xf32>
    %12 = arith.maximumf %10, %11 : vector<132x8xf32>
    %c2 = arith.constant 2 : index
    %c0_12 = arith.constant 0 : index
    %13 = tpu.strided_load %arg11[%c2, %c0_12] {strides = array<i32: 2, 1>} : memref<296x8xf32, #tpu.memory_space<vmem>>, vector<132x8xf32>
    %c3 = arith.constant 3 : index
    %c0_13 = arith.constant 0 : index
    %14 = tpu.strided_load %arg11[%c3, %c0_13] {strides = array<i32: 2, 1>} : memref<296x8xf32, #tpu.memory_space<vmem>>, vector<132x8xf32>
    %15 = arith.maximumf %13, %14 : vector<132x8xf32>
    %c4 = arith.constant 4 : index
    %c0_14 = arith.constant 0 : index
    %16 = tpu.strided_load %arg11[%c4, %c0_14] {strides = array<i32: 2, 1>} : memref<296x8xf32, #tpu.memory_space<vmem>>, vector<132x8xf32>
    %c5 = arith.constant 5 : index
    %c0_15 = arith.constant 0 : index
    %17 = tpu.strided_load %arg11[%c5, %c0_15] {strides = array<i32: 2, 1>} : memref<296x8xf32, #tpu.memory_space<vmem>>, vector<132x8xf32>
    %18 = arith.maximumf %16, %17 : vector<132x8xf32>
    %c6 = arith.constant 6 : index
    %c0_16 = arith.constant 0 : index
    %19 = tpu.strided_load %arg11[%c6, %c0_16] {strides = array<i32: 2, 1>} : memref<296x8xf32, #tpu.memory_space<vmem>>, vector<132x8xf32>
    %c7 = arith.constant 7 : index
    %c0_17 = arith.constant 0 : index
    %20 = tpu.strided_load %arg11[%c7, %c0_17] {strides = array<i32: 2, 1>} : memref<296x8xf32, #tpu.memory_space<vmem>>, vector<132x8xf32>
    %21 = arith.maximumf %19, %20 : vector<132x8xf32>
    %c8 = arith.constant 8 : index
    %c0_18 = arith.constant 0 : index
    %22 = tpu.strided_load %arg11[%c8, %c0_18] {strides = array<i32: 2, 1>} : memref<296x8xf32, #tpu.memory_space<vmem>>, vector<132x8xf32>
    %c9 = arith.constant 9 : index
    %c0_19 = arith.constant 0 : index
    %23 = tpu.strided_load %arg11[%c9, %c0_19] {strides = array<i32: 2, 1>} : memref<296x8xf32, #tpu.memory_space<vmem>>, vector<132x8xf32>
    %24 = arith.maximumf %22, %23 : vector<132x8xf32>
    %c10 = arith.constant 10 : index
    %c0_20 = arith.constant 0 : index
    %25 = tpu.strided_load %arg11[%c10, %c0_20] {strides = array<i32: 2, 1>} : memref<296x8xf32, #tpu.memory_space<vmem>>, vector<132x8xf32>
    %c11 = arith.constant 11 : index
    %c0_21 = arith.constant 0 : index
    %26 = tpu.strided_load %arg11[%c11, %c0_21] {strides = array<i32: 2, 1>} : memref<296x8xf32, #tpu.memory_space<vmem>>, vector<132x8xf32>
    %27 = arith.maximumf %25, %26 : vector<132x8xf32>
    %c12 = arith.constant 12 : index
    %c0_22 = arith.constant 0 : index
    %28 = tpu.strided_load %arg11[%c12, %c0_22] {strides = array<i32: 2, 1>} : memref<296x8xf32, #tpu.memory_space<vmem>>, vector<132x8xf32>
    %c13 = arith.constant 13 : index
    %c0_23 = arith.constant 0 : index
    %29 = tpu.strided_load %arg11[%c13, %c0_23] {strides = array<i32: 2, 1>} : memref<296x8xf32, #tpu.memory_space<vmem>>, vector<132x8xf32>
    %30 = arith.maximumf %28, %29 : vector<132x8xf32>
    %c14 = arith.constant 14 : index
    %c0_24 = arith.constant 0 : index
    %31 = tpu.strided_load %arg11[%c14, %c0_24] {strides = array<i32: 2, 1>} : memref<296x8xf32, #tpu.memory_space<vmem>>, vector<132x8xf32>
    %c15 = arith.constant 15 : index
    %c0_25 = arith.constant 0 : index
    %32 = tpu.strided_load %arg11[%c15, %c0_25] {strides = array<i32: 2, 1>} : memref<296x8xf32, #tpu.memory_space<vmem>>, vector<132x8xf32>
    %33 = arith.maximumf %31, %32 : vector<132x8xf32>
    %c16 = arith.constant 16 : index
    %c0_26 = arith.constant 0 : index
    %34 = tpu.strided_load %arg11[%c16, %c0_26] {strides = array<i32: 2, 1>} : memref<296x8xf32, #tpu.memory_space<vmem>>, vector<132x8xf32>
    %c17 = arith.constant 17 : index
    %c0_27 = arith.constant 0 : index
    %35 = tpu.strided_load %arg11[%c17, %c0_27] {strides = array<i32: 2, 1>} : memref<296x8xf32, #tpu.memory_space<vmem>>, vector<132x8xf32>
    %36 = arith.maximumf %34, %35 : vector<132x8xf32>
    %c18 = arith.constant 18 : index
    %c0_28 = arith.constant 0 : index
    %37 = tpu.strided_load %arg11[%c18, %c0_28] {strides = array<i32: 2, 1>} : memref<296x8xf32, #tpu.memory_space<vmem>>, vector<132x8xf32>
    %c19 = arith.constant 19 : index
    %c0_29 = arith.constant 0 : index
    %38 = tpu.strided_load %arg11[%c19, %c0_29] {strides = array<i32: 2, 1>} : memref<296x8xf32, #tpu.memory_space<vmem>>, vector<132x8xf32>
    %39 = arith.maximumf %37, %38 : vector<132x8xf32>
    %c20 = arith.constant 20 : index
    %c0_30 = arith.constant 0 : index
    %40 = tpu.strided_load %arg11[%c20, %c0_30] {strides = array<i32: 2, 1>} : memref<296x8xf32, #tpu.memory_space<vmem>>, vector<132x8xf32>
    %c21 = arith.constant 21 : index
    %c0_31 = arith.constant 0 : index
    %41 = tpu.strided_load %arg11[%c21, %c0_31] {strides = array<i32: 2, 1>} : memref<296x8xf32, #tpu.memory_space<vmem>>, vector<132x8xf32>
    %42 = arith.maximumf %40, %41 : vector<132x8xf32>
    %c22 = arith.constant 22 : index
    %c0_32 = arith.constant 0 : index
    %43 = tpu.strided_load %arg11[%c22, %c0_32] {strides = array<i32: 2, 1>} : memref<296x8xf32, #tpu.memory_space<vmem>>, vector<132x8xf32>
    %c23 = arith.constant 23 : index
    %c0_33 = arith.constant 0 : index
    %44 = tpu.strided_load %arg11[%c23, %c0_33] {strides = array<i32: 2, 1>} : memref<296x8xf32, #tpu.memory_space<vmem>>, vector<132x8xf32>
    %45 = arith.maximumf %43, %44 : vector<132x8xf32>
    %c24 = arith.constant 24 : index
    %c0_34 = arith.constant 0 : index
    %46 = tpu.strided_load %arg11[%c24, %c0_34] {strides = array<i32: 2, 1>} : memref<296x8xf32, #tpu.memory_space<vmem>>, vector<132x8xf32>
    %c25 = arith.constant 25 : index
    %c0_35 = arith.constant 0 : index
    %47 = tpu.strided_load %arg11[%c25, %c0_35] {strides = array<i32: 2, 1>} : memref<296x8xf32, #tpu.memory_space<vmem>>, vector<132x8xf32>
    %48 = arith.maximumf %46, %47 : vector<132x8xf32>
    %c26 = arith.constant 26 : index
    %c0_36 = arith.constant 0 : index
    %49 = tpu.strided_load %arg11[%c26, %c0_36] {strides = array<i32: 2, 1>} : memref<296x8xf32, #tpu.memory_space<vmem>>, vector<132x8xf32>
    %c27 = arith.constant 27 : index
    %c0_37 = arith.constant 0 : index
    %50 = tpu.strided_load %arg11[%c27, %c0_37] {strides = array<i32: 2, 1>} : memref<296x8xf32, #tpu.memory_space<vmem>>, vector<132x8xf32>
    %51 = arith.maximumf %49, %50 : vector<132x8xf32>
    %c28 = arith.constant 28 : index
    %c0_38 = arith.constant 0 : index
    %52 = tpu.strided_load %arg11[%c28, %c0_38] {strides = array<i32: 2, 1>} : memref<296x8xf32, #tpu.memory_space<vmem>>, vector<132x8xf32>
    %c29 = arith.constant 29 : index
    %c0_39 = arith.constant 0 : index
    %53 = tpu.strided_load %arg11[%c29, %c0_39] {strides = array<i32: 2, 1>} : memref<296x8xf32, #tpu.memory_space<vmem>>, vector<132x8xf32>
    %54 = arith.maximumf %52, %53 : vector<132x8xf32>
    %c30 = arith.constant 30 : index
    %c0_40 = arith.constant 0 : index
    %55 = tpu.strided_load %arg11[%c30, %c0_40] {strides = array<i32: 2, 1>} : memref<296x8xf32, #tpu.memory_space<vmem>>, vector<132x8xf32>
    %c31 = arith.constant 31 : index
    %c0_41 = arith.constant 0 : index
    %56 = tpu.strided_load %arg11[%c31, %c0_41] {strides = array<i32: 2, 1>} : memref<296x8xf32, #tpu.memory_space<vmem>>, vector<132x8xf32>
    %57 = arith.maximumf %55, %56 : vector<132x8xf32>
    %58 = tpu.concatenate %12, %15, %18, %21, %24, %27, %30, %33, %36, %39, %42, %45, %48, %51, %54, %57 in 1 : vector<132x8xf32>, vector<132x8xf32>, vector<132x8xf32>, vector<132x8xf32>, vector<132x8xf32>, vector<132x8xf32>, vector<132x8xf32>, vector<132x8xf32>, vector<132x8xf32>, vector<132x8xf32>, vector<132x8xf32>, vector<132x8xf32>, vector<132x8xf32>, vector<132x8xf32>, vector<132x8xf32>, vector<132x8xf32> -> vector<132x128xf32>
    %59 = arith.truncf %58 : vector<132x128xf32> to vector<132x128xbf16>
    %c0_42 = arith.constant 0 : index
    %c0_43 = arith.constant 0 : index
    %60 = vector.load %arg4[%c0_42, %c0_43] : memref<128x16xbf16, #tpu.memory_space<vmem>>, vector<128x16xbf16>
    %cst_44 = arith.constant dense<0.000000e+00> : vector<132x16xf32>
    %61 = tpu.matmul %59, %60, %cst_44 {dimension_numbers = #tpu.dot_dimension_numbers<[1], [0], [0], [1], [0, 0, 1, 1], [], []>} : vector<132x128xbf16>, vector<128x16xbf16>, vector<132x16xf32> -> vector<132x16xf32>
    %c0_45 = arith.constant 0 : index
    %c0_46 = arith.constant 0 : index
    %62 = vector.load %arg5[%c0_45, %c0_46] : memref<1x16xf32, #tpu.memory_space<vmem>>, vector<1x16xf32>
    %63 = vector.broadcast %62 : vector<1x16xf32> to vector<132x16xf32>
    %64 = arith.addf %61, %63 : vector<132x16xf32>
    %cst_47 = arith.constant 0.000000e+00 : f32
    %65 = vector.broadcast %cst_47 : f32 to vector<132x16xf32>
    %66 = arith.maximumf %64, %65 : vector<132x16xf32>
    %c0_48 = arith.constant 0 : index
    %c0_49 = arith.constant 0 : index
    %67 = vector.load %arg12[%c0_48, %c0_49] : memref<164x16xf32, #tpu.memory_space<vmem>>, vector<132x16xf32>
    tpu.vector_store %arg12[%c0_48, %c0_49], %66 {strides = array<i32>} : memref<164x16xf32, #tpu.memory_space<vmem>>, vector<132x16xf32>,
    %c0_50 = arith.constant 0 : index
    %c0_51 = arith.constant 0 : index
    %68 = tpu.strided_load %arg12[%c0_50, %c0_51] {strides = array<i32: 2, 1>} : memref<164x16xf32, #tpu.memory_space<vmem>>, vector<66x16xf32>
    %c1_52 = arith.constant 1 : index
    %c0_53 = arith.constant 0 : index
    %69 = tpu.strided_load %arg12[%c1_52, %c0_53] {strides = array<i32: 2, 1>} : memref<164x16xf32, #tpu.memory_space<vmem>>, vector<66x16xf32>
    %70 = arith.maximumf %68, %69 : vector<66x16xf32>
    %c2_54 = arith.constant 2 : index
    %c0_55 = arith.constant 0 : index
    %71 = tpu.strided_load %arg12[%c2_54, %c0_55] {strides = array<i32: 2, 1>} : memref<164x16xf32, #tpu.memory_space<vmem>>, vector<66x16xf32>
    %c3_56 = arith.constant 3 : index
    %c0_57 = arith.constant 0 : index
    %72 = tpu.strided_load %arg12[%c3_56, %c0_57] {strides = array<i32: 2, 1>} : memref<164x16xf32, #tpu.memory_space<vmem>>, vector<66x16xf32>
    %73 = arith.maximumf %71, %72 : vector<66x16xf32>
    %c4_58 = arith.constant 4 : index
    %c0_59 = arith.constant 0 : index
    %74 = tpu.strided_load %arg12[%c4_58, %c0_59] {strides = array<i32: 2, 1>} : memref<164x16xf32, #tpu.memory_space<vmem>>, vector<66x16xf32>
    %c5_60 = arith.constant 5 : index
    %c0_61 = arith.constant 0 : index
    %75 = tpu.strided_load %arg12[%c5_60, %c0_61] {strides = array<i32: 2, 1>} : memref<164x16xf32, #tpu.memory_space<vmem>>, vector<66x16xf32>
    %76 = arith.maximumf %74, %75 : vector<66x16xf32>
    %c6_62 = arith.constant 6 : index
    %c0_63 = arith.constant 0 : index
    %77 = tpu.strided_load %arg12[%c6_62, %c0_63] {strides = array<i32: 2, 1>} : memref<164x16xf32, #tpu.memory_space<vmem>>, vector<66x16xf32>
    %c7_64 = arith.constant 7 : index
    %c0_65 = arith.constant 0 : index
    %78 = tpu.strided_load %arg12[%c7_64, %c0_65] {strides = array<i32: 2, 1>} : memref<164x16xf32, #tpu.memory_space<vmem>>, vector<66x16xf32>
    %79 = arith.maximumf %77, %78 : vector<66x16xf32>
    %c8_66 = arith.constant 8 : index
    %c0_67 = arith.constant 0 : index
    %80 = tpu.strided_load %arg12[%c8_66, %c0_67] {strides = array<i32: 2, 1>} : memref<164x16xf32, #tpu.memory_space<vmem>>, vector<66x16xf32>
    %c9_68 = arith.constant 9 : index
    %c0_69 = arith.constant 0 : index
    %81 = tpu.strided_load %arg12[%c9_68, %c0_69] {strides = array<i32: 2, 1>} : memref<164x16xf32, #tpu.memory_space<vmem>>, vector<66x16xf32>
    %82 = arith.maximumf %80, %81 : vector<66x16xf32>
    %c10_70 = arith.constant 10 : index
    %c0_71 = arith.constant 0 : index
    %83 = tpu.strided_load %arg12[%c10_70, %c0_71] {strides = array<i32: 2, 1>} : memref<164x16xf32, #tpu.memory_space<vmem>>, vector<66x16xf32>
    %c11_72 = arith.constant 11 : index
    %c0_73 = arith.constant 0 : index
    %84 = tpu.strided_load %arg12[%c11_72, %c0_73] {strides = array<i32: 2, 1>} : memref<164x16xf32, #tpu.memory_space<vmem>>, vector<66x16xf32>
    %85 = arith.maximumf %83, %84 : vector<66x16xf32>
    %c12_74 = arith.constant 12 : index
    %c0_75 = arith.constant 0 : index
    %86 = tpu.strided_load %arg12[%c12_74, %c0_75] {strides = array<i32: 2, 1>} : memref<164x16xf32, #tpu.memory_space<vmem>>, vector<66x16xf32>
    %c13_76 = arith.constant 13 : index
    %c0_77 = arith.constant 0 : index
    %87 = tpu.strided_load %arg12[%c13_76, %c0_77] {strides = array<i32: 2, 1>} : memref<164x16xf32, #tpu.memory_space<vmem>>, vector<66x16xf32>
    %88 = arith.maximumf %86, %87 : vector<66x16xf32>
    %c14_78 = arith.constant 14 : index
    %c0_79 = arith.constant 0 : index
    %89 = tpu.strided_load %arg12[%c14_78, %c0_79] {strides = array<i32: 2, 1>} : memref<164x16xf32, #tpu.memory_space<vmem>>, vector<66x16xf32>
    %c15_80 = arith.constant 15 : index
    %c0_81 = arith.constant 0 : index
    %90 = tpu.strided_load %arg12[%c15_80, %c0_81] {strides = array<i32: 2, 1>} : memref<164x16xf32, #tpu.memory_space<vmem>>, vector<66x16xf32>
    %91 = arith.maximumf %89, %90 : vector<66x16xf32>
    %c16_82 = arith.constant 16 : index
    %c0_83 = arith.constant 0 : index
    %92 = tpu.strided_load %arg12[%c16_82, %c0_83] {strides = array<i32: 2, 1>} : memref<164x16xf32, #tpu.memory_space<vmem>>, vector<66x16xf32>
    %c17_84 = arith.constant 17 : index
    %c0_85 = arith.constant 0 : index
    %93 = tpu.strided_load %arg12[%c17_84, %c0_85] {strides = array<i32: 2, 1>} : memref<164x16xf32, #tpu.memory_space<vmem>>, vector<66x16xf32>
    %94 = arith.maximumf %92, %93 : vector<66x16xf32>
    %c18_86 = arith.constant 18 : index
    %c0_87 = arith.constant 0 : index
    %95 = tpu.strided_load %arg12[%c18_86, %c0_87] {strides = array<i32: 2, 1>} : memref<164x16xf32, #tpu.memory_space<vmem>>, vector<66x16xf32>
    %c19_88 = arith.constant 19 : index
    %c0_89 = arith.constant 0 : index
    %96 = tpu.strided_load %arg12[%c19_88, %c0_89] {strides = array<i32: 2, 1>} : memref<164x16xf32, #tpu.memory_space<vmem>>, vector<66x16xf32>
    %97 = arith.maximumf %95, %96 : vector<66x16xf32>
    %c20_90 = arith.constant 20 : index
    %c0_91 = arith.constant 0 : index
    %98 = tpu.strided_load %arg12[%c20_90, %c0_91] {strides = array<i32: 2, 1>} : memref<164x16xf32, #tpu.memory_space<vmem>>, vector<66x16xf32>
    %c21_92 = arith.constant 21 : index
    %c0_93 = arith.constant 0 : index
    %99 = tpu.strided_load %arg12[%c21_92, %c0_93] {strides = array<i32: 2, 1>} : memref<164x16xf32, #tpu.memory_space<vmem>>, vector<66x16xf32>
    %100 = arith.maximumf %98, %99 : vector<66x16xf32>
    %c22_94 = arith.constant 22 : index
    %c0_95 = arith.constant 0 : index
    %101 = tpu.strided_load %arg12[%c22_94, %c0_95] {strides = array<i32: 2, 1>} : memref<164x16xf32, #tpu.memory_space<vmem>>, vector<66x16xf32>
    %c23_96 = arith.constant 23 : index
    %c0_97 = arith.constant 0 : index
    %102 = tpu.strided_load %arg12[%c23_96, %c0_97] {strides = array<i32: 2, 1>} : memref<164x16xf32, #tpu.memory_space<vmem>>, vector<66x16xf32>
    %103 = arith.maximumf %101, %102 : vector<66x16xf32>
    %c24_98 = arith.constant 24 : index
    %c0_99 = arith.constant 0 : index
    %104 = tpu.strided_load %arg12[%c24_98, %c0_99] {strides = array<i32: 2, 1>} : memref<164x16xf32, #tpu.memory_space<vmem>>, vector<66x16xf32>
    %c25_100 = arith.constant 25 : index
    %c0_101 = arith.constant 0 : index
    %105 = tpu.strided_load %arg12[%c25_100, %c0_101] {strides = array<i32: 2, 1>} : memref<164x16xf32, #tpu.memory_space<vmem>>, vector<66x16xf32>
    %106 = arith.maximumf %104, %105 : vector<66x16xf32>
    %c26_102 = arith.constant 26 : index
    %c0_103 = arith.constant 0 : index
    %107 = tpu.strided_load %arg12[%c26_102, %c0_103] {strides = array<i32: 2, 1>} : memref<164x16xf32, #tpu.memory_space<vmem>>, vector<66x16xf32>
    %c27_104 = arith.constant 27 : index
    %c0_105 = arith.constant 0 : index
    %108 = tpu.strided_load %arg12[%c27_104, %c0_105] {strides = array<i32: 2, 1>} : memref<164x16xf32, #tpu.memory_space<vmem>>, vector<66x16xf32>
    %109 = arith.maximumf %107, %108 : vector<66x16xf32>
    %c28_106 = arith.constant 28 : index
    %c0_107 = arith.constant 0 : index
    %110 = tpu.strided_load %arg12[%c28_106, %c0_107] {strides = array<i32: 2, 1>} : memref<164x16xf32, #tpu.memory_space<vmem>>, vector<66x16xf32>
    %c29_108 = arith.constant 29 : index
    %c0_109 = arith.constant 0 : index
    %111 = tpu.strided_load %arg12[%c29_108, %c0_109] {strides = array<i32: 2, 1>} : memref<164x16xf32, #tpu.memory_space<vmem>>, vector<66x16xf32>
    %112 = arith.maximumf %110, %111 : vector<66x16xf32>
    %c30_110 = arith.constant 30 : index
    %c0_111 = arith.constant 0 : index
    %113 = tpu.strided_load %arg12[%c30_110, %c0_111] {strides = array<i32: 2, 1>} : memref<164x16xf32, #tpu.memory_space<vmem>>, vector<66x16xf32>
    %c31_112 = arith.constant 31 : index
    %c0_113 = arith.constant 0 : index
    %114 = tpu.strided_load %arg12[%c31_112, %c0_113] {strides = array<i32: 2, 1>} : memref<164x16xf32, #tpu.memory_space<vmem>>, vector<66x16xf32>
    %115 = arith.maximumf %113, %114 : vector<66x16xf32>
    %116 = tpu.concatenate %70, %73, %76, %79, %82, %85, %88, %91, %94, %97, %100, %103, %106, %109, %112, %115 in 1 : vector<66x16xf32>, vector<66x16xf32>, vector<66x16xf32>, vector<66x16xf32>, vector<66x16xf32>, vector<66x16xf32>, vector<66x16xf32>, vector<66x16xf32>, vector<66x16xf32>, vector<66x16xf32>, vector<66x16xf32>, vector<66x16xf32>, vector<66x16xf32>, vector<66x16xf32>, vector<66x16xf32>, vector<66x16xf32> -> vector<66x256xf32>
    %117 = arith.truncf %116 : vector<66x256xf32> to vector<66x256xbf16>
    %c0_114 = arith.constant 0 : index
    %c0_115 = arith.constant 0 : index
    %118 = vector.load %arg6[%c0_114, %c0_115] : memref<256x32xbf16, #tpu.memory_space<vmem>>, vector<256x32xbf16>
    %cst_116 = arith.constant dense<0.000000e+00> : vector<66x32xf32>
    %119 = tpu.matmul %117, %118, %cst_116 {dimension_numbers = #tpu.dot_dimension_numbers<[1], [0], [0], [1], [0, 0, 1, 1], [], []>} : vector<66x256xbf16>, vector<256x32xbf16>, vector<66x32xf32> -> vector<66x32xf32>
    %c0_117 = arith.constant 0 : index
    %c0_118 = arith.constant 0 : index
    %120 = vector.load %arg7[%c0_117, %c0_118] : memref<1x32xf32, #tpu.memory_space<vmem>>, vector<1x32xf32>
    %121 = vector.broadcast %120 : vector<1x32xf32> to vector<66x32xf32>
    %122 = arith.addf %119, %121 : vector<66x32xf32>
    %cst_119 = arith.constant 0.000000e+00 : f32
    %123 = vector.broadcast %cst_119 : f32 to vector<66x32xf32>
    %124 = arith.maximumf %122, %123 : vector<66x32xf32>
    %c0_120 = arith.constant 0 : index
    %c0_121 = arith.constant 0 : index
    %125 = vector.load %arg13[%c0_120, %c0_121] : memref<66x32xf32, #tpu.memory_space<vmem>>, vector<66x32xf32>
    tpu.vector_store %arg13[%c0_120, %c0_121], %124 {strides = array<i32>} : memref<66x32xf32, #tpu.memory_space<vmem>>, vector<66x32xf32>,
    %c0_122 = arith.constant 0 : index
    %c0_123 = arith.constant 0 : index
    %126 = tpu.strided_load %arg13[%c0_122, %c0_123] {strides = array<i32: 6, 1>} : memref<66x32xf32, #tpu.memory_space<vmem>>, vector<11x32xf32>
    %c1_124 = arith.constant 1 : index
    %c0_125 = arith.constant 0 : index
    %127 = tpu.strided_load %arg13[%c1_124, %c0_125] {strides = array<i32: 6, 1>} : memref<66x32xf32, #tpu.memory_space<vmem>>, vector<11x32xf32>
    %128 = arith.maximumf %126, %127 : vector<11x32xf32>
    %c2_126 = arith.constant 2 : index
    %c0_127 = arith.constant 0 : index
    %129 = tpu.strided_load %arg13[%c2_126, %c0_127] {strides = array<i32: 6, 1>} : memref<66x32xf32, #tpu.memory_space<vmem>>, vector<11x32xf32>
    %130 = arith.maximumf %128, %129 : vector<11x32xf32>
    %c3_128 = arith.constant 3 : index
    %c0_129 = arith.constant 0 : index
    %131 = tpu.strided_load %arg13[%c3_128, %c0_129] {strides = array<i32: 6, 1>} : memref<66x32xf32, #tpu.memory_space<vmem>>, vector<11x32xf32>
    %132 = arith.maximumf %130, %131 : vector<11x32xf32>
    %c4_130 = arith.constant 4 : index
    %c0_131 = arith.constant 0 : index
    %133 = tpu.strided_load %arg13[%c4_130, %c0_131] {strides = array<i32: 6, 1>} : memref<66x32xf32, #tpu.memory_space<vmem>>, vector<11x32xf32>
    %134 = arith.maximumf %132, %133 : vector<11x32xf32>
    %c5_132 = arith.constant 5 : index
    %c0_133 = arith.constant 0 : index
    %135 = tpu.strided_load %arg13[%c5_132, %c0_133] {strides = array<i32: 6, 1>} : memref<66x32xf32, #tpu.memory_space<vmem>>, vector<11x32xf32>
    %136 = arith.maximumf %134, %135 : vector<11x32xf32>
    %137 = arith.truncf %136 : vector<11x32xf32> to vector<11x32xbf16>
    %c0_134 = arith.constant 0 : index
    %c0_135 = arith.constant 0 : index
    %138 = vector.load %arg8[%c0_134, %c0_135] : memref<32x32xbf16, #tpu.memory_space<vmem>>, vector<32x32xbf16>
    %cst_136 = arith.constant dense<0.000000e+00> : vector<11x32xf32>
    %139 = tpu.matmul %137, %138, %cst_136 {dimension_numbers = #tpu.dot_dimension_numbers<[1], [0], [0], [1], [0, 0, 1, 1], [], []>} : vector<11x32xbf16>, vector<32x32xbf16>, vector<11x32xf32> -> vector<11x32xf32>
    %c0_137 = arith.constant 0 : index
    %c0_138 = arith.constant 0 : index
    %140 = vector.load %arg9[%c0_137, %c0_138] : memref<1x32xf32, #tpu.memory_space<vmem>>, vector<1x32xf32>
    %141 = vector.broadcast %140 : vector<1x32xf32> to vector<11x32xf32>
    %142 = arith.addf %139, %141 : vector<11x32xf32>
    %c0_139 = arith.constant 0 : index
    %c0_140 = arith.constant 0 : index
    %143 = vector.load %arg14[%c0_139, %c0_140] : memref<11x32xf32, #tpu.memory_space<vmem>>, vector<11x32xf32>
    tpu.vector_store %arg14[%c0_139, %c0_140], %142 {strides = array<i32>} : memref<11x32xf32, #tpu.memory_space<vmem>>, vector<11x32xf32>,
    %c0_141 = arith.constant 0 : index
    %c0_142 = arith.constant 0 : index
    %144 = tpu.strided_load %arg14[%c0_141, %c0_142] {strides = array<i32: 11, 1>} : memref<11x32xf32, #tpu.memory_space<vmem>>, vector<1x32xf32>
    %c1_143 = arith.constant 1 : index
    %c0_144 = arith.constant 0 : index
    %145 = tpu.strided_load %arg14[%c1_143, %c0_144] {strides = array<i32: 11, 1>} : memref<11x32xf32, #tpu.memory_space<vmem>>, vector<1x32xf32>
    %c2_145 = arith.constant 2 : index
    %c0_146 = arith.constant 0 : index
    %146 = tpu.strided_load %arg14[%c2_145, %c0_146] {strides = array<i32: 11, 1>} : memref<11x32xf32, #tpu.memory_space<vmem>>, vector<1x32xf32>
    %c3_147 = arith.constant 3 : index
    %c0_148 = arith.constant 0 : index
    %147 = tpu.strided_load %arg14[%c3_147, %c0_148] {strides = array<i32: 11, 1>} : memref<11x32xf32, #tpu.memory_space<vmem>>, vector<1x32xf32>
    %c4_149 = arith.constant 4 : index
    %c0_150 = arith.constant 0 : index
    %148 = tpu.strided_load %arg14[%c4_149, %c0_150] {strides = array<i32: 11, 1>} : memref<11x32xf32, #tpu.memory_space<vmem>>, vector<1x32xf32>
    %c5_151 = arith.constant 5 : index
    %c0_152 = arith.constant 0 : index
    %149 = tpu.strided_load %arg14[%c5_151, %c0_152] {strides = array<i32: 11, 1>} : memref<11x32xf32, #tpu.memory_space<vmem>>, vector<1x32xf32>
    %150 = tpu.concatenate %144, %145, %146, %147, %148, %149 in 1 : vector<1x32xf32>, vector<1x32xf32>, vector<1x32xf32>, vector<1x32xf32>, vector<1x32xf32>, vector<1x32xf32> -> vector<1x192xf32>
    %c0_153 = arith.constant 0 : index
    %c0_154 = arith.constant 0 : index
    %c0_155 = arith.constant 0 : index
    %151 = vector.load %arg10[%c0_153, %c0_154, %c0_155] : memref<1x1x192xf32, #tpu.memory_space<vmem>>, vector<1x1x192xf32>
    %152 = vector.shape_cast %151 : vector<1x1x192xf32> to vector<1x192xf32>
    %153 = vector.shape_cast %150 : vector<1x192xf32> to vector<1x1x192xf32>
    tpu.vector_store %arg10[%c0_153, %c0_154, %c0_155], %153 {strides = array<i32>} : memref<1x1x192xf32, #tpu.memory_space<vmem>>, vector<1x1x192xf32>,
    return
  }
  func.func @transform_0(%arg0: i32) -> (i32, i32, i32) {
    %c0_i32 = arith.constant 0 : i32
    %c0_i32_0 = arith.constant 0 : i32
    %c0_i32_1 = arith.constant 0 : i32
    return %arg0, %c0_i32, %c0_i32_0 : i32, i32, i32
  }
  func.func @transform_1(%arg0: i32) -> (i32, i32) {
    %c0_i32 = arith.constant 0 : i32
    %c0_i32_0 = arith.constant 0 : i32
    %c0_i32_1 = arith.constant 0 : i32
    return %c0_i32, %c0_i32_0 : i32, i32
  }
  func.func @transform_2(%arg0: i32) -> (i32, i32) {
    %c0_i32 = arith.constant 0 : i32
    %c0_i32_0 = arith.constant 0 : i32
    %c0_i32_1 = arith.constant 0 : i32
    return %c0_i32, %c0_i32_0 : i32, i32
  }
  func.func @transform_3(%arg0: i32) -> (i32, i32) {
    %c0_i32 = arith.constant 0 : i32
    %c0_i32_0 = arith.constant 0 : i32
    %c0_i32_1 = arith.constant 0 : i32
    return %c0_i32, %c0_i32_0 : i32, i32
  }
  func.func @transform_4(%arg0: i32) -> (i32, i32) {
    %c0_i32 = arith.constant 0 : i32
    %c0_i32_0 = arith.constant 0 : i32
    %c0_i32_1 = arith.constant 0 : i32
    return %c0_i32, %c0_i32_0 : i32, i32
  }
  func.func @transform_5(%arg0: i32) -> (i32, i32) {
    %c0_i32 = arith.constant 0 : i32
    %c0_i32_0 = arith.constant 0 : i32
    %c0_i32_1 = arith.constant 0 : i32
    return %c0_i32, %c0_i32_0 : i32, i32
  }
  func.func @transform_6(%arg0: i32) -> (i32, i32) {
    %c0_i32 = arith.constant 0 : i32
    %c0_i32_0 = arith.constant 0 : i32
    %c0_i32_1 = arith.constant 0 : i32
    return %c0_i32, %c0_i32_0 : i32, i32
  }
  func.func @transform_7(%arg0: i32) -> (i32, i32) {
    %c0_i32 = arith.constant 0 : i32
    %c0_i32_0 = arith.constant 0 : i32
    %c0_i32_1 = arith.constant 0 : i32
    return %c0_i32, %c0_i32_0 : i32, i32
  }
  func.func @transform_8(%arg0: i32) -> (i32, i32) {
    %c0_i32 = arith.constant 0 : i32
    %c0_i32_0 = arith.constant 0 : i32
    %c0_i32_1 = arith.constant 0 : i32
    return %c0_i32, %c0_i32_0 : i32, i32
  }
  func.func @transform_9(%arg0: i32) -> (i32, i32, i32) {
    %c0_i32 = arith.constant 0 : i32
    %c0_i32_0 = arith.constant 0 : i32
    %c0_i32_1 = arith.constant 0 : i32
    return %arg0, %c0_i32, %c0_i32_0 : i32, i32, i32
  }
}

</mosaic_0001>

<bundles_post_ra>
// kernel: tpu_custom_call.1
= control target key start
LH: loop header
LB: loop body
LE: loop exit
PB: predicated region body
PF: predicated region fallthrough
CT: control target
= control target key end

     0   :  { %s7159_s0 = inlined_call_operand.vmem [shape: bf16[2,264,48], index: 0, kind: input, shape index: {}]   ;;  %s7160_s1 = inlined_call_operand.vmem [shape: bf16[48,8], index: 1, kind: input, shape index: {}]   ;;  %s7161_s2 = inlined_call_operand.vmem [shape: f32[1,8], index: 2, kind: input, shape index: {}]   ;;  %s7162_s3 = inlined_call_operand.vmem [shape: bf16[128,16], index: 3, kind: input, shape index: {}]   ;;  %s7163_s4 = inlined_call_operand.vmem [shape: f32[1,16], index: 4, kind: input, shape index: {}]   ;;  %s7164_s5 = inlined_call_operand.vmem [shape: bf16[256,32], index: 5, kind: input, shape index: {}]   ;;  %s7165_s6 = inlined_call_operand.vmem [shape: f32[1,32], index: 6, kind: input, shape index: {}]   ;;  %s7166_s7 = inlined_call_operand.vmem [shape: bf16[32,32], index: 7, kind: input, shape index: {}]   ;;  %s7167_s8 = inlined_call_operand.vmem [shape: f32[1,32], index: 8, kind: input, shape index: {}]   ;;  %s7168_s9 = inlined_call_operand.hbm [shape: f32[2,1,192], index: 9, kind: output, shape index: {}]  }
   0x1   :  { %7201 = sst [smem:[#allocation11_spill]] %s7159_s0 }
   0x2   :  { %7202 = sst [smem:[#allocation12_spill]] %s7160_s1 }
   0x3   :  { %7203 = sst [smem:[#allocation13_spill]] %s7161_s2 }
   0x4   :  { %14 = vsyncpa [#allocation7], 0 }
   0x5   :  { %16 = vsyncpa [#allocation7 + $0x1], 0  ;;  %s5497_s30 = smov 0   ;;  %s5499_s10 = smov 0  }
   0x6   :  { %s5501_s11 = smov 0   ;;  %s5503_s12 = smov 0  }
   0x7 LB: > { %s5518_s13 = sadd.s32 4294967295, %s5426_s12   ;;  %s4187_s14 = sadd.s32 4294967294, %s5426_s12   ;;  %s5426_s12 = sphi %s5503_s12, %s7232_s12   ;;  %s5422_s11 = sphi %s5501_s11, %s7231_s11   ;;  %s5418_s10 = sphi %s5499_s10, %s7230_s10   ;;  %s5414_s30 = sphi %s5497_s30, %s7229_s30  }
   0x8   : > { %s5522_s15 = sadd.s32 1, %s5426_s12   ;;  %s223_s16 = sadd.s32 1, %s5422_s11 }
   0x9   : > { %s220_s17 = ssub.s32 %s5426_s12, %s5522_s15  ;;  %p233_p0 = scmp.ne.s32.totalorder %s5422_s11, %s5418_s10 }
   0xa   : > { %p221_p1 = scmp.eq.s32.totalorder %s220_s17, 0  ;;  %p234_p2 = scmp.eq.s32.totalorder %s5518_s13, 1 }
   0xb   : > { %p239_p3 = scmp.ne.s32.totalorder %s5418_s10, %s5414_s30  ;;  %p240_p4 = scmp.eq.s32.totalorder %s4187_s14, 1 }
   0xc   : > { %s5533_s18 = scalar_select %p221_p1, %s5422_s11, %s223_s16  }
   0xd   : > { %p5535_p5 = por %p234_p2, %p233_p0  ;;  %p5539_p6 = por %p240_p4, %p239_p3 }
   0xe   : > { %p4190_p7 = scmp.ge.s32.totalorder %s5426_s12, 1  ;;  %p290_p8 = scmp.lt.s32.totalorder %s5426_s12, 3 }
  0x10   : > { %p291_p9 = pnand %p4190_p7, %p290_p8 }
  0x12   : > { %294 = sbr.rel (%p291_p9) target bundleno = 1571 (0x623), region = 56 }
  0x17   : > { %s7206_s1 = sld [smem:[#allocation12_spill]]  ;;  %v7199_v1 = vmov 0.0   ;;  %vm5429_vm0 = vmmov 0   ;;  %p326_p10 = scmp.lt.s32.totalorder %s5518_s13, 1  ;;  %vm479_vm1 = vcmask 392192   ;;  %vm732_vm2 = vcmask 64512  }
  0x18   : > { %4353 = vmatprep.subr.bf16.mxu0 %v7199_v1  ;;  %4427 = vmatprep.subr.bf16.mxu1 %v7199_v1  ;;  %s7207_s0 = sld [smem:[#allocation11_spill]]  ;;  %v1138_v14 = vld [vmem:[#allocation2 + $0x108] ss:$2 sm:$0xf]  ;;  %s7179_s17 = smov 32   ;;  %vm2441_vm3 = vcmask 130048  }
  0x19   : > { %4359 = vmatprep.mubr.msk.bf16.mxu0 %vm5429_vm0, %v7199_v1  ;;  %4443 = vmatprep.mubr.msk.bf16.mxu1 %vm5429_vm0, %v7199_v1  ;;  %s327_s25 = scalar_select %p326_p10, %s5518_s13, 1  ;;  %v1172_v15 = vld [vmem:[#allocation2 + $0x109] ss:$2 sm:$0xf]  ;;  %vm2459_vm4 = vcmask 195584   ;;  %vm2477_vm5 = vcmask 261120  }
  0x1a   : > { %v1189_v16 = vmax.f32 %v1138_v14, %v1172_v15  ;;  %v1223_v18 = vld [vmem:[#allocation2 + $0x10a] ss:$2 sm:$0xf]  ;;  %v1257_v19 = vld [vmem:[#allocation2 + $0x10b] ss:$2 sm:$0xf] }
  0x1b   : > { %s4487_s28 = smul.u32 132, %s327_s25  ;;  %v1274_v20 = vmax.f32 %v1223_v18, %v1257_v19  ;;  %s7195_s21 = smov 40   ;;  %v1308_v21 = vld [vmem:[#allocation2 + $0x10c] ss:$2 sm:$0xf]  ;;  %vm2495_vm6 = vcmask 326656  }
  0x1c   : > { %1762 = vrot.lane.b32.xlu1 %v1189_v16, %s7179_s17  ;;  %v1342_v22 = vld [vmem:[#allocation2 + $0x10d] ss:$2 sm:$0xf]  ;;  %s7193_s22 = smov 48   ;;  %s7191_s23 = smov 56   ;;  %vm2530_vm7 = vcmask 457728  }
  0x1d   : > { %v5320_v0 = vld [vmem:[%s7206_s1 + $0x10] sm:$0xff]   ;;  %v5321_v2 = vld [vmem:[%s7206_s1 + $0x8] sm:$0xff]   ;;  %v5322_v3 = vld [vmem:[%s7206_s1] sm:$0xff]   ;;  %v1359_v23 = vmax.f32 %v1308_v21, %v1342_v22  ;;  %s7181_s24 = smov 72   ;;  %s7183_s25 = smov 64   ;;  %vm2548_vm8 = vcmask 523264  }
  0x1e   : > { %4354 = vmatpush3.bf16.msra.mxu0 %v5320_v0  ;;  %s5567_s16 = scalar_lea.vmem %s7207_s0, %s4487_s28  ;;  %v1393_v25 = vld [vmem:[#allocation2 + $0x10e] ss:$2 sm:$0xf]  ;;  %v1427_v26 = vld [vmem:[#allocation2 + $0x10f] ss:$2 sm:$0xf] }
  0x1f   : > { %4355 = vmatprep.subr.bf16.mxu0 %v7199_v1  ;;  %v5323_v4 = vld [vmem:[%s5567_s16] sm:$0xff]   ;;  %v5324_v5 = vld [vmem:[%s5567_s16 + $0x8] sm:$0xff]   ;;  %v5325_v6 = vld [vmem:[%s5567_s16 + $0x10] sm:$0xff]   ;;  %v1444_v27 = vmax.f32 %v1393_v25, %v1427_v26  ;;  %s7208_s2 = sld [smem:[#allocation13_spill]]  ;;  %s7177_s28 = smov 24   ;;  %vm2566_vm9 = vcmask 588800  }
  0x20   : > { %v5326_v7 = vld [vmem:[%s5567_s16 + $0x18] sm:$0xff]   ;;  %v5327_v8 = vld [vmem:[%s5567_s16 + $0x20] sm:$0xff]   ;;  %v5328_v9 = vld [vmem:[%s5567_s16 + $0x28] sm:$0xff]   ;;  %1830 = vrot.lane.b32.xlu1 %v1274_v20, %s7195_s21  ;;  %s7185_s29 = smov 8   ;;  %s7175_s26 = smov 16   ;;  %vm2584_vm10 = vcmask 654336  }
  0x21   : > { %v5329_v10 = vld [vmem:[%s5567_s16 + $0x30] sm:$0xff]   ;;  %v5330_v11 = vld [vmem:[%s5567_s16 + $0x38] sm:$0xff]   ;;  %v5331_v12 = vld [vmem:[%s5567_s16 + $0x40] sm:$0xff]   ;;  %s7189_s27 = smov 112   ;;  %s7187_s14 = smov 120   ;;  %vm2602_vm11 = vcmask 719872  }
  0x22   : > { %4356 = vmatpush3.bf16.msra.mxu0 %v5321_v2  ;;  %v5332_v13 = vld [vmem:[%s5567_s16 + $0x48] sm:$0xff]   ;;  %v5333_v17 = vld [vmem:[%s5567_s16 + $0x50] sm:$0xff]   ;;  %v5334_v24 = vld [vmem:[%s5567_s16 + $0x58] sm:$0xff]   ;;  %vm2620_vm12 = vcmask 785408   ;;  %vm2638_vm13 = vcmask 850944   ;;  %vm2656_vm14 = vcmask 916480  }
  0x23   : > { %4357 = vmatprep.subr.bf16.mxu0 %v7199_v1  ;;  %v1455_v28 = vld [vmem:[#allocation2 + $0x112] ss:$2 sm:$0xf]  ;;  %v1458_v29 = vld [vmem:[#allocation2 + $0x113] ss:$2 sm:$0xf] }
  0x24   : > { %1898 = vrot.lane.b32.xlu1 %v1359_v23, %s7193_s22  ;;  %v1460_v30 = vmax.f32 %v1455_v28, %v1458_v29  ;;  %v1447_v31 = vld [vmem:[#allocation2 + $0x110] ss:$2 sm:$0xf]  ;;  %v1450_v32 = vld [vmem:[#allocation2 + $0x111] ss:$2 sm:$0xf] }
  0x25   : > { %v5335_v33 = vld [vmem:[%s5567_s16 + $0x60] sm:$0xff]   ;;  %v1452_v34 = vmax.f32 %v1447_v31, %v1450_v32  ;;  %v5336_v35 = vld [vmem:[%s5567_s16 + $0x68] sm:$0xff]   ;;  %v5337_v36 = vld [vmem:[%s5567_s16 + $0x70] sm:$0xff]   ;;  %vm2674_vm15 = vcmask 982016   ;;  %s7223_s0 = smov 104   ;;  %s7224_s1 = smov 40  }
  0x26   : > { %4358 = vmatpush3.bf16.msra.mxu0 %v5322_v3  ;;  %2087 = vrot.lane.b32.xlu0 %v1460_v30, %s7181_s24  ;;  %v5338_v37 = vld [vmem:[%s5567_s16 + $0x78] sm:$0xff]   ;;  %v5339_v38 = vld [vmem:[%s5567_s16 + $0x80] ss:$0 sps:$4 sm:$0xff]   ;;  %s7169_s16 = smov 80  }
  0x27   : > { %v5644_v39 = vld [vmem:[%s7208_s2] ss:$0 sm:$0xff]  ;;  %s7225_s2 = smov 48  }
  0x28   : > { %1966 = vrot.lane.b32.xlu1 %v1444_v27, %s7191_s23 }
  0x29   : > { %4360 = vmatmul.mubr.msk.bf16.vlgmr.msra.gmra.mxu0 %vm479_vm1, %v5323_v4 }
  0x2a   : > { %4363 = vmatprep.mubr.msk.bf16.mxu0 %vm5429_vm0, %v7199_v1 }
  0x2c   : > { %2034 = vrot.lane.b32.xlu1 %v1452_v34, %s7183_s25 }
  0x31   : > { %4364 = vmatmul.mubr.msk.bf16.gmra.mxu0 %vm479_vm1, %v5324_v5 }
  0x32   : > { %4367 = vmatprep.mubr.msk.bf16.mxu0 %vm5429_vm0, %v7199_v1 }
  0x39   : > { %4368 = vmatmul.mubr.msk.bf16.gmra.mxu0 %vm479_vm1, %v5325_v6 }
  0x3a   : > { %4371 = vmatprep.mubr.msk.bf16.mxu0 %vm5429_vm0, %v7199_v1 }
  0x41   : > { %4372 = vmatmul.mubr.msk.bf16.gmra.mxu0 %vm479_vm1, %v5326_v7 }
  0x42   : > { %4375 = vmatprep.mubr.msk.bf16.mxu0 %vm5429_vm0, %v7199_v1 }
  0x49   : > { %4376 = vmatmul.mubr.msk.bf16.gmra.mxu0 %vm479_vm1, %v5327_v8 }
  0x4a   : > { %4379 = vmatprep.mubr.msk.bf16.mxu0 %vm5429_vm0, %v7199_v1 }
  0x51   : > { %4380 = vmatmul.mubr.msk.bf16.gmra.mxu0 %vm479_vm1, %v5328_v9 }
  0x52   : > { %4383 = vmatprep.mubr.msk.bf16.mxu0 %vm5429_vm0, %v7199_v1 }
  0x59   : > { %4384 = vmatmul.mubr.msk.bf16.gmra.mxu0 %vm479_vm1, %v5329_v10 }
  0x5a   : > { %4387 = vmatprep.mubr.msk.bf16.mxu0 %vm5429_vm0, %v7199_v1 }
  0x61   : > { %4388 = vmatmul.mubr.msk.bf16.gmra.mxu0 %vm479_vm1, %v5330_v11 }
  0x62   : > { %4391 = vmatprep.mubr.msk.bf16.mxu0 %vm5429_vm0, %v7199_v1 }
  0x69   : > { %4392 = vmatmul.mubr.msk.bf16.gmra.mxu0 %vm479_vm1, %v5331_v12 }
  0x6a   : > { %4395 = vmatprep.mubr.msk.bf16.mxu0 %vm5429_vm0, %v7199_v1 }
  0x71   : > { %4396 = vmatmul.mubr.msk.bf16.gmra.mxu0 %vm479_vm1, %v5332_v13 }
  0x72   : > { %4399 = vmatprep.mubr.msk.bf16.mxu0 %vm5429_vm0, %v7199_v1 }
  0x79   : > { %4400 = vmatmul.mubr.msk.bf16.gmra.mxu0 %vm479_vm1, %v5333_v17 }
  0x7a   : > { %4403 = vmatprep.mubr.msk.bf16.mxu0 %vm5429_vm0, %v7199_v1 }
  0x81   : > { %4404 = vmatmul.mubr.msk.bf16.gmra.mxu0 %vm479_vm1, %v5334_v24 }
  0x82   : > { %4407 = vmatprep.mubr.msk.bf16.mxu0 %vm5429_vm0, %v7199_v1 }
  0x89   : > { %4408 = vmatmul.mubr.msk.bf16.gmra.mxu0 %vm479_vm1, %v5335_v33 }
  0x8a   : > { %4411 = vmatprep.mubr.msk.bf16.mxu0 %vm5429_vm0, %v7199_v1 }
  0x91   : > { %4412 = vmatmul.mubr.msk.bf16.gmra.mxu0 %vm479_vm1, %v5336_v35 }
  0x92   : > { %4415 = vmatprep.mubr.msk.bf16.mxu0 %vm5429_vm0, %v7199_v1 }
  0x99   : > { %4416 = vmatmul.mubr.msk.bf16.gmra.mxu0 %vm479_vm1, %v5337_v36 }
  0x9a   : > { %4419 = vmatprep.mubr.msk.bf16.mxu0 %vm5429_vm0, %v7199_v1 }
  0xa1   : > { %4420 = vmatmul.mubr.msk.bf16.gmra.mxu0 %vm479_vm1, %v5338_v37 }
  0xa2   : > { %4423 = vmatprep.mubr.msk.bf16.mxu0 %vm5429_vm0, %v7199_v1 }
  0xa9   : > { %4424 = vmatmul.mubr.msk.bf16.gmra.mxu0 %vm479_vm1, %v5339_v38 }
  0xe9   : > { %v565_v40 = vpop.f32.mrf.mxu0 }
  0xea   : > { %v566_v41 = vadd.f32 %v5644_v39, %v565_v40 }
  0xeb   : > { %v4361_v42 = vpop.f32.mrf.mxu0 }
  0xec   : > { %v699_v43 = vmax.f32 %v566_v41, 0.0 }
  0xed   : > { %v568_v44 = vpop.f32.mrf.mxu0 }
  0xee   : > { %733 = vst.msk [vmem:[#allocation2] sm:$0xff] %vm732_vm2, %v699_v43  ;;  %v569_v45 = vadd.f32 %v5644_v39, %v568_v44 }
  0xef   : > { %v4362_v46 = vpop.f32.mrf.mxu0 }
  0xf0   : > { %v700_v47 = vmax.f32 %v569_v45, 0.0  ;;  %v5340_v45 = vld [vmem:[%s7162_s3 + $0x38] sm:$0xff]  }
  0xf1   : > { %v573_v48 = vpop.f32.mrf.mxu0  ;;  %4428 = vmatpush3.bf16.msra.mxu1 %v5340_v45 }
  0xf2   : > { %734 = vst.msk [vmem:[#allocation2 + $0x8] sm:$0xff] %vm732_vm2, %v700_v47  ;;  %v574_v49 = vadd.f32 %v5644_v39, %v573_v48  ;;  %4429 = vmatprep.subr.bf16.mxu1 %v7199_v1 }
  0xf3   : > { %v4365_v50 = vpop.f32.mrf.mxu0 }
  0xf4   : > { %v701_v51 = vmax.f32 %v574_v49, 0.0 }
  0xf5   : > { %v576_v52 = vpop.f32.mrf.mxu0 }
  0xf6   : > { %735 = vst.msk [vmem:[#allocation2 + $0x10] sm:$0xff] %vm732_vm2, %v701_v51  ;;  %v577_v53 = vadd.f32 %v5644_v39, %v576_v52 }
  0xf7   : > { %v4366_v54 = vpop.f32.mrf.mxu0 }
  0xf8   : > { %v702_v55 = vmax.f32 %v577_v53, 0.0 }
  0xf9   : > { %v581_v56 = vpop.f32.mrf.mxu0 }
  0xfa   : > { %736 = vst.msk [vmem:[#allocation2 + $0x18] sm:$0xff] %vm732_vm2, %v702_v55  ;;  %v582_v57 = vadd.f32 %v5644_v39, %v581_v56 }
  0xfb   : > { %v4369_v58 = vpop.f32.mrf.mxu0 }
  0xfc   : > { %v703_v59 = vmax.f32 %v582_v57, 0.0 }
  0xfd   : > { %v584_v60 = vpop.f32.mrf.mxu0  ;;  %v1021_v4 = vld [vmem:[#allocation2 + $0x6] ss:$2 sm:$0xff]  ;;  %v1055_v5 = vld [vmem:[#allocation2 + $0x7] ss:$2 sm:$0xff] }
  0xfe   : > { %737 = vst.msk [vmem:[#allocation2 + $0x20] sm:$0xff] %vm732_vm2, %v703_v59  ;;  %v585_v61 = vadd.f32 %v5644_v39, %v584_v60  ;;  %v851_v7 = vld [vmem:[#allocation2 + $0x2] ss:$2 sm:$0xff]  ;;  %v885_v8 = vld [vmem:[#allocation2 + $0x3] ss:$2 sm:$0xff]  ;;  %v1088_v15 = vmax.f32 %v1021_v4, %v1055_v5 }
  0xff   : > { %v4370_v62 = vpop.f32.mrf.mxu0  ;;  %v1106_v13 = vld [vmem:[#allocation2 + $0x8] ss:$2 sm:$0xff]  ;;  %v918_v21 = vmax.f32 %v851_v7, %v885_v8  ;;  %v1140_v23 = vld [vmem:[#allocation2 + $0x9] ss:$2 sm:$0xff] }
 0x100   : > { %v704_v63 = vmax.f32 %v585_v61, 0.0  ;;  %v936_v29 = vld [vmem:[#allocation2 + $0x4] ss:$2 sm:$0xff]  ;;  %v970_v30 = vld [vmem:[#allocation2 + $0x5] ss:$2 sm:$0xff]  ;;  %v1173_v37 = vmax.f32 %v1106_v13, %v1140_v23 }
 0x101   : > { %v589_v0 = vpop.f32.mrf.mxu0  ;;  %v1003_v42 = vmax.f32 %v936_v29, %v970_v30  ;;  %v1276_v43 = vld [vmem:[#allocation2 + $0xc] ss:$2 sm:$0xff]  ;;  %v1310_v44 = vld [vmem:[#allocation2 + $0xd] ss:$2 sm:$0xff] }
 0x102   : > { %738 = vst.msk [vmem:[#allocation2 + $0x28] sm:$0xff] %vm732_vm2, %v704_v63  ;;  %v590_v2 = vadd.f32 %v5644_v39, %v589_v0  ;;  %v1191_v49 = vld [vmem:[#allocation2 + $0xa] ss:$2 sm:$0xff]  ;;  %v1225_v50 = vld [vmem:[#allocation2 + $0xb] ss:$2 sm:$0xff]  ;;  %v1343_v57 = vmax.f32 %v1276_v43, %v1310_v44 }
 0x103   : > { %v4373_v3 = vpop.f32.mrf.mxu0  ;;  %v1258_v61 = vmax.f32 %v1191_v49, %v1225_v50  ;;  %v768_v62 = vld [vmem:[#allocation2 + $0x10] ss:$2 sm:$0xff]  ;;  %v802_v63 = vld [vmem:[#allocation2 + $0x11] ss:$2 sm:$0xff] }
 0x104   : > { %v705_v6 = vmax.f32 %v590_v2, 0.0  ;;  %v5341_v0 = vld [vmem:[%s7162_s3 + $0x30] sm:$0xff]   ;;  %v5701_v13 = vmax.f32 %v768_v62, %v802_v63  ;;  %v5344_v49 = vld [vmem:[%s7162_s3 + $0x18] sm:$0xff]  }
 0x105   : > { %v592_v9 = vpop.f32.mrf.mxu0  ;;  %v1023_v10 = vld [vmem:[#allocation2 + $0x16] ss:$2 sm:$0xff]  ;;  %v1057_v11 = vld [vmem:[#allocation2 + $0x17] ss:$2 sm:$0xff]  ;;  %4430 = vmatpush3.bf16.msra.mxu1 %v5341_v0 }
 0x106   : > { %v853_v12 = vld [vmem:[#allocation2 + $0x12] ss:$2 sm:$0xff]  ;;  %739 = vst.msk [vmem:[#allocation2 + $0x30] sm:$0xff] %vm732_vm2, %v705_v6  ;;  %v593_v14 = vadd.f32 %v5644_v39, %v592_v9  ;;  %v5661_v16 = vmax.f32 %v1023_v10, %v1057_v11  ;;  %v887_v17 = vld [vmem:[#allocation2 + $0x13] ss:$2 sm:$0xff]  ;;  %4431 = vmatprep.subr.bf16.mxu1 %v7199_v1 }
 0x107   : > { %v1108_v18 = vld [vmem:[#allocation2 + $0x18] ss:$2 sm:$0xff]  ;;  %v1142_v19 = vld [vmem:[#allocation2 + $0x19] ss:$2 sm:$0xff]  ;;  %v4374_v20 = vpop.f32.mrf.mxu0  ;;  %v5663_v22 = vmax.f32 %v853_v12, %v887_v17  ;;  %v5342_v17 = vld [vmem:[%s7162_s3 + $0x28] sm:$0xff]  }
 0x108   : > { %v938_v24 = vld [vmem:[#allocation2 + $0x14] ss:$2 sm:$0xff]  ;;  %v972_v25 = vld [vmem:[#allocation2 + $0x15] ss:$2 sm:$0xff]  ;;  %v706_v26 = vmax.f32 %v593_v14, 0.0  ;;  %v4555_v27 = vpack.i.bf16 %v5661_v16, %v1088_v15  ;;  %v5666_v28 = vmax.f32 %v1108_v18, %v1142_v19 }
 0x109   : > { %v597_v31 = vpop.f32.mrf.mxu0  ;;  %v4545_v32 = vpack.i.bf16 %v5663_v22, %v918_v21  ;;  %v5669_v33 = vmax.f32 %v938_v24, %v972_v25  ;;  %v1278_v34 = vld [vmem:[#allocation2 + $0x1c] ss:$2 sm:$0xff]  ;;  %v1312_v35 = vld [vmem:[#allocation2 + $0x1d] ss:$2 sm:$0xff]  ;;  %4432 = vmatpush3.bf16.msra.mxu1 %v5342_v17  ;;  %v5345_v62 = vld [vmem:[%s7162_s3 + $0x10] sm:$0xff]  }
 0x10a   : > { %740 = vst.msk [vmem:[#allocation2 + $0x38] sm:$0xff] %vm732_vm2, %v706_v26  ;;  %v598_v36 = vadd.f32 %v5644_v39, %v597_v31  ;;  %4556 = vrot.lane.b32.xlu1 %v4555_v27, %s7177_s28  ;;  %v1193_v38 = vld [vmem:[#allocation2 + $0x1a] ss:$2 sm:$0xff]  ;;  %v1227_v40 = vld [vmem:[#allocation2 + $0x1b] ss:$2 sm:$0xff]  ;;  %v4560_v47 = vpack.i.bf16 %v5666_v28, %v1173_v37  ;;  %v5679_v48 = vmax.f32 %v1278_v34, %v1312_v35 }
 0x10b   : > { %4546 = vrot.lane.b32.xlu0 %v4545_v32, %s7185_s29  ;;  %v4377_v41 = vpop.f32.mrf.mxu0  ;;  %v4550_v52 = vpack.i.bf16 %v5669_v33, %v1003_v42  ;;  %v5682_v53 = vmax.f32 %v1193_v38, %v1227_v40  ;;  %v770_v54 = vld [vmem:[#allocation2 + $0x20] ss:$2 sm:$0xff]  ;;  %v804_v55 = vld [vmem:[#allocation2 + $0x21] ss:$2 sm:$0xff]  ;;  %4433 = vmatprep.subr.bf16.mxu1 %v7199_v1 }
 0x10c   : > { %v707_v46 = vmax.f32 %v598_v36, 0.0  ;;  %v1363_v58 = vld [vmem:[#allocation2 + $0x1e] ss:$2 sm:$0xff]  ;;  %v1397_v59 = vld [vmem:[#allocation2 + $0x1f] ss:$2 sm:$0xff]  ;;  %v4570_v3 = vpack.i.bf16 %v5679_v48, %v1343_v57  ;;  %v5693_v6 = vmax.f32 %v770_v54, %v804_v55 }
 0x10d   : > { %v600_v51 = vpop.f32.mrf.mxu0  ;;  %v1361_v4 = vld [vmem:[#allocation2 + $0xe] ss:$2 sm:$0xff]  ;;  %v1395_v5 = vld [vmem:[#allocation2 + $0xf] ss:$2 sm:$0xff]  ;;  %v4565_v8 = vpack.i.bf16 %v5682_v53, %v1258_v61  ;;  %v5696_v9 = vmax.f32 %v1363_v58, %v1397_v59  ;;  %v5343_v35 = vld [vmem:[%s7162_s3 + $0x20] sm:$0xff]  }
 0x10e   : > { %741 = vst.msk [vmem:[#allocation2 + $0x40] sm:$0xff] %vm732_vm2, %v707_v46  ;;  %v601_v56 = vadd.f32 %v5644_v39, %v600_v51  ;;  %4561 = vrot.lane.b32.xlu1 %v4560_v47, %s7179_s17  ;;  %v855_v10 = vld [vmem:[#allocation2 + $0x22] ss:$2 sm:$0xff]  ;;  %v889_v11 = vld [vmem:[#allocation2 + $0x23] ss:$2 sm:$0xff]  ;;  %v1428_v15 = vmax.f32 %v1361_v4, %v1395_v5  ;;  %v4580_v19 = vpack.i.bf16 %v5693_v6, %v5701_v13 }
 0x10f   : > { %4551 = vrot.lane.b32.xlu0 %v4550_v52, %s7175_s26  ;;  %v4378_v60 = vpop.f32.mrf.mxu0  ;;  %v920_v20 = vmax.f32 %v855_v10, %v889_v11  ;;  %v940_v21 = vld [vmem:[#allocation2 + $0x24] ss:$2 sm:$0xff]  ;;  %v974_v27 = vld [vmem:[#allocation2 + $0x25] ss:$2 sm:$0xff]  ;;  %4434 = vmatpush3.bf16.msra.mxu1 %v5343_v35 }
 0x110   : > { %v708_v2 = vmax.f32 %v601_v56, 0.0  ;;  %v4575_v24 = vpack.i.bf16 %v5696_v9, %v1428_v15  ;;  %v1005_v40 = vmax.f32 %v940_v21, %v974_v27  ;;  %v1025_v43 = vld [vmem:[#allocation2 + $0x26] ss:$2 sm:$0xff]  ;;  %v1059_v44 = vld [vmem:[#allocation2 + $0x27] ss:$2 sm:$0xff]  ;;  %4435 = vmatprep.subr.bf16.mxu1 %v7199_v1 }
 0x111   : > { %v605_v7 = vpop.f32.mrf.mxu0  ;;  %v4585_v37 = vpack.i.bf16 %v920_v20, %v5663_v22  ;;  %v1090_v52 = vmax.f32 %v1025_v43, %v1059_v44  ;;  %v1110_v57 = vld [vmem:[#allocation2 + $0x28] ss:$2 sm:$0xff]  ;;  %v1144_v58 = vld [vmem:[#allocation2 + $0x29] ss:$2 sm:$0xff] }
 0x112   : > { %742 = vst.msk [vmem:[#allocation2 + $0x48] sm:$0xff] %vm732_vm2, %v708_v2  ;;  %v606_v12 = vadd.f32 %v5644_v39, %v605_v7  ;;  %4571 = vrot.lane.b32.xlu1 %v4570_v3, %s7193_s22  ;;  %v4590_v51 = vpack.i.bf16 %v1005_v40, %v5669_v33  ;;  %v1175_v2 = vmax.f32 %v1110_v57, %v1144_v58  ;;  %v1195_v7 = vld [vmem:[#allocation2 + $0x2a] ss:$2 sm:$0xff] }
 0x113   : > { %4566 = vrot.lane.b32.xlu0 %v4565_v8, %s7195_s21  ;;  %v4381_v14 = vpop.f32.mrf.mxu0  ;;  %4436 = vmatpush3.bf16.msra.mxu1 %v5344_v49  ;;  %v4595_v0 = vpack.i.bf16 %v1090_v52, %v5661_v16  ;;  %v1229_v8 = vld [vmem:[#allocation2 + $0x2b] ss:$2 sm:$0xff] }
 0x114   : > { %v709_v18 = vmax.f32 %v606_v12, 0.0  ;;  %4437 = vmatprep.subr.bf16.mxu1 %v7199_v1  ;;  %v5346_v14 = vld [vmem:[%s7162_s3 + $0x8] sm:$0xff]   ;;  %v4600_v17 = vpack.i.bf16 %v1175_v2, %v5666_v28 }
 0x115   : > { %v608_v23 = vpop.f32.mrf.mxu0  ;;  %v857_v25 = vld [vmem:[#allocation2 + $0x32] ss:$2 sm:$0xff]  ;;  %v891_v26 = vld [vmem:[#allocation2 + $0x33] ss:$2 sm:$0xff] }
 0x116   : > { %743 = vst.msk [vmem:[#allocation2 + $0x50] sm:$0xff] %vm732_vm2, %v709_v18  ;;  %v609_v29 = vadd.f32 %v5644_v39, %v608_v23  ;;  %4581 = vrot.lane.b32.xlu1 %v4580_v19, %s7183_s25  ;;  %v5714_v30 = vmax.f32 %v857_v25, %v891_v26  ;;  %v942_v31 = vld [vmem:[#allocation2 + $0x34] ss:$2 sm:$0xff]  ;;  %v976_v32 = vld [vmem:[#allocation2 + $0x35] ss:$2 sm:$0xff]  ;;  %v1260_v18 = vmax.f32 %v1195_v7, %v1229_v8 }
 0x117   : > { %4576 = vrot.lane.b32.xlu0 %v4575_v24, %s7191_s23  ;;  %v4382_v34 = vpop.f32.mrf.mxu0  ;;  %v5723_v42 = vmax.f32 %v942_v31, %v976_v32  ;;  %v1027_v46 = vld [vmem:[#allocation2 + $0x36] ss:$2 sm:$0xff]  ;;  %v1061_v47 = vld [vmem:[#allocation2 + $0x37] ss:$2 sm:$0xff]  ;;  %4438 = vmatpush3.bf16.msra.mxu1 %v5345_v62 }
 0x118   : > { %v710_v36 = vmax.f32 %v609_v29, 0.0  ;;  %v4620_v38 = vpack.i.bf16 %v5714_v30, %v920_v20  ;;  %v5735_v56 = vmax.f32 %v1027_v46, %v1061_v47  ;;  %v1112_v60 = vld [vmem:[#allocation2 + $0x38] ss:$2 sm:$0xff]  ;;  %v1146_v61 = vld [vmem:[#allocation2 + $0x39] ss:$2 sm:$0xff]  ;;  %4439 = vmatprep.subr.bf16.mxu1 %v7199_v1  ;;  %v4605_v32 = vpack.i.bf16 %v1260_v18, %v5682_v53 }
 0x119   : > { %v613_v41 = vpop.f32.mrf.mxu0  ;;  %v4625_v55 = vpack.i.bf16 %v5723_v42, %v1005_v40  ;;  %v5747_v5 = vmax.f32 %v1112_v60, %v1146_v61  ;;  %v1197_v11 = vld [vmem:[#allocation2 + $0x3a] ss:$2 sm:$0xff]  ;;  %v1231_v12 = vld [vmem:[#allocation2 + $0x3b] ss:$2 sm:$0xff] }
 0x11a   : > { %744 = vst.msk [vmem:[#allocation2 + $0x58] sm:$0xff] %vm732_vm2, %v710_v36  ;;  %v614_v45 = vadd.f32 %v5644_v39, %v613_v41  ;;  %4586 = vrot.lane.b32.xlu1 %v4585_v37, %s7181_s24  ;;  %v4630_v3 = vpack.i.bf16 %v5735_v56, %v1090_v52  ;;  %v5759_v21 = vmax.f32 %v1197_v11, %v1231_v12  ;;  %v1280_v23 = vld [vmem:[#allocation2 + $0x2c] ss:$2 sm:$0xff]  ;;  %v1314_v24 = vld [vmem:[#allocation2 + $0x2d] ss:$2 sm:$0xff]  ;;  %v5347_v29 = vld [vmem:[%s7162_s3] sm:$0xff]  }
 0x11b   : > { %4621 = vrot.lane.b32.xlu0 %v4620_v38, %s7185_s29  ;;  %v4385_v22 = vpop.f32.mrf.mxu0  ;;  %v4635_v19 = vpack.i.bf16 %v5747_v5, %v1175_v2  ;;  %4440 = vmatpush3.bf16.msra.mxu1 %v5346_v14  ;;  %v1282_v26 = vld [vmem:[#allocation2 + $0x3c] ss:$2 sm:$0xff]  ;;  %v1316_v27 = vld [vmem:[#allocation2 + $0x3d] ss:$2 sm:$0xff]  ;;  %v1345_v34 = vmax.f32 %v1280_v23, %v1314_v24 }
 0x11c   : > { %v711_v50 = vmax.f32 %v614_v45, 0.0  ;;  %4441 = vmatprep.subr.bf16.mxu1 %v7199_v1  ;;  %v4640_v35 = vpack.i.bf16 %v5759_v21, %v1260_v18  ;;  %v5771_v36 = vmax.f32 %v1282_v26, %v1316_v27  ;;  %v1365_v38 = vld [vmem:[#allocation2 + $0x2e] ss:$2 sm:$0xff]  ;;  %v1399_v40 = vld [vmem:[#allocation2 + $0x2f] ss:$2 sm:$0xff] }
 0x11d   : > { %v616_v54 = vpop.f32.mrf.mxu0  ;;  %v1367_v43 = vld [vmem:[#allocation2 + $0x3e] ss:$2 sm:$0xff]  ;;  %v1401_v44 = vld [vmem:[#allocation2 + $0x3f] ss:$2 sm:$0xff]  ;;  %v4610_v45 = vpack.i.bf16 %v1345_v34, %v5679_v48  ;;  %v1430_v47 = vmax.f32 %v1365_v38, %v1399_v40 }
 0x11e   : > { %745 = vst.msk [vmem:[#allocation2 + $0x60] sm:$0xff] %vm732_vm2, %v711_v50  ;;  %v617_v59 = vadd.f32 %v5644_v39, %v616_v54  ;;  %4591 = vrot.lane.b32.xlu1 %v4590_v51, %s7169_s16  ;;  %s7171_s16 = smov 88   ;;  %v4645_v22 = vpack.i.bf16 %v5771_v36, %v1345_v34  ;;  %v5779_v49 = vmax.f32 %v1367_v43, %v1401_v44  ;;  %v808_v57 = vld [vmem:[#allocation2 + $0x41] ss:$2 sm:$0xff]  ;;  %v859_v48 = vld [vmem:[#allocation2 + $0x42] ss:$2 sm:$0xff] }
 0x11f   : > { %4626 = vrot.lane.b32.xlu0 %v4625_v55, %s7175_s26  ;;  %v4386_v33 = vpop.f32.mrf.mxu0  ;;  %4442 = vmatpush3.bf16.msra.mxu1 %v5347_v29  ;;  %v774_v55 = vld [vmem:[#allocation2 + $0x40] ss:$2 sm:$0xff]  ;;  %v893_v58 = vld [vmem:[#allocation2 + $0x43] ss:$2 sm:$0xff]  ;;  %v4615_v60 = vpack.i.bf16 %v1430_v47, %v5696_v9 }
 0x120   : > { %v712_v63 = vmax.f32 %v617_v59, 0.0  ;;  %v772_v33 = vld [vmem:[#allocation2 + $0x30] ss:$2 sm:$0xff]  ;;  %v806_v62 = vld [vmem:[#allocation2 + $0x31] ss:$2 sm:$0xff]  ;;  %v5789_v2 = vmax.f32 %v774_v55, %v808_v57  ;;  %v922_v8 = vmax.f32 %v859_v48, %v893_v58 }
 0x121   : > { %v621_v4 = vpop.f32.mrf.mxu0  ;;  %v944_v11 = vld [vmem:[#allocation2 + $0x44] ss:$2 sm:$0xff]  ;;  %v978_v12 = vld [vmem:[#allocation2 + $0x45] ss:$2 sm:$0xff] }
 0x122   : > { %746 = vst.msk [vmem:[#allocation2 + $0x68] sm:$0xff] %vm732_vm2, %v712_v63  ;;  %4596 = vrot.lane.b32.xlu1 %v4595_v0, %s7171_s16  ;;  %v622_v10 = vadd.f32 %v5644_v39, %v621_v4  ;;  %s7173_s16 = smov 96   ;;  %v4650_v0 = vpack.i.bf16 %v5779_v49, %v1430_v47  ;;  %v1007_v24 = vmax.f32 %v944_v11, %v978_v12  ;;  %v1029_v26 = vld [vmem:[#allocation2 + $0x46] ss:$2 sm:$0xff]  ;;  %v1063_v27 = vld [vmem:[#allocation2 + $0x47] ss:$2 sm:$0xff] }
 0x123   : > { %4631 = vrot.lane.b32.xlu0 %v4630_v3, %s7177_s28  ;;  %v4389_v16 = vpop.f32.mrf.mxu0  ;;  %v4660_v34 = vpack.i.bf16 %v922_v8, %v5714_v30  ;;  %v1092_v40 = vmax.f32 %v1029_v26, %v1063_v27  ;;  %v1114_v43 = vld [vmem:[#allocation2 + $0x48] ss:$2 sm:$0xff]  ;;  %v1148_v44 = vld [vmem:[#allocation2 + $0x49] ss:$2 sm:$0xff] }
 0x124   : > { %v713_v15 = vmax.f32 %v622_v10, 0.0  ;;  %v5795_v10 = vmax.f32 %v772_v33, %v806_v62  ;;  %v4665_v30 = vpack.i.bf16 %v1007_v24, %v5723_v42  ;;  %v1199_v55 = vld [vmem:[#allocation2 + $0x4a] ss:$2 sm:$0xff]  ;;  %v1233_v57 = vld [vmem:[#allocation2 + $0x4b] ss:$2 sm:$0xff] }
 0x125   : > { %v624_v20 = vpop.f32.mrf.mxu0  ;;  %v861_v51 = vld [vmem:[#allocation2 + $0x52] ss:$2 sm:$0xff]  ;;  %v895_v52 = vld [vmem:[#allocation2 + $0x53] ss:$2 sm:$0xff]  ;;  %v4670_v42 = vpack.i.bf16 %v1092_v40, %v5735_v56 }
 0x126   : > { %747 = vst.msk [vmem:[#allocation2 + $0x70] sm:$0xff] %vm732_vm2, %v713_v15  ;;  %4601 = vrot.lane.b32.xlu1 %v4600_v17, %s7173_s16  ;;  %v625_v25 = vadd.f32 %v5644_v39, %v624_v20  ;;  %s7197_s16 = smov 104   ;;  %v5786_v63 = vmax.f32 %v861_v51, %v895_v52  ;;  %v946_v4 = vld [vmem:[#allocation2 + $0x54] ss:$2 sm:$0xff]  ;;  %v980_v7 = vld [vmem:[#allocation2 + $0x55] ss:$2 sm:$0xff]  ;;  %v4655_v18 = vpack.i.bf16 %v5789_v2, %v5795_v10 }
 0x127   : > { %4636 = vrot.lane.b32.xlu0 %v4635_v19, %s7179_s17  ;;  %v4390_v28 = vpop.f32.mrf.mxu0  ;;  %v5798_v17 = vmax.f32 %v946_v4, %v980_v7  ;;  %v1031_v20 = vld [vmem:[#allocation2 + $0x56] ss:$2 sm:$0xff]  ;;  %v1065_v23 = vld [vmem:[#allocation2 + $0x57] ss:$2 sm:$0xff]  ;;  %v1177_v52 = vmax.f32 %v1114_v43, %v1148_v44 }
 0x128   : > { %v714_v31 = vmax.f32 %v625_v25, 0.0  ;;  %v4695_v14 = vpack.i.bf16 %v5786_v63, %v922_v8  ;;  %v1150_v38 = vld [vmem:[#allocation2 + $0x59] ss:$2 sm:$0xff]  ;;  %v1284_v4 = vld [vmem:[#allocation2 + $0x4c] ss:$2 sm:$0xff] }
 0x129   : > { %v629_v37 = vpop.f32.mrf.mxu0  ;;  %v4700_v29 = vpack.i.bf16 %v5798_v17, %v1007_v24  ;;  %v1235_v51 = vld [vmem:[#allocation2 + $0x5b] ss:$2 sm:$0xff]  ;;  %v4675_v12 = vpack.i.bf16 %v1177_v52, %v5747_v5  ;;  %v776_v5 = vld [vmem:[#allocation2 + $0x50] ss:$2 sm:$0xff] }
 0x12a   : > { %748 = vst.msk [vmem:[#allocation2 + $0x78] sm:$0xff] %vm732_vm2, %v714_v31  ;;  %4606 = vrot.lane.b32.xlu1 %v4605_v32, %s7197_s16  ;;  %v630_v41 = vadd.f32 %v5644_v39, %v629_v37  ;;  %v5807_v32 = vmax.f32 %v1031_v20, %v1065_v23  ;;  %v1116_v37 = vld [vmem:[#allocation2 + $0x58] ss:$2 sm:$0xff]  ;;  %v1320_v33 = vld [vmem:[#allocation2 + $0x5d] ss:$2 sm:$0xff] }
 0x12b   : > { %4641 = vrot.lane.b32.xlu0 %v4640_v35, %s7195_s21  ;;  %v4393_v53 = vpop.f32.mrf.mxu0  ;;  %v5815_v47 = vmax.f32 %v1116_v37, %v1150_v38  ;;  %v1318_v7 = vld [vmem:[#allocation2 + $0x4d] ss:$2 sm:$0xff]  ;;  %v1369_v20 = vld [vmem:[#allocation2 + $0x4e] ss:$2 sm:$0xff] }
 0x12c   : > { %v715_v46 = vmax.f32 %v630_v41, 0.0  ;;  %v1403_v23 = vld [vmem:[#allocation2 + $0x4f] ss:$2 sm:$0xff] }
 0x12d   : > { %v632_v50 = vpop.f32.mrf.mxu0  ;;  %v4710_v58 = vpack.i.bf16 %v5815_v47, %v1177_v52  ;;  %v1432_v37 = vmax.f32 %v1369_v20, %v1403_v23 }
 0x12e   : > { %4611 = vrot.lane.b32.xlu1 %v4610_v45, %s7189_s27  ;;  %749 = vst.msk [vmem:[#allocation2 + $0x80] sm:$0xff] %vm732_vm2, %v715_v46  ;;  %v633_v54 = vadd.f32 %v5644_v39, %v632_v50  ;;  %v4705_v45 = vpack.i.bf16 %v5807_v32, %v1092_v40  ;;  %v1201_v50 = vld [vmem:[#allocation2 + $0x5a] ss:$2 sm:$0xff] }
 0x12f   : > { %4646 = vrot.lane.b32.xlu0 %v4645_v22, %s7193_s22  ;;  %v4394_v59 = vpop.f32.mrf.mxu0 }
 0x130   : > { %v716_v61 = vmax.f32 %v633_v54, 0.0 }
 0x131   : > { %v637_v3 = vpop.f32.mrf.mxu0 }
 0x132   : > { %4616 = vrot.lane.b32.xlu1 %v4615_v60, %s7187_s14  ;;  %750 = vst.msk [vmem:[#allocation2 + $0x88] sm:$0xff] %vm732_vm2, %v716_v61  ;;  %v638_v9 = vadd.f32 %v5644_v39, %v637_v3  ;;  %v5823_v60 = vmax.f32 %v1201_v50, %v1235_v51  ;;  %v1286_v61 = vld [vmem:[#allocation2 + $0x5c] ss:$2 sm:$0xff] }
 0x133   : > { %4651 = vrot.lane.b32.xlu0 %v4650_v0, %s7191_s23  ;;  %v4397_v16 = vpop.f32.mrf.mxu0  ;;  %v1262_v0 = vmax.f32 %v1199_v55, %v1233_v57  ;;  %v5831_v11 = vmax.f32 %v1286_v61, %v1320_v33 }
 0x134   : > { %v717_v15 = vmax.f32 %v638_v9, 0.0  ;;  %v1371_v16 = vld [vmem:[#allocation2 + $0x5e] ss:$2 sm:$0xff] }
 0x135   : > { %v640_v19 = vpop.f32.mrf.mxu0  ;;  %v4715_v9 = vpack.i.bf16 %v5823_v60, %v1262_v0  ;;  %v899_v50 = vld [vmem:[#allocation2 + $0x73] ss:$2 sm:$0xff]  ;;  %v950_v61 = vld [vmem:[#allocation2 + $0x74] ss:$2 sm:$0xff] }
 0x136   : > { %4696 = vrot.lane.b32.xlu1 %v4695_v14, %s7185_s29  ;;  %751 = vst.msk [vmem:[#allocation2 + $0x90] sm:$0xff] %vm732_vm2, %v717_v15  ;;  %v641_v25 = vadd.f32 %v5644_v39, %v640_v19  ;;  %v1405_v14 = vld [vmem:[#allocation2 + $0x5f] ss:$2 sm:$0xff] }
 0x137   : > { %4656 = vrot.lane.b32.xlu0 %v4655_v18, %s7183_s25  ;;  %v4398_v28 = vpop.f32.mrf.mxu0  ;;  %v1347_v18 = vmax.f32 %v1284_v4, %v1318_v7  ;;  %v5839_v26 = vmax.f32 %v1371_v16, %v1405_v14  ;;  %v984_v33 = vld [vmem:[#allocation2 + $0x75] ss:$2 sm:$0xff]  ;;  %v1035_v16 = vld [vmem:[#allocation2 + $0x76] ss:$2 sm:$0xff] }
 0x138   : > { %v718_v31 = vmax.f32 %v641_v25, 0.0  ;;  %v4680_v28 = vpack.i.bf16 %v1262_v0, %v5759_v21  ;;  %v1069_v14 = vld [vmem:[#allocation2 + $0x77] ss:$2 sm:$0xff] }
 0x139   : > { %v645_v35 = vpop.f32.mrf.mxu0  ;;  %v4720_v25 = vpack.i.bf16 %v5831_v11, %v1347_v18 }
 0x13a   : > { %4701 = vrot.lane.b32.xlu1 %v4700_v29, %s7175_s26  ;;  %752 = vst.msk [vmem:[#allocation2 + $0x98] sm:$0xff] %vm732_vm2, %v718_v31  ;;  %v646_v41 = vadd.f32 %v5644_v39, %v645_v35  ;;  %s7209_s26 = smov 80   ;;  %v778_v29 = vld [vmem:[#allocation2 + $0x60] ss:$2 sm:$0xff]  ;;  %v810_v31 = vld [vmem:[#allocation2 + $0x51] ss:$2 sm:$0xff] }
 0x13b   : > { %4661 = vrot.lane.b32.xlu0 %v4660_v34, %s7181_s24  ;;  %v4401_v53 = vpop.f32.mrf.mxu0  ;;  %v812_v34 = vld [vmem:[#allocation2 + $0x61] ss:$2 sm:$0xff]  ;;  %v5847_v43 = vmax.f32 %v776_v5, %v810_v31 }
 0x13c   : > { %v719_v46 = vmax.f32 %v646_v41, 0.0  ;;  %v4725_v41 = vpack.i.bf16 %v5839_v26, %v1432_v37  ;;  %v5849_v44 = vmax.f32 %v778_v29, %v812_v34  ;;  %v4685_v53 = vpack.i.bf16 %v1347_v18, %v5771_v36  ;;  %v1152_v5 = vld [vmem:[#allocation2 + $0x69] ss:$2 sm:$0xff]  ;;  %v1154_v29 = vld [vmem:[#allocation2 + $0x79] ss:$2 sm:$0xff] }
 0x13d   : > { %v648_v22 = vpop.f32.mrf.mxu0  ;;  %v4690_v36 = vpack.i.bf16 %v1432_v37, %v5779_v49 }
 0x13e   : > { %4706 = vrot.lane.b32.xlu1 %v4705_v45, %s7177_s28  ;;  %753 = vst.msk [vmem:[#allocation2 + $0xa0] sm:$0xff] %vm732_vm2, %v719_v46  ;;  %v649_v54 = vadd.f32 %v5644_v39, %v648_v22  ;;  %s7210_s28 = smov 88   ;;  %v863_v45 = vld [vmem:[#allocation2 + $0x62] ss:$2 sm:$0xff]  ;;  %v897_v46 = vld [vmem:[#allocation2 + $0x63] ss:$2 sm:$0xff] }
 0x13f   : > { %4666 = vrot.lane.b32.xlu0 %v4665_v30, %s7209_s26  ;;  %v4402_v48 = vpop.f32.mrf.mxu0  ;;  %v865_v22 = vld [vmem:[#allocation2 + $0x72] ss:$2 sm:$0xff]  ;;  %v924_v55 = vmax.f32 %v863_v45, %v897_v46  ;;  %v1239_v46 = vld [vmem:[#allocation2 + $0x7b] ss:$2 sm:$0xff] }
 0x140   : > { %v720_v59 = vmax.f32 %v649_v54, 0.0  ;;  %v4730_v54 = vpack.i.bf16 %v5849_v44, %v5847_v43  ;;  %v5859_v48 = vmax.f32 %v865_v22, %v899_v50  ;;  %v1205_v45 = vld [vmem:[#allocation2 + $0x7a] ss:$2 sm:$0xff] }
 0x141   : > { %v653_v62 = vpop.f32.mrf.mxu0 }
 0x142   : > { %4711 = vrot.lane.b32.xlu1 %v4710_v58, %s7179_s17  ;;  %754 = vst.msk [vmem:[#allocation2 + $0xa8] sm:$0xff] %vm732_vm2, %v720_v59  ;;  %v654_v3 = vadd.f32 %v5644_v39, %v653_v62  ;;  %s7211_s17 = smov 96   ;;  %v948_v58 = vld [vmem:[#allocation2 + $0x64] ss:$2 sm:$0xff]  ;;  %v982_v59 = vld [vmem:[#allocation2 + $0x65] ss:$2 sm:$0xff]  ;;  %v4770_v7 = vpack.i.bf16 %v5859_v48, %v924_v55 }
 0x143   : > { %4671 = vrot.lane.b32.xlu0 %v4670_v42, %s7210_s28  ;;  %v4405_v8 = vpop.f32.mrf.mxu0  ;;  %v1009_v4 = vmax.f32 %v948_v58, %v982_v59  ;;  %v1290_v59 = vld [vmem:[#allocation2 + $0x7c] ss:$2 sm:$0xff] }
 0x144   : > { %v721_v56 = vmax.f32 %v654_v3, 0.0  ;;  %v4735_v3 = vpack.i.bf16 %v924_v55, %v5786_v63  ;;  %v5867_v8 = vmax.f32 %v950_v61, %v984_v33  ;;  %v5893_v55 = vmax.f32 %v1205_v45, %v1239_v46 }
 0x145   : > { %v656_v15 = vpop.f32.mrf.mxu0  ;;  %v4740_v18 = vpack.i.bf16 %v1009_v4, %v5798_v17 }
 0x146   : > { %4716 = vrot.lane.b32.xlu1 %v4715_v9, %s7195_s21  ;;  %755 = vst.msk [vmem:[#allocation2 + $0xb0] sm:$0xff] %vm732_vm2, %v721_v56  ;;  %v657_v19 = vadd.f32 %v5644_v39, %v656_v15  ;;  %v1033_v9 = vld [vmem:[#allocation2 + $0x66] ss:$2 sm:$0xff]  ;;  %v1067_v56 = vld [vmem:[#allocation2 + $0x67] ss:$2 sm:$0xff]  ;;  %v4775_v23 = vpack.i.bf16 %v5867_v8, %v1009_v4 }
 0x147   : > { %4676 = vrot.lane.b32.xlu0 %v4675_v12, %s7211_s17  ;;  %v4406_v24 = vpop.f32.mrf.mxu0 }
 0x148   : > { %v722_v27 = vmax.f32 %v657_v19, 0.0  ;;  %v1094_v19 = vmax.f32 %v1033_v9, %v1067_v56  ;;  %v5875_v24 = vmax.f32 %v1035_v16, %v1069_v14  ;;  %v1407_v9 = vld [vmem:[#allocation2 + $0x6f] ss:$2 sm:$0xff]  ;;  %v1409_v16 = vld [vmem:[#allocation2 + $0x7f] ss:$2 sm:$0xff] }
 0x149   : > { %v661_v35 = vpop.f32.mrf.mxu0 }
 0x14a   : > { %4721 = vrot.lane.b32.xlu1 %v4720_v25, %s7193_s22  ;;  %756 = vst.msk [vmem:[#allocation2 + $0xb8] sm:$0xff] %vm732_vm2, %v722_v27  ;;  %v662_v38 = vadd.f32 %v5644_v39, %v661_v35  ;;  %v1118_v25 = vld [vmem:[#allocation2 + $0x68] ss:$2 sm:$0xff]  ;;  %v4745_v34 = vpack.i.bf16 %v1094_v19, %v5807_v32 }
 0x14b   : > { %4681 = vrot.lane.b32.xlu0 %v4680_v28, %s7197_s16  ;;  %v4409_v40 = vpop.f32.mrf.mxu0  ;;  %v1120_v28 = vld [vmem:[#allocation2 + $0x78] ss:$2 sm:$0xff]  ;;  %v1179_v35 = vmax.f32 %v1118_v25, %v1152_v5  ;;  %v903_v5 = vld [vmem:[#allocation2 + $0x93] ss:$2 sm:$0xff] }
 0x14c   : > { %v723_v21 = vmax.f32 %v662_v38, 0.0  ;;  %v4780_v38 = vpack.i.bf16 %v5875_v24, %v1094_v19  ;;  %v5883_v40 = vmax.f32 %v1120_v28, %v1154_v29  ;;  %v869_v25 = vld [vmem:[#allocation2 + $0x92] ss:$2 sm:$0xff] }
 0x14d   : > { %v664_v30 = vpop.f32.mrf.mxu0  ;;  %v4750_v50 = vpack.i.bf16 %v1179_v35, %v5815_v47  ;;  %v782_v29 = vld [vmem:[#allocation2 + $0x80] ss:$2 sm:$0xff] }
 0x14e   : > { %4726 = vrot.lane.b32.xlu1 %v4725_v41, %s7191_s23  ;;  %757 = vst.msk [vmem:[#allocation2 + $0xc0] sm:$0xff] %vm732_vm2, %v723_v21  ;;  %v665_v51 = vadd.f32 %v5644_v39, %v664_v30  ;;  %v1203_v41 = vld [vmem:[#allocation2 + $0x6a] ss:$2 sm:$0xff]  ;;  %v1237_v21 = vld [vmem:[#allocation2 + $0x6b] ss:$2 sm:$0xff]  ;;  %v5886_v30 = vpop.permute.xlu1 %1762 }
 0x14f   : > { %4686 = vrot.lane.b32.xlu0 %v4685_v53, %s7189_s27  ;;  %v4410_v52 = vpop.f32.mrf.mxu0 }
 0x150   : > { %v724_v57 = vmax.f32 %v665_v51, 0.0  ;;  %v1264_v51 = vmax.f32 %v1203_v41, %v1237_v21  ;;  %v5920_v41 = vmax.f32 %v869_v25, %v903_v5  ;;  %v1207_v25 = vld [vmem:[#allocation2 + $0x8a] ss:$2 sm:$0xff]  ;;  %v1241_v5 = vld [vmem:[#allocation2 + $0x8b] ss:$2 sm:$0xff] }
 0x151   : > { %v669_v42 = vpop.f32.mrf.mxu0 }
 0x152   : > { %4731 = vrot.lane.b32.xlu1 %v4730_v54, %s7183_s25  ;;  %758 = vst.msk [vmem:[#allocation2 + $0xc8] sm:$0xff] %vm732_vm2, %v724_v57  ;;  %v670_v62 = vadd.f32 %v5644_v39, %v669_v42  ;;  %s7213_s25 = smov 24   ;;  %v4785_v54 = vpack.i.bf16 %v5883_v40, %v1179_v35  ;;  %v1288_v57 = vld [vmem:[#allocation2 + $0x6c] ss:$2 sm:$0xff]  ;;  %v1324_v42 = vld [vmem:[#allocation2 + $0x7d] ss:$2 sm:$0xff]  ;;  %v4755_v33 = vpack.i.bf16 %v1264_v51, %v5823_v60 }
 0x153   : > { %4691 = vrot.lane.b32.xlu0 %v4690_v36, %s7187_s14  ;;  %v4413_v0 = vpop.f32.mrf.mxu0  ;;  %v1322_v36 = vld [vmem:[#allocation2 + $0x6d] ss:$2 sm:$0xff]  ;;  %v4790_v4 = vpack.i.bf16 %v5893_v55, %v1264_v51 }
 0x154   : > { %v725_v49 = vmax.f32 %v670_v62, 0.0  ;;  %v1349_v62 = vmax.f32 %v1288_v57, %v1322_v36  ;;  %v5900_v0 = vpop.permute.xlu1 %1830  ;;  %v901_v35 = vld [vmem:[#allocation2 + $0x83] ss:$2 sm:$0xff] }
 0x155   : > { %v672_v12 = vpop.f32.mrf.mxu0  ;;  %v986_v51 = vld [vmem:[#allocation2 + $0x85] ss:$2 sm:$0xff] }
 0x156   : > { %4736 = vrot.lane.b32.xlu1 %v4735_v3, %s7181_s24  ;;  %759 = vst.msk [vmem:[#allocation2 + $0xd0] sm:$0xff] %vm732_vm2, %v725_v49  ;;  %v673_v15 = vadd.f32 %v5644_v39, %v672_v12  ;;  %s7212_s24 = smov 16   ;;  %v5903_v49 = vmax.f32 %v1290_v59, %v1324_v42  ;;  %v1375_v12 = vld [vmem:[#allocation2 + $0x7e] ss:$2 sm:$0xff]  ;;  %v1073_v42 = vld [vmem:[#allocation2 + $0x97] ss:$2 sm:$0xff] }
 0x157   : > { %4771 = vrot.lane.b32.xlu0 %v4770_v7, %s7185_s29  ;;  %v4414_v63 = vpop.f32.mrf.mxu0  ;;  %s7214_s29 = smov 32   ;;  %v1373_v7 = vld [vmem:[#allocation2 + $0x6e] ss:$2 sm:$0xff] }
 0x158   : > { %v726_v20 = vmax.f32 %v673_v15, 0.0  ;;  %v4760_v15 = vpack.i.bf16 %v1349_v62, %v5831_v11  ;;  %v1434_v63 = vmax.f32 %v1373_v7, %v1407_v9  ;;  %v4795_v19 = vpack.i.bf16 %v5903_v49, %v1349_v62  ;;  %v5914_v28 = vpop.permute.xlu1 %1898  ;;  %v1039_v59 = vld [vmem:[#allocation2 + $0x96] ss:$2 sm:$0xff]  ;;  %v1158_v9 = vld [vmem:[#allocation2 + $0x99] ss:$2 sm:$0xff] }
 0x159   : > { %v677_v27 = vpop.f32.mrf.mxu0  ;;  %v1124_v7 = vld [vmem:[#allocation2 + $0x98] ss:$2 sm:$0xff] }
 0x15a   : > { %4741 = vrot.lane.b32.xlu1 %v4740_v18, %s7209_s26  ;;  %760 = vst.msk [vmem:[#allocation2 + $0xd8] sm:$0xff] %vm732_vm2, %v726_v20  ;;  %v678_v31 = vadd.f32 %v5644_v39, %v677_v27  ;;  %v5911_v20 = vmax.f32 %v1375_v12, %v1409_v16  ;;  %v5947_v16 = vpop.permute.xlu0 %2087 }
 0x15b   : > { %4776 = vrot.lane.b32.xlu0 %v4775_v23, %s7212_s24  ;;  %v4417_v17 = vpop.f32.mrf.mxu0  ;;  %v780_v23 = vld [vmem:[#allocation2 + $0x70] ss:$2 sm:$0xff]  ;;  %7219 = vst [vmem:[#allocation10_spill] sm:$0xff] %v5947_v16 }
 0x15c   : > { %v727_v37 = vmax.f32 %v678_v31, 0.0  ;;  %v814_v31 = vld [vmem:[#allocation2 + $0x71] ss:$2 sm:$0xff]  ;;  %v816_v17 = vld [vmem:[#allocation2 + $0x81] ss:$2 sm:$0xff]  ;;  %v5931_v57 = vpop.permute.xlu1 %1966 }
 0x15d   : > { %v680_v53 = vpop.f32.mrf.mxu0  ;;  %v5923_v45 = vmax.f32 %v780_v23, %v814_v31  ;;  %v5925_v46 = vmax.f32 %v782_v29, %v816_v17 }
 0x15e   : > { %4746 = vrot.lane.b32.xlu1 %v4745_v34, %s7210_s28  ;;  %761 = vst.msk [vmem:[#allocation2 + $0xe0] sm:$0xff] %vm732_vm2, %v727_v37  ;;  %v681_v22 = vadd.f32 %v5644_v39, %v680_v53  ;;  %v867_v34 = vld [vmem:[#allocation2 + $0x82] ss:$2 sm:$0xff]  ;;  %v4800_v53 = vpack.i.bf16 %v5911_v20, %v1434_v63 }
 0x15f   : > { %4781 = vrot.lane.b32.xlu0 %v4780_v38, %s7213_s25  ;;  %v4418_v32 = vpop.f32.mrf.mxu0  ;;  %v4765_v38 = vpack.i.bf16 %v1434_v63, %v5839_v26  ;;  %v952_v26 = vld [vmem:[#allocation2 + $0x84] ss:$2 sm:$0xff]  ;;  %v5950_v63 = vmax.f32 %v1124_v7, %v1158_v9 }
 0x160   : > { %v728_v52 = vmax.f32 %v681_v22, 0.0  ;;  %v954_v22 = vld [vmem:[#allocation2 + $0x94] ss:$2 sm:$0xff]  ;;  %v988_v32 = vld [vmem:[#allocation2 + $0x95] ss:$2 sm:$0xff] }
 0x161   : > { %v685_v58 = vpop.f32.mrf.mxu0  ;;  %v5933_v36 = vmax.f32 %v954_v22, %v988_v32 }
 0x162   : > { %4751 = vrot.lane.b32.xlu1 %v4750_v50, %s7211_s17  ;;  %762 = vst.msk [vmem:[#allocation2 + $0xe8] sm:$0xff] %vm732_vm2, %v728_v52  ;;  %v686_v61 = vadd.f32 %v5644_v39, %v685_v58  ;;  %v4805_v58 = vpack.i.bf16 %v5925_v46, %v5923_v45 }
 0x163   : > { %4786 = vrot.lane.b32.xlu0 %v4785_v54, %s7214_s29  ;;  %v4421_v47 = vpop.f32.mrf.mxu0 }
 0x164   : > { %v729_v3 = vmax.f32 %v686_v61, 0.0  ;;  %v1011_v61 = vmax.f32 %v952_v26, %v986_v51  ;;  %v1037_v47 = vld [vmem:[#allocation2 + $0x86] ss:$2 sm:$0xff] }
 0x165   : > { %v688_v56 = vpop.f32.mrf.mxu0  ;;  %v1377_v51 = vld [vmem:[#allocation2 + $0x8e] ss:$2 sm:$0xff] }
 0x166   : > { %4756 = vrot.lane.b32.xlu1 %v4755_v33, %s7197_s16  ;;  %763 = vst.msk [vmem:[#allocation2 + $0xf0] sm:$0xff] %vm732_vm2, %v729_v3  ;;  %v689_v14 = vadd.f32 %v5644_v39, %v688_v56  ;;  %v1071_v33 = vld [vmem:[#allocation2 + $0x87] ss:$2 sm:$0xff]  ;;  %v4850_v62 = vpack.i.bf16 %v5933_v36, %v1011_v61  ;;  %v5940_v3 = vmax.f32 %v1039_v59, %v1073_v42  ;;  %v5944_v56 = vpop.permute.xlu1 %2034  ;;  %v784_v42 = vld [vmem:[#allocation2 + $0x90] ss:$2 sm:$0xff] }
 0x167   : > { %4791 = vrot.lane.b32.xlu0 %v4790_v4, %s7195_s21  ;;  %v4422_v60 = vpop.f32.mrf.mxu0  ;;  %7217 = vst [vmem:[#allocation9_spill] sm:$0xff] %v5944_v56  ;;  %v1096_v12 = vmax.f32 %v1037_v47, %v1071_v33  ;;  %v786_v47 = vld [vmem:[#allocation2 + $0xa0] ss:$2 sm:$0xff]  ;;  %v818_v33 = vld [vmem:[#allocation2 + $0x91] ss:$2 sm:$0xff] }
 0x168   : > { %v730_v18 = vmax.f32 %v689_v14, 0.0  ;;  %v1122_v14 = vld [vmem:[#allocation2 + $0x88] ss:$2 sm:$0xff]  ;;  %v1156_v60 = vld [vmem:[#allocation2 + $0x89] ss:$2 sm:$0xff] }
 0x169   : > { %v693_v27 = vpop.f32.mrf.mxu0  ;;  %v1181_v23 = vmax.f32 %v1122_v14, %v1156_v60  ;;  %v766_v60 = vld [vmem:[#allocation2] ss:$2 sm:$0xff]  ;;  %v1421_v56 = vld [vmem:[#allocation2 + $0xdf] ss:$2 sm:$0xff] }
 0x16a   : > { %4761 = vrot.lane.b32.xlu1 %v4760_v15, %s7189_s27  ;;  %764 = vst.msk [vmem:[#allocation2 + $0xf8] sm:$0xff] %vm732_vm2, %v730_v18  ;;  %v694_v11 = vadd.f32 %v5644_v39, %v693_v27  ;;  %v926_v39 = vmax.f32 %v867_v34, %v901_v35  ;;  %s7216_s27 = smov 64   ;;  %v4855_v15 = vpack.i.bf16 %v5940_v3, %v1096_v12  ;;  %v1328_v34 = vld [vmem:[#allocation2 + $0x9d] ss:$2 sm:$0xff]  ;;  %v1387_v16 = vld [vmem:[#allocation2 + $0xde] ss:$2 sm:$0xff] }
 0x16b   : > { %4796 = vrot.lane.b32.xlu0 %v4795_v19, %s7193_s22  ;;  %v4425_v37 = vpop.f32.mrf.mxu0  ;;  %v4815_v18 = vpack.i.bf16 %v1011_v61, %v5867_v8  ;;  %v1243_v19 = vld [vmem:[#allocation2 + $0x9b] ss:$2 sm:$0xff]  ;;  %v4860_v29 = vpack.i.bf16 %v5950_v63, %v1181_v23  ;;  %v1294_v8 = vld [vmem:[#allocation2 + $0x9c] ss:$2 sm:$0xff]  ;;  %v1266_v35 = vmax.f32 %v1207_v25, %v1241_v5 }
 0x16c   : > { %v731_v21 = vmax.f32 %v694_v11, 0.0  ;;  %v4845_v54 = vpack.i.bf16 %v5920_v41, %v926_v39  ;;  %v4810_v4 = vpack.i.bf16 %v926_v39, %v5859_v48  ;;  %v1209_v48 = vld [vmem:[#allocation2 + $0x9a] ss:$2 sm:$0xff]  ;;  %v4820_v11 = vpack.i.bf16 %v1096_v12, %v5875_v24  ;;  %v1413_v24 = vld [vmem:[#allocation2 + $0x9f] ss:$2 sm:$0xff] }
 0x16d   : > { %v696_v50 = vpop.f32.mrf.mxu0  ;;  %v5958_v31 = vmax.f32 %v1209_v48, %v1243_v19  ;;  %v1292_v37 = vld [vmem:[#allocation2 + $0x8c] ss:$2 sm:$0xff]  ;;  %v5968_v22 = vmax.f32 %v1294_v8, %v1328_v34  ;;  %v5986_v12 = vmax.f32 %v784_v42, %v818_v33  ;;  %v905_v48 = vld [vmem:[#allocation2 + $0xa3] ss:$2 sm:$0xff]  ;;  %v907_v25 = vld [vmem:[#allocation2 + $0xb3] ss:$2 sm:$0xff] }
 0x16e   : > { %4766 = vrot.lane.b32.xlu1 %v4765_v38, %s7187_s14  ;;  %765 = vst.msk [vmem:[#allocation2 + $0x100] sm:$0xff] %vm732_vm2, %v731_v21  ;;  %s7215_s14 = smov 8   ;;  %v1326_v38 = vld [vmem:[#allocation2 + $0x8d] ss:$2 sm:$0xff]  ;;  %v4825_v50 = vpack.i.bf16 %v1181_v23, %v5883_v40  ;;  %v1379_v39 = vld [vmem:[#allocation2 + $0x9e] ss:$2 sm:$0xff]  ;;  %v4830_v40 = vpack.i.bf16 %v1266_v35, %v5893_v55 }
 0x16f   : > { %4801 = vrot.lane.b32.xlu0 %v4800_v53, %s7191_s23  ;;  %v4426_v52 = vpop.f32.mrf.mxu0  ;;  %s7218_s23 = smov 72   ;;  %v4865_v53 = vpack.i.bf16 %v5958_v31, %v1266_v35  ;;  %v1351_v26 = vmax.f32 %v1292_v37, %v1326_v38  ;;  %v5976_v59 = vmax.f32 %v1379_v39, %v1413_v24  ;;  %v800_v19 = vld [vmem:[#allocation2 + $0x1] ss:$2 sm:$0xff]  ;;  %v873_v23 = vld [vmem:[#allocation2 + $0xb2] ss:$2 sm:$0xff] }
 0x170   : > { %v1411_v52 = vld [vmem:[#allocation2 + $0x8f] ss:$2 sm:$0xff]  ;;  %v833_v37 = vmax.f32 %v766_v60, %v800_v19  ;;  %v956_v39 = vld [vmem:[#allocation2 + $0xa4] ss:$2 sm:$0xff]  ;;  %v958_v24 = vld [vmem:[#allocation2 + $0xb4] ss:$2 sm:$0xff] }
 0x171   : > { %v4835_v55 = vpack.i.bf16 %v1351_v26, %v5903_v49  ;;  %v1075_v33 = vld [vmem:[#allocation2 + $0xa7] ss:$2 sm:$0xff] }
 0x172   : > { %4846 = vrot.lane.b32.xlu1 %v4845_v54, %s7215_s14 }
 0x173   : > { %4806 = vrot.lane.b32.xlu0 %v4805_v58, %s7216_s27  ;;  %v4870_v58 = vpack.i.bf16 %v5968_v22, %v1351_v26 }
 0x176   : > { %4851 = vrot.lane.b32.xlu1 %v4850_v62, %s7212_s24  ;;  %v820_v62 = vld [vmem:[#allocation2 + $0xa1] ss:$2 sm:$0xff] }
 0x177   : > { %4811 = vrot.lane.b32.xlu0 %v4810_v4, %s7218_s23  ;;  %v1436_v4 = vmax.f32 %v1377_v51, %v1411_v52  ;;  %v5988_v14 = vmax.f32 %v786_v47, %v820_v62  ;;  %v1041_v47 = vld [vmem:[#allocation2 + $0xa6] ss:$2 sm:$0xff] }
 0x178   : > { %v1098_v19 = vmax.f32 %v1041_v47, %v1075_v33  ;;  %v1213_v47 = vld [vmem:[#allocation2 + $0xba] ss:$2 sm:$0xff]  ;;  %v1247_v33 = vld [vmem:[#allocation2 + $0xbb] ss:$2 sm:$0xff] }
 0x179   : > { %v4875_v9 = vpack.i.bf16 %v5976_v59, %v1436_v4  ;;  %v4880_v49 = vpack.i.bf16 %v5988_v14, %v5986_v12 }
 0x17a   : > { %4856 = vrot.lane.b32.xlu1 %v4855_v15, %s7213_s25 }
 0x17b   : > { %4816 = vrot.lane.b32.xlu0 %v4815_v18, %s7209_s26  ;;  %v871_v18 = vld [vmem:[#allocation2 + $0xa2] ss:$2 sm:$0xff] }
 0x17c   : > { %v5955_v27 = vpop.permute.xlu1 %4556  ;;  %v928_v35 = vmax.f32 %v871_v18, %v905_v48  ;;  %v1077_v18 = vld [vmem:[#allocation2 + $0xb7] ss:$2 sm:$0xff] }
 0x17d   : > { %v5960_v17 = vpop.permute.xlu0 %4546  ;;  %v4559_v62 = vunpack.i.h.bf16 %v5955_v27 }
 0x17e   : > { %4861 = vrot.lane.b32.xlu1 %v4860_v29, %s7214_s29  ;;  %v4549_v5 = vunpack.i.h.bf16 %v5960_v17  ;;  %v4548_v29 = vunpack.i.l.bf16 %v5960_v17  ;;  %v990_v17 = vld [vmem:[#allocation2 + $0xa5] ss:$2 sm:$0xff]  ;;  %v4885_v42 = vpack.i.bf16 %v928_v35, %v5920_v41 }
 0x17f   : > { %4821 = vrot.lane.b32.xlu0 %v4820_v11, %s7210_s28 }
 0x180   : > { %v5965_v21 = vpop.permute.xlu1 %4561  ;;  %v2425_v26 = vsel %vm732_vm2, %v5701_v13, %v4549_v5  ;;  %v2424_v51 = vsel %vm732_vm2, %v833_v37, %v4548_v29  ;;  %v4558_v13 = vunpack.i.l.bf16 %v5955_v27 }
 0x181   : > { %v4552_v32 = vpop.permute.xlu0 %4551  ;;  %v4564_v27 = vunpack.i.h.bf16 %v5965_v21 }
 0x182   : > { %4866 = vrot.lane.b32.xlu1 %v4865_v53, %s7195_s21  ;;  %s7221_s21 = smov 112   ;;  %v4554_v11 = vunpack.i.h.bf16 %v4552_v32  ;;  %v4553_v8 = vunpack.i.l.bf16 %v4552_v32  ;;  %v4840_v53 = vpack.i.bf16 %v1436_v4, %v5911_v20  ;;  %v992_v32 = vld [vmem:[#allocation2 + $0xb5] ss:$2 sm:$0xff] }
 0x183   : > { %4826 = vrot.lane.b32.xlu0 %v4825_v50, %s7211_s17  ;;  %v6004_v50 = vmax.f32 %v873_v23, %v907_v25  ;;  %v6021_v60 = vmax.f32 %v958_v24, %v992_v32  ;;  %v1126_v23 = vld [vmem:[#allocation2 + $0xa8] ss:$2 sm:$0xff]  ;;  %v4563_v25 = vunpack.i.l.bf16 %v5965_v21 }
 0x184   : > { %v5973_v54 = vpop.permute.xlu1 %4571  ;;  %v2442_v52 = vsel %vm2441_vm3, %v2424_v51, %v4553_v8  ;;  %v2443_v20 = vsel %vm2441_vm3, %v2425_v26, %v4554_v11  ;;  %v1160_v8 = vld [vmem:[#allocation2 + $0xa9] ss:$2 sm:$0xff] }
 0x185   : > { %v5978_v61 = vpop.permute.xlu0 %4566  ;;  %v2460_v48 = vsel %vm2459_vm4, %v2442_v52, %v4558_v13  ;;  %v2461_v41 = vsel %vm2459_vm4, %v2443_v20, %v4559_v62  ;;  %v1245_v26 = vld [vmem:[#allocation2 + $0xab] ss:$2 sm:$0xff]  ;;  %v4574_v51 = vunpack.i.h.bf16 %v5973_v54  ;;  %v4573_v52 = vunpack.i.l.bf16 %v5973_v54 }
 0x186   : > { %4871 = vrot.lane.b32.xlu1 %v4870_v58, %s7193_s22  ;;  %s7220_s22 = smov 56   ;;  %v4569_v37 = vunpack.i.h.bf16 %v5978_v61  ;;  %v2478_v21 = vsel %vm2477_vm5, %v2460_v48, %v4563_v25  ;;  %v2479_v24 = vsel %vm2477_vm5, %v2461_v41, %v4564_v27  ;;  %v6061_v41 = vmax.f32 %v1213_v47, %v1247_v33  ;;  %v1381_v33 = vld [vmem:[#allocation2 + $0xae] ss:$2 sm:$0xff] }
 0x187   : > { %4831 = vrot.lane.b32.xlu0 %v4830_v40, %s7197_s16  ;;  %s7222_s16 = smov 120   ;;  %v1013_v40 = vmax.f32 %v956_v39, %v990_v17 }
 0x188   : > { %v5983_v7 = vpop.permute.xlu1 %4581  ;;  %v2497_v62 = vsel %vm2495_vm6, %v2479_v24, %v4569_v37 }
 0x189   : > { %v5990_v15 = vpop.permute.xlu0 %4576  ;;  %v4890_v29 = vpack.i.bf16 %v1013_v40, %v5933_v36  ;;  %v4925_v17 = vpack.i.bf16 %v6021_v60, %v1013_v40  ;;  %v1183_v36 = vmax.f32 %v1126_v23, %v1160_v8  ;;  %v1330_v23 = vld [vmem:[#allocation2 + $0xad] ss:$2 sm:$0xff]  ;;  %v2514_v27 = vsel %vm479_vm1, %v2497_v62, %v4574_v51 }
 0x18a   : > { %4876 = vrot.lane.b32.xlu1 %v4875_v9, %s7220_s22  ;;  %v4920_v9 = vpack.i.bf16 %v6004_v50, %v928_v35  ;;  %v1162_v35 = vld [vmem:[#allocation2 + $0xb9] ss:$2 sm:$0xff]  ;;  %v4584_v25 = vunpack.i.h.bf16 %v5983_v7 }
 0x18b   : > { %4836 = vrot.lane.b32.xlu0 %v4835_v55, %s7221_s21  ;;  %v1043_v55 = vld [vmem:[#allocation2 + $0xb6] ss:$2 sm:$0xff]  ;;  %v4900_v54 = vpack.i.bf16 %v1183_v36, %v5950_v63  ;;  %v1415_v62 = vld [vmem:[#allocation2 + $0xaf] ss:$2 sm:$0xff] }
 0x18c   : > { %v5997_v34 = vpop.permute.xlu1 %4586  ;;  %v6032_v11 = vmax.f32 %v1043_v55, %v1077_v18  ;;  %v4578_v55 = vunpack.i.l.bf16 %v5990_v15 }
 0x18d   : > { %v6001_v38 = vpop.permute.xlu0 %4621 }
 0x18e   : > { %4881 = vrot.lane.b32.xlu1 %v4880_v49, %s7216_s27  ;;  %v1128_v49 = vld [vmem:[#allocation2 + $0xb8] ss:$2 sm:$0xff]  ;;  %v4930_v40 = vpack.i.bf16 %v6032_v11, %v1098_v19 }
 0x18f   : > { %4841 = vrot.lane.b32.xlu0 %v4840_v53, %s7222_s16  ;;  %v4568_v53 = vunpack.i.l.bf16 %v5978_v61  ;;  %v6043_v32 = vmax.f32 %v1128_v49, %v1162_v35  ;;  %v1211_v61 = vld [vmem:[#allocation2 + $0xaa] ss:$2 sm:$0xff]  ;;  %v1332_v35 = vld [vmem:[#allocation2 + $0xbd] ss:$2 sm:$0xff] }
 0x190   : > { %v6013_v58 = vpop.permute.xlu1 %4591  ;;  %v1298_v49 = vld [vmem:[#allocation2 + $0xbc] ss:$2 sm:$0xff] }
 0x191   : > { %v6018_v4 = vpop.permute.xlu0 %4626  ;;  %v2496_v13 = vsel %vm2495_vm6, %v2478_v21, %v4568_v53  ;;  %v4935_v48 = vpack.i.bf16 %v6043_v32, %v1183_v36  ;;  %v4589_v53 = vunpack.i.h.bf16 %v5997_v34  ;;  %v4594_v24 = vunpack.i.h.bf16 %v6013_v58 }
 0x192   : > { %4886 = vrot.lane.b32.xlu1 %v4885_v42, %s7218_s23  ;;  %v4895_v42 = vpack.i.bf16 %v1098_v19, %v5940_v3  ;;  %v1268_v3 = vmax.f32 %v1211_v61, %v1245_v26  ;;  %v1296_v19 = vld [vmem:[#allocation2 + $0xac] ss:$2 sm:$0xff]  ;;  %v4593_v36 = vunpack.i.l.bf16 %v6013_v58 }
 0x193   : > { %4921 = vrot.lane.b32.xlu0 %v4920_v9, %s7215_s14  ;;  %v4579_v9 = vunpack.i.h.bf16 %v5990_v15  ;;  %v2513_v15 = vsel %vm479_vm1, %v2496_v13, %v4573_v52  ;;  %v1353_v61 = vmax.f32 %v1296_v19, %v1330_v23 }
 0x194   : > { %v6029_v5 = vpop.permute.xlu1 %4596  ;;  %v2531_v63 = vsel %vm2530_vm7, %v2513_v15, %v4578_v55  ;;  %v4940_v52 = vpack.i.bf16 %v6061_v41, %v1268_v3 }
 0x195   : > { %v6036_v39 = vpop.permute.xlu0 %4631  ;;  %v2532_v37 = vsel %vm2530_vm7, %v2514_v27, %v4579_v9  ;;  %v4599_v26 = vunpack.i.h.bf16 %v6029_v5  ;;  %v4598_v51 = vunpack.i.l.bf16 %v6029_v5 }
 0x196   : > { %4891 = vrot.lane.b32.xlu1 %v4890_v29, %s7209_s26  ;;  %v4583_v29 = vunpack.i.l.bf16 %v5983_v7  ;;  %v4905_v7 = vpack.i.bf16 %v1268_v3, %v5958_v31 }
 0x197   : > { %4926 = vrot.lane.b32.xlu0 %v4925_v17, %s7212_s24  ;;  %v4588_v17 = vunpack.i.l.bf16 %v5997_v34  ;;  %v6081_v34 = vmax.f32 %v1298_v49, %v1332_v35 }
 0x198   : > { %v6047_v20 = vpop.permute.xlu1 %4601 }
 0x199   : > { %v6055_v18 = vpop.permute.xlu0 %4636  ;;  %v4604_v58 = vunpack.i.h.bf16 %v6047_v20  ;;  %v4603_v47 = vunpack.i.l.bf16 %v6047_v20 }
 0x19a   : > { %4896 = vrot.lane.b32.xlu1 %v4895_v42, %s7210_s28  ;;  %v2550_v42 = vsel %vm2548_vm8, %v2532_v37, %v4584_v25  ;;  %v4945_v37 = vpack.i.bf16 %v6081_v34, %v1353_v61 }
 0x19b   : > { %4931 = vrot.lane.b32.xlu0 %v4930_v40, %s7213_s25  ;;  %v2549_v40 = vsel %vm2548_vm8, %v2531_v63, %v4583_v29  ;;  %v2568_v13 = vsel %vm2566_vm9, %v2550_v42, %v4589_v53  ;;  %v4910_v29 = vpack.i.bf16 %v1353_v61, %v5968_v22  ;;  %v877_v22 = vld [vmem:[#allocation2 + $0xd2] ss:$2 sm:$0xff] }
 0x19c   : > { %v4607_v8 = vpop.permute.xlu1 %4606  ;;  %v2567_v5 = vsel %vm2566_vm9, %v2549_v40, %v4588_v17  ;;  %v2586_v23 = vsel %vm2584_vm10, %v2568_v13, %v4594_v24  ;;  %v790_v61 = vld [vmem:[#allocation2 + $0xc0] ss:$2 sm:$0xff]  ;;  %v909_v13 = vld [vmem:[#allocation2 + $0xc3] ss:$2 sm:$0xff] }
 0x19d   : > { %v6071_v21 = vpop.permute.xlu0 %4641  ;;  %v4609_v9 = vunpack.i.h.bf16 %v4607_v8  ;;  %v4608_v55 = vunpack.i.l.bf16 %v4607_v8  ;;  %v2585_v19 = vsel %vm2584_vm10, %v2567_v5, %v4593_v36  ;;  %v2604_v25 = vsel %vm2602_vm11, %v2586_v23, %v4599_v26 }
 0x19e   : > { %4901 = vrot.lane.b32.xlu1 %v4900_v54, %s7211_s17  ;;  %v1383_v54 = vld [vmem:[#allocation2 + $0xbe] ss:$2 sm:$0xff]  ;;  %v2603_v20 = vsel %vm2602_vm11, %v2585_v19, %v4598_v51  ;;  %v1438_v8 = vmax.f32 %v1381_v33, %v1415_v62  ;;  %v2622_v35 = vsel %vm2620_vm12, %v2604_v25, %v4604_v58  ;;  %v822_v58 = vld [vmem:[#allocation2 + $0xb1] ss:$2 sm:$0xff] }
 0x19f   : > { %4936 = vrot.lane.b32.xlu0 %v4935_v48, %s7214_s29  ;;  %v1417_v48 = vld [vmem:[#allocation2 + $0xbf] ss:$2 sm:$0xff]  ;;  %v2621_v49 = vsel %vm2620_vm12, %v2603_v20, %v4603_v47  ;;  %v2640_v17 = vsel %vm2638_vm13, %v2622_v35, %v4609_v9  ;;  %v788_v51 = vld [vmem:[#allocation2 + $0xb0] ss:$2 sm:$0xff] }
 0x1a0   : > { %v4612_v31 = vpop.permute.xlu1 %4611  ;;  %v6101_v53 = vmax.f32 %v1383_v54, %v1417_v48  ;;  %v2639_v24 = vsel %vm2638_vm13, %v2621_v49, %v4608_v55  ;;  %v824_v47 = vld [vmem:[#allocation2 + $0xc1] ss:$2 sm:$0xff]  ;;  %v875_v62 = vld [vmem:[#allocation2 + $0xc2] ss:$2 sm:$0xff]  ;;  %v4915_v55 = vpack.i.bf16 %v1438_v8, %v5976_v59  ;;  %v6121_v23 = vmax.f32 %v788_v51, %v822_v58 }
 0x1a1   : > { %v6089_v3 = vpop.permute.xlu0 %4646  ;;  %v4614_v15 = vunpack.i.h.bf16 %v4612_v31  ;;  %v4613_v27 = vunpack.i.l.bf16 %v4612_v31  ;;  %v996_v20 = vld [vmem:[#allocation2 + $0xd5] ss:$2 sm:$0xff]  ;;  %v930_v25 = vmax.f32 %v875_v62, %v909_v13  ;;  %v994_v59 = vld [vmem:[#allocation2 + $0xc5] ss:$2 sm:$0xff]  ;;  %v1215_v58 = vld [vmem:[#allocation2 + $0xca] ss:$2 sm:$0xff] }
 0x1a2   : > { %4906 = vrot.lane.b32.xlu1 %v4905_v7, %s7223_s0  ;;  %v4950_v19 = vpack.i.bf16 %v6101_v53, %v1438_v8  ;;  %v1079_v51 = vld [vmem:[#allocation2 + $0xc7] ss:$2 sm:$0xff]  ;;  %v1132_v13 = vld [vmem:[#allocation2 + $0xd8] ss:$2 sm:$0xff] }
 0x1a3   : > { %4941 = vrot.lane.b32.xlu0 %v4940_v52, %s7224_s1  ;;  %v911_v52 = vld [vmem:[#allocation2 + $0xd3] ss:$2 sm:$0xff]  ;;  %v2657_v42 = vsel %vm2656_vm14, %v2639_v24, %v4613_v27  ;;  %v2658_v40 = vsel %vm2656_vm14, %v2640_v17, %v4614_v15  ;;  %v6123_v15 = vmax.f32 %v790_v61, %v824_v47  ;;  %v962_v27 = vld [vmem:[#allocation2 + $0xd4] ss:$2 sm:$0xff] }
 0x1a4   : > { %v4617_v63 = vpop.permute.xlu1 %4616  ;;  %v6116_v54 = vmax.f32 %v877_v22, %v911_v52  ;;  %v6132_v35 = vmax.f32 %v962_v27, %v996_v20  ;;  %v1045_v17 = vld [vmem:[#allocation2 + $0xc6] ss:$2 sm:$0xff]  ;;  %v1047_v24 = vld [vmem:[#allocation2 + $0xd6] ss:$2 sm:$0xff]  ;;  %v1164_v52 = vld [vmem:[#allocation2 + $0xc9] ss:$2 sm:$0xff] }
 0x1a5   : > { %v4619_v36 = vunpack.i.h.bf16 %v4617_v63  ;;  %v4618_v7 = vunpack.i.l.bf16 %v4617_v63  ;;  %v6105_v26 = vpop.permute.xlu0 %4651  ;;  %v1130_v22 = vld [vmem:[#allocation2 + $0xc8] ss:$2 sm:$0xff]  ;;  %v1249_v47 = vld [vmem:[#allocation2 + $0xcb] ss:$2 sm:$0xff]  ;;  %v1100_v62 = vmax.f32 %v1045_v17, %v1079_v51  ;;  %v1251_v20 = vld [vmem:[#allocation2 + $0xdb] ss:$2 sm:$0xff] }
 0x1a6   : > { %4911 = vrot.lane.b32.xlu1 %v4910_v29, %s7221_s21  ;;  %v960_v29 = vld [vmem:[#allocation2 + $0xc4] ss:$2 sm:$0xff]  ;;  %v4995_v8 = vpack.i.bf16 %v6116_v54, %v930_v25 }
 0x1a7   : > { %4946 = vrot.lane.b32.xlu0 %v4945_v37, %s7225_s2  ;;  %v2675_v31 = vsel %vm2674_vm15, %v2657_v42, %v4618_v7  ;;  %v2676_v33 = vsel %vm2674_vm15, %v2658_v40, %v4619_v36  ;;  %v4955_v37 = vpack.i.bf16 %v6123_v15, %v6121_v23  ;;  %v1081_v36 = vld [vmem:[#allocation2 + $0xd7] ss:$2 sm:$0xff]  ;;  %v1015_v7 = vmax.f32 %v960_v29, %v994_v59  ;;  %v1300_v27 = vld [vmem:[#allocation2 + $0xcc] ss:$2 sm:$0xff]  ;;  %v1302_v29 = vld [vmem:[#allocation2 + $0xdc] ss:$2 sm:$0xff] }
 0x1a8   : > { %v6113_v5 = vpop.permute.xlu1 %4696  ;;  %v2692_v9 = vpack.c.bf16 %v2676_v33, %v2675_v31  ;;  %v6143_v61 = vmax.f32 %v1047_v24, %v1081_v36  ;;  %v4960_v33 = vpack.i.bf16 %v930_v25, %v6004_v50  ;;  %v1336_v59 = vld [vmem:[#allocation2 + $0xdd] ss:$2 sm:$0xff]  ;;  %v1385_v24 = vld [vmem:[#allocation2 + $0xce] ss:$2 sm:$0xff] }
 0x1a9   : > { %v6118_v48 = vpop.permute.xlu0 %4656  ;;  %v5000_v40 = vpack.i.bf16 %v6132_v35, %v1015_v7  ;;  %v1419_v36 = vld [vmem:[#allocation2 + $0xcf] ss:$2 sm:$0xff]  ;;  %v4965_v25 = vpack.i.bf16 %v1015_v7, %v6021_v60  ;;  %v4624_v60 = vunpack.i.h.bf16 %v6001_v38  ;;  %v4623_v7 = vunpack.i.l.bf16 %v6001_v38 }
 0x1aa   : > { %4444 = vmatmul.mubr.bf16.vlgmr.msra.gmra.mxu1 %v2692_v9  ;;  %4916 = vrot.lane.b32.xlu1 %v4915_v55, %s7222_s16  ;;  %v1166_v9 = vld [vmem:[#allocation2 + $0xd9] ss:$2 sm:$0xff]  ;;  %v6148_v55 = vmax.f32 %v1130_v22, %v1164_v52  ;;  %v5005_v17 = vpack.i.bf16 %v6143_v61, %v1100_v62  ;;  %v792_v22 = vld [vmem:[#allocation2 + $0xd0] ss:$2 sm:$0xff]  ;;  %v4633_v38 = vunpack.i.l.bf16 %v6036_v39 }
 0x1ab   : > { %4951 = vrot.lane.b32.xlu0 %v4950_v19, %s7220_s22  ;;  %4447 = vmatprep.mubr.msk.bf16.mxu1 %vm5429_vm0, %v7199_v1  ;;  %v1217_v19 = vld [vmem:[#allocation2 + $0xda] ss:$2 sm:$0xff]  ;;  %v6158_v51 = vmax.f32 %v1132_v13, %v1166_v9  ;;  %v826_v52 = vld [vmem:[#allocation2 + $0xd1] ss:$2 sm:$0xff]  ;;  %v4970_v1 = vpack.i.bf16 %v1100_v62, %v6032_v11  ;;  %v6174_v9 = vmax.f32 %v1385_v24, %v1419_v36  ;;  %v4629_v11 = vunpack.i.h.bf16 %v6018_v4 }
 0x1ac   : > { %v6129_v49 = vpop.permute.xlu1 %4701 }
 0x1ad   : > { %v6134_v63 = vpop.permute.xlu0 %4661 }
 0x1ae   : > { %4996 = vrot.lane.b32.xlu1 %v4995_v8, %s7215_s14  ;;  %v6152_v8 = vmax.f32 %v1215_v58, %v1249_v47  ;;  %v4975_v58 = vpack.i.bf16 %v6148_v55, %v6043_v32  ;;  %v6165_v47 = vmax.f32 %v1217_v19, %v1251_v20  ;;  %v4628_v32 = vunpack.i.l.bf16 %v6018_v4 }
 0x1af   : > { %4956 = vrot.lane.b32.xlu0 %v4955_v37, %s7216_s27  ;;  %v1334_v37 = vld [vmem:[#allocation2 + $0xcd] ss:$2 sm:$0xff]  ;;  %v6181_v19 = vmax.f32 %v792_v22, %v826_v52  ;;  %v4634_v20 = vunpack.i.h.bf16 %v6036_v39  ;;  %v4639_v4 = vunpack.i.h.bf16 %v6055_v18  ;;  %v2427_v39 = vsel %vm732_vm2, %v5795_v10, %v4624_v60 }
 0x1b0   : > { %v6140_v42 = vpop.permute.xlu1 %4706  ;;  %v6172_v13 = vmax.f32 %v1300_v27, %v1334_v37  ;;  %v4980_v62 = vpack.i.bf16 %v6152_v8, %v6061_v41  ;;  %v5010_v27 = vpack.i.bf16 %v6158_v51, %v6148_v55  ;;  %v4638_v37 = vunpack.i.l.bf16 %v6055_v18 }
 0x1b1   : > { %v6145_v31 = vpop.permute.xlu0 %4666  ;;  %v5015_v41 = vpack.i.bf16 %v6165_v47, %v6152_v8  ;;  %v2426_v55 = vsel %vm732_vm2, %v5693_v6, %v4623_v7  ;;  %v4649_v8 = vunpack.i.h.bf16 %v6089_v3  ;;  %v4654_v22 = vunpack.i.h.bf16 %v6105_v26 }
 0x1b2   : > { %5001 = vrot.lane.b32.xlu1 %v5000_v40, %s7212_s24  ;;  %v2444_v18 = vsel %vm2441_vm3, %v2426_v55, %v4628_v32 }
 0x1b3   : > { %4961 = vrot.lane.b32.xlu0 %v4960_v33, %s7218_s23  ;;  %v6167_v33 = vmax.f32 %v1302_v29, %v1336_v59  ;;  %v6189_v59 = vmax.f32 %v1387_v16, %v1421_v56  ;;  %v4644_v56 = vunpack.i.h.bf16 %v6071_v21  ;;  %v4643_v16 = vunpack.i.l.bf16 %v6071_v21 }
 0x1b4   : > { %v6154_v50 = vpop.permute.xlu1 %4711  ;;  %v2462_v10 = vsel %vm2459_vm4, %v2444_v18, %v4633_v38  ;;  %v4653_v21 = vunpack.i.l.bf16 %v6105_v26 }
 0x1b5   : > { %v6160_v40 = vpop.permute.xlu0 %4671  ;;  %v5020_v36 = vpack.i.bf16 %v6167_v33, %v6172_v13  ;;  %v2480_v60 = vsel %vm2477_vm5, %v2462_v10, %v4638_v37 }
 0x1b6   : > { %5006 = vrot.lane.b32.xlu1 %v5005_v17, %s7213_s25  ;;  %v4648_v17 = vunpack.i.l.bf16 %v6089_v3  ;;  %v4658_v3 = vunpack.i.l.bf16 %v6118_v48  ;;  %v2498_v38 = vsel %vm2495_vm6, %v2480_v60, %v4643_v16 }
 0x1b7   : > { %4966 = vrot.lane.b32.xlu0 %v4965_v25, %s7209_s26  ;;  %v2445_v25 = vsel %vm2441_vm3, %v2427_v39, %v4629_v11  ;;  %v4659_v11 = vunpack.i.h.bf16 %v6118_v48  ;;  %v4668_v39 = vunpack.i.l.bf16 %v6145_v31 }
 0x1b8   : > { %v6185_v29 = vpop.permute.xlu1 %4716  ;;  %v2463_v6 = vsel %vm2459_vm4, %v2445_v25, %v4634_v20  ;;  %v4664_v20 = vunpack.i.h.bf16 %v6134_v63  ;;  %v2515_v26 = vsel %vm479_vm1, %v2498_v38, %v4648_v17  ;;  %v828_v17 = vld [vmem:[#allocation2 + $0xe1] ss:$2 sm:$0xff]  ;;  %v5025_v38 = vpack.i.bf16 %v6189_v59, %v6174_v9 }
 0x1b9   : > { %v6193_v24 = vpop.permute.xlu0 %4676  ;;  %v2481_v7 = vsel %vm2477_vm5, %v2463_v6, %v4639_v4  ;;  %v4669_v4 = vunpack.i.h.bf16 %v6145_v31  ;;  %v2533_v48 = vsel %vm2530_vm7, %v2515_v26, %v4653_v21  ;;  %v4985_v26 = vpack.i.bf16 %v6172_v13, %v6081_v34 }
 0x1ba   : > { %5011 = vrot.lane.b32.xlu1 %v5010_v27, %s7214_s29  ;;  %v4663_v27 = vunpack.i.l.bf16 %v6134_v63  ;;  %v4673_v63 = vunpack.i.l.bf16 %v6160_v40  ;;  %v2551_v18 = vsel %vm2548_vm8, %v2533_v48, %v4658_v3  ;;  %v4679_v25 = vunpack.i.h.bf16 %v6193_v24 }
 0x1bb   : > { %4971 = vrot.lane.b32.xlu0 %v4970_v1, %s7210_s28  ;;  %v2499_v1 = vsel %vm2495_vm6, %v2481_v7, %v4644_v56  ;;  %v4674_v56 = vunpack.i.h.bf16 %v6160_v40  ;;  %v4678_v31 = vunpack.i.l.bf16 %v6193_v24 }
 0x1bc   : > { %v6215_v52 = vpop.permute.xlu1 %4721  ;;  %v2516_v37 = vsel %vm479_vm1, %v2499_v1, %v4649_v8  ;;  %v2569_v6 = vsel %vm2566_vm9, %v2551_v18, %v4663_v27 }
 0x1bd   : > { %v4682_v32 = vpop.permute.xlu0 %4681  ;;  %v2534_v55 = vsel %vm2530_vm7, %v2516_v37, %v4654_v22  ;;  %v2587_v40 = vsel %vm2584_vm10, %v2569_v6, %v4668_v39  ;;  %v913_v37 = vld [vmem:[#allocation2 + $0xe3] ss:$2 sm:$0xff] }
 0x1be   : > { %5016 = vrot.lane.b32.xlu1 %v5015_v41, %s7224_s1  ;;  %v2552_v41 = vsel %vm2548_vm8, %v2534_v55, %v4659_v11  ;;  %v4684_v22 = vunpack.i.h.bf16 %v4682_v32  ;;  %v4683_v21 = vunpack.i.l.bf16 %v4682_v32  ;;  %v2605_v24 = vsel %vm2602_vm11, %v2587_v40, %v4673_v63  ;;  %v915_v63 = vld [vmem:[#allocation2 + $0xf3] ss:$2 sm:$0xff]  ;;  %v1049_v40 = vld [vmem:[#allocation2 + $0xe6] ss:$2 sm:$0xff] }
 0x1bf   : > { %4976 = vrot.lane.b32.xlu0 %v4975_v58, %s7211_s17  ;;  %v794_v58 = vld [vmem:[#allocation2 + $0xe0] ss:$2 sm:$0xff]  ;;  %v2570_v10 = vsel %vm2566_vm9, %v2552_v41, %v4664_v20 }
 0x1c0   : > { %v6235_v16 = vpop.permute.xlu1 %4726  ;;  %v2588_v60 = vsel %vm2584_vm10, %v2570_v10, %v4669_v4  ;;  %v6253_v32 = vmax.f32 %v794_v58, %v828_v17  ;;  %v964_v58 = vld [vmem:[#allocation2 + $0xe4] ss:$2 sm:$0xff]  ;;  %v998_v17 = vld [vmem:[#allocation2 + $0xe5] ss:$2 sm:$0xff] }
 0x1c1   : > { %v4687_v8 = vpop.permute.xlu0 %4686  ;;  %v2606_v3 = vsel %vm2602_vm11, %v2588_v60, %v4674_v56  ;;  %v881_v56 = vld [vmem:[#allocation2 + $0xf2] ss:$2 sm:$0xff]  ;;  %v1083_v60 = vld [vmem:[#allocation2 + $0xe7] ss:$2 sm:$0xff] }
 0x1c2   : > { %5021 = vrot.lane.b32.xlu1 %v5020_v36, %s7225_s2  ;;  %v4689_v7 = vunpack.i.h.bf16 %v4687_v8  ;;  %v4688_v11 = vunpack.i.l.bf16 %v4687_v8  ;;  %v2623_v36 = vsel %vm2620_vm12, %v2605_v24, %v4678_v31  ;;  %v2624_v20 = vsel %vm2620_vm12, %v2606_v3, %v4679_v25  ;;  %v1000_v24 = vld [vmem:[#allocation2 + $0xf5] ss:$2 sm:$0xff] }
 0x1c3   : > { %4981 = vrot.lane.b32.xlu0 %v4980_v62, %s7223_s0  ;;  %v879_v62 = vld [vmem:[#allocation2 + $0xe2] ss:$2 sm:$0xff]  ;;  %v2642_v4 = vsel %vm2638_vm13, %v2624_v20, %v4684_v22  ;;  %v2641_v39 = vsel %vm2638_vm13, %v2623_v36, %v4683_v21  ;;  %v5030_v31 = vpack.i.bf16 %v6253_v32, %v6181_v19  ;;  %v4990_v22 = vpack.i.bf16 %v6174_v9, %v6101_v53  ;;  %v1168_v3 = vld [vmem:[#allocation2 + $0xe9] ss:$2 sm:$0xff] }
 0x1c4   : > { %v6249_v1 = vpop.permute.xlu1 %4731  ;;  %v2659_v41 = vsel %vm2656_vm14, %v2641_v39, %v4688_v11  ;;  %v2660_v18 = vsel %vm2656_vm14, %v2642_v4, %v4689_v7  ;;  %v932_v8 = vmax.f32 %v879_v62, %v913_v37  ;;  %v6275_v21 = vmax.f32 %v881_v56, %v915_v63  ;;  %v1134_v7 = vld [vmem:[#allocation2 + $0xe8] ss:$2 sm:$0xff]  ;;  %v1253_v36 = vld [vmem:[#allocation2 + $0xeb] ss:$2 sm:$0xff]  ;;  %v1136_v37 = vld [vmem:[#allocation2 + $0xf8] ss:$2 sm:$0xff] }
 0x1c5   : > { %v4692_v27 = vpop.permute.xlu0 %4691  ;;  %v966_v11 = vld [vmem:[#allocation2 + $0xf4] ss:$2 sm:$0xff]  ;;  %v1017_v53 = vmax.f32 %v964_v58, %v998_v17  ;;  %v1102_v9 = vmax.f32 %v1049_v40, %v1083_v60  ;;  %v1085_v62 = vld [vmem:[#allocation2 + $0xf7] ss:$2 sm:$0xff]  ;;  %v7226_v4 = vmov 0.0   ;;  %v6289_v56 = vmax.f32 %v1134_v7, %v1168_v3 }
 0x1c6   : > { %v4694_v48 = vunpack.i.h.bf16 %v4692_v27  ;;  %v4693_v55 = vunpack.i.l.bf16 %v4692_v27  ;;  %5026 = vrot.lane.b32.xlu1 %v5025_v38, %s7220_s22  ;;  %v1219_v38 = vld [vmem:[#allocation2 + $0xea] ss:$2 sm:$0xff]  ;;  %v5035_v27 = vpack.i.bf16 %v932_v8, %v6116_v54  ;;  %v1170_v63 = vld [vmem:[#allocation2 + $0xf9] ss:$2 sm:$0xff]  ;;  %v4699_v7 = vunpack.i.h.bf16 %v6113_v5 }
 0x1c7   : > { %4986 = vrot.lane.b32.xlu0 %v4985_v26, %s7221_s21  ;;  %v1051_v26 = vld [vmem:[#allocation2 + $0xf6] ss:$2 sm:$0xff]  ;;  %v6292_v54 = vmax.f32 %v1219_v38, %v1253_v36  ;;  %v5045_v17 = vpack.i.bf16 %v1102_v9, %v6143_v61  ;;  %v1340_v60 = vld [vmem:[#allocation2 + $0xfd] ss:$2 sm:$0xff]  ;;  %v5050_v38 = vpack.i.bf16 %v6289_v56, %v6158_v51  ;;  %v4703_v61 = vunpack.i.l.bf16 %v6129_v49 }
 0x1c8   : > { %v6265_v25 = vpop.permute.xlu1 %4736  ;;  %v2677_v34 = vsel %vm2674_vm15, %v2659_v41, %v4693_v55  ;;  %v2678_v13 = vsel %vm2674_vm15, %v2660_v18, %v4694_v48  ;;  %v5070_v48 = vpack.i.bf16 %v6275_v21, %v932_v8  ;;  %v6287_v55 = vmax.f32 %v966_v11, %v1000_v24  ;;  %v1221_v41 = vld [vmem:[#allocation2 + $0xfa] ss:$2 sm:$0xff]  ;;  %v1255_v18 = vld [vmem:[#allocation2 + $0xfb] ss:$2 sm:$0xff] }
 0x1c9   : > { %v6271_v10 = vpop.permute.xlu0 %4771  ;;  %v2693_v6 = vpack.c.bf16 %v2678_v13, %v2677_v34  ;;  %v6295_v34 = vmax.f32 %v1051_v26, %v1085_v62  ;;  %v1304_v13 = vld [vmem:[#allocation2 + $0xec] ss:$2 sm:$0xff]  ;;  %v5040_v8 = vpack.i.bf16 %v1017_v53, %v6132_v35  ;;  %v1306_v40 = vld [vmem:[#allocation2 + $0xfc] ss:$2 sm:$0xff]  ;;  %v4698_v11 = vunpack.i.l.bf16 %v6113_v5 }
 0x1ca   : > { %5031 = vrot.lane.b32.xlu1 %v5030_v31, %s7216_s27  ;;  %v1338_v31 = vld [vmem:[#allocation2 + $0xed] ss:$2 sm:$0xff]  ;;  %v5075_v3 = vpack.i.bf16 %v6287_v55, %v1017_v53  ;;  %v4704_v35 = vunpack.i.h.bf16 %v6129_v49  ;;  %v5055_v36 = vpack.i.bf16 %v6292_v54, %v6165_v47  ;;  %v4709_v5 = vunpack.i.h.bf16 %v6140_v42 }
 0x1cb   : > { %4448 = vmatmul.mubr.bf16.gmra.mxu1 %v2693_v6  ;;  %4991 = vrot.lane.b32.xlu0 %v4990_v22, %s7222_s16  ;;  %v6301_v6 = vmax.f32 %v1136_v37, %v1170_v63  ;;  %v6303_v22 = vmax.f32 %v1221_v41, %v1255_v18  ;;  %v4708_v26 = vunpack.i.l.bf16 %v6140_v42  ;;  %v5080_v53 = vpack.i.bf16 %v6295_v34, %v1102_v9 }
 0x1cc   : > { %v6279_v20 = vpop.permute.xlu1 %4741  ;;  %4451 = vmatprep.mubr.msk.bf16.mxu1 %vm5429_vm0, %v7226_v4  ;;  %v6323_v51 = vmax.f32 %v1306_v40, %v1340_v60  ;;  %v4714_v62 = vunpack.i.h.bf16 %v6154_v50  ;;  %v4713_v49 = vunpack.i.l.bf16 %v6154_v50  ;;  %v2429_v42 = vsel %vm732_vm2, %v5847_v43, %v4699_v7 }
 0x1cd   : > { %v6284_v39 = vpop.permute.xlu0 %4776  ;;  %v5090_v63 = vpack.i.bf16 %v6303_v22, %v6292_v54  ;;  %v2428_v9 = vsel %vm732_vm2, %v5789_v2, %v4698_v11  ;;  %v4719_v41 = vunpack.i.h.bf16 %v6185_v29  ;;  %v4718_v18 = vunpack.i.l.bf16 %v6185_v29 }
 0x1ce   : > { %5036 = vrot.lane.b32.xlu1 %v5035_v27, %s7218_s23  ;;  %v6317_v27 = vmax.f32 %v1304_v13, %v1338_v31  ;;  %v2446_v50 = vsel %vm2441_vm3, %v2428_v9, %v4703_v61  ;;  %v2447_v31 = vsel %vm2441_vm3, %v2429_v42, %v4704_v35  ;;  %v4729_v40 = vunpack.i.h.bf16 %v6235_v16 }
 0x1cf   : > { %5071 = vrot.lane.b32.xlu0 %v5070_v48, %s7215_s14  ;;  %v5085_v48 = vpack.i.bf16 %v6301_v6, %v6289_v56  ;;  %v4724_v56 = vunpack.i.h.bf16 %v6215_v52  ;;  %v2464_v43 = vsel %vm2459_vm4, %v2446_v50, %v4708_v26  ;;  %v2465_v2 = vsel %vm2459_vm4, %v2447_v31, %v4709_v5 }
 0x1d0   : > { %v6297_v58 = vpop.permute.xlu1 %4746  ;;  %v4728_v29 = vunpack.i.l.bf16 %v6235_v16  ;;  %v2482_v60 = vsel %vm2477_vm5, %v2464_v43, %v4713_v49  ;;  %v2483_v7 = vsel %vm2477_vm5, %v2465_v2, %v4714_v62  ;;  %v4734_v11 = vunpack.i.h.bf16 %v6249_v1 }
 0x1d1   : > { %v6307_v24 = vpop.permute.xlu0 %4781  ;;  %v2500_v35 = vsel %vm2495_vm6, %v2482_v60, %v4718_v18  ;;  %v4739_v61 = vunpack.i.h.bf16 %v6265_v25  ;;  %v4738_v5 = vunpack.i.l.bf16 %v6265_v25  ;;  %v4744_v62 = vunpack.i.h.bf16 %v6279_v20 }
 0x1d2   : > { %5041 = vrot.lane.b32.xlu1 %v5040_v8, %s7209_s26  ;;  %v4723_v8 = vunpack.i.l.bf16 %v6215_v52  ;;  %v4733_v52 = vunpack.i.l.bf16 %v6249_v1  ;;  %v4743_v49 = vunpack.i.l.bf16 %v6279_v20  ;;  %v4749_v9 = vunpack.i.h.bf16 %v6297_v58 }
 0x1d3   : > { %5076 = vrot.lane.b32.xlu0 %v5075_v3, %s7212_s24  ;;  %v4748_v25 = vunpack.i.l.bf16 %v6297_v58 }
 0x1d4   : > { %v6327_v37 = vpop.permute.xlu1 %4751  ;;  %v2517_v26 = vsel %vm479_vm1, %v2500_v35, %v4723_v8 }
 0x1d5   : > { %v6339_v13 = vpop.permute.xlu0 %4786  ;;  %v2535_v1 = vsel %vm2530_vm7, %v2517_v26, %v4728_v29  ;;  %v4754_v50 = vunpack.i.h.bf16 %v6327_v37  ;;  %v4753_v20 = vunpack.i.l.bf16 %v6327_v37  ;;  %v1425_v29 = vld [vmem:[#allocation2 + $0xff] ss:$2 sm:$0xff] }
 0x1d6   : > { %5046 = vrot.lane.b32.xlu1 %v5045_v17, %s7210_s28  ;;  %v2501_v17 = vsel %vm2495_vm6, %v2483_v7, %v4719_v41  ;;  %v2553_v18 = vsel %vm2548_vm8, %v2535_v1, %v4733_v52 }
 0x1d7   : > { %5081 = vrot.lane.b32.xlu0 %v5080_v53, %s7213_s25  ;;  %v2518_v53 = vsel %vm479_vm1, %v2501_v17, %v4724_v56  ;;  %v1423_v56 = vld [vmem:[#allocation2 + $0xef] ss:$2 sm:$0xff]  ;;  %v2571_v43 = vsel %vm2566_vm9, %v2553_v18, %v4738_v5 }
 0x1d8   : > { %v4757_v3 = vpop.permute.xlu1 %4756  ;;  %v2536_v42 = vsel %vm2530_vm7, %v2518_v53, %v4729_v40  ;;  %v2589_v60 = vsel %vm2584_vm10, %v2571_v43, %v4743_v49  ;;  %v5095_v53 = vpack.i.bf16 %v6323_v51, %v6317_v27  ;;  %v917_v43 = vld [vmem:[#allocation2 + $0x103] ss:$2 sm:$0xf] }
 0x1d9   : > { %v6359_v16 = vpop.permute.xlu0 %4791  ;;  %v2554_v41 = vsel %vm2548_vm8, %v2536_v42, %v4734_v11  ;;  %v4759_v2 = vunpack.i.h.bf16 %v4757_v3  ;;  %v4758_v40 = vunpack.i.l.bf16 %v4757_v3  ;;  %v2607_v37 = vsel %vm2602_vm11, %v2589_v60, %v4748_v25  ;;  %v1445_v25 = vld [vmem:[#allocation2 + $0x100] ss:$2 sm:$0xff] }
 0x1da   : > { %5051 = vrot.lane.b32.xlu1 %v5050_v38, %s7211_s17  ;;  %v1389_v38 = vld [vmem:[#allocation2 + $0xee] ss:$2 sm:$0xff]  ;;  %v2572_v8 = vsel %vm2566_vm9, %v2554_v41, %v4739_v61  ;;  %v5060_v3 = vpack.i.bf16 %v6317_v27, %v6167_v33  ;;  %v2625_v61 = vsel %vm2620_vm12, %v2607_v37, %v4753_v20  ;;  %v1448_v27 = vld [vmem:[#allocation2 + $0x101] ss:$2 sm:$0xff] }
 0x1db   : > { %5086 = vrot.lane.b32.xlu0 %v5085_v48, %s7214_s29  ;;  %v1391_v48 = vld [vmem:[#allocation2 + $0xfe] ss:$2 sm:$0xff]  ;;  %v2590_v7 = vsel %vm2584_vm10, %v2572_v8, %v4744_v62  ;;  %v1442_v35 = vmax.f32 %v1389_v38, %v1423_v56  ;;  %v1002_v37 = vld [vmem:[#allocation2 + $0x105] ss:$2 sm:$0xf] }
 0x1dc   : > { %v4762_v31 = vpop.permute.xlu1 %4761  ;;  %v2608_v17 = vsel %vm2602_vm11, %v2590_v7, %v4749_v9  ;;  %v6394_v47 = vmax.f32 %v1391_v48, %v1425_v29  ;;  %v796_v33 = vld [vmem:[#allocation2 + $0xf0] ss:$2 sm:$0xff]  ;;  %v830_v9 = vld [vmem:[#allocation2 + $0xf1] ss:$2 sm:$0xff] }
 0x1dd   : > { %v6377_v58 = vpop.permute.xlu0 %4796  ;;  %v4764_v11 = vunpack.i.h.bf16 %v4762_v31  ;;  %v4763_v52 = vunpack.i.l.bf16 %v4762_v31  ;;  %v2626_v5 = vsel %vm2620_vm12, %v2608_v17, %v4754_v50  ;;  %v5065_v31 = vpack.i.bf16 %v1442_v35, %v6189_v59  ;;  %v883_v8 = vld [vmem:[#allocation2 + $0x102] ss:$2 sm:$0xf]  ;;  %v1456_v29 = vld [vmem:[#allocation2 + $0x103] ss:$2 sm:$0xff] }
 0x1de   : > { %5056 = vrot.lane.b32.xlu1 %v5055_v36, %s7223_s0  ;;  %v2644_v54 = vsel %vm2638_vm13, %v2626_v5, %v4759_v2  ;;  %v2643_v36 = vsel %vm2638_vm13, %v2625_v61, %v4758_v40  ;;  %v5100_v56 = vpack.i.bf16 %v6394_v47, %v1442_v35  ;;  %v6412_v2 = vmax.f32 %v796_v33, %v830_v9  ;;  %v1453_v48 = vld [vmem:[#allocation2 + $0x102] ss:$2 sm:$0xff]  ;;  %v1464_v35 = vld [vmem:[#allocation2 + $0x105] ss:$2 sm:$0xff] }
 0x1df   : > { %5091 = vrot.lane.b32.xlu0 %v5090_v63, %s7224_s1  ;;  %v2661_v1 = vsel %vm2656_vm14, %v2643_v36, %v4763_v52  ;;  %v2662_v42 = vsel %vm2656_vm14, %v2644_v54, %v4764_v11  ;;  %v1451_v40 = vmax.f32 %v1445_v25, %v1448_v27  ;;  %v934_v60 = vmax.f32 %v883_v8, %v917_v43  ;;  %v968_v52 = vld [vmem:[#allocation2 + $0x104] ss:$2 sm:$0xf]  ;;  %v6433_v25 = vld [vmem:[#allocation2 + $0x10b] ss:$2 sm:$0xff] }
 0x1e0   : > { %v4767_v26 = vpop.permute.xlu1 %4766  ;;  %v1459_v17 = vmax.f32 %v1453_v48, %v1456_v29  ;;  %v1019_v5 = vmax.f32 %v968_v52, %v1002_v37  ;;  %v6431_v9 = vld [vmem:[#allocation2 + $0x10a] ss:$2 sm:$0xff]  ;;  %v1482_v29 = vld [vmem:[#allocation2 + $0x119] ss:$2 sm:$0xf] }
 0x1e1   : > { %v4769_v62 = vunpack.i.h.bf16 %v4767_v26  ;;  %v4768_v63 = vunpack.i.l.bf16 %v4767_v26  ;;  %v6398_v49 = vpop.permute.xlu0 %4801  ;;  %v5105_v11 = vpack.i.bf16 %v1451_v40, %v6412_v2  ;;  %v1477_v26 = vld [vmem:[#allocation2 + $0x108] ss:$2 sm:$0xff]  ;;  %v1479_v48 = vld [vmem:[#allocation2 + $0x118] ss:$2 sm:$0xf] }
 0x1e2   : > { %5061 = vrot.lane.b32.xlu1 %v5060_v3, %s7221_s21  ;;  %v1461_v3 = vld [vmem:[#allocation2 + $0x104] ss:$2 sm:$0xff]  ;;  %v5110_v36 = vpack.i.bf16 %v1459_v17, %v6275_v21  ;;  %v1463_v27 = vld [vmem:[#allocation2 + $0x114] ss:$2 sm:$0xf] }
 0x1e3   : > { %5096 = vrot.lane.b32.xlu0 %v5095_v53, %s7225_s2  ;;  %v2679_v41 = vsel %vm2674_vm15, %v2661_v1, %v4768_v63  ;;  %v2680_v18 = vsel %vm2674_vm15, %v2662_v42, %v4769_v62  ;;  %v1480_v53 = vld [vmem:[#allocation2 + $0x109] ss:$2 sm:$0xff]  ;;  %v1053_v62 = vld [vmem:[#allocation2 + $0x106] ss:$2 sm:$0xf]  ;;  %v1467_v33 = vmax.f32 %v1461_v3, %v1464_v35  ;;  %v4779_v3 = vunpack.i.h.bf16 %v6284_v39 }
 0x1e4   : > { %v6406_v50 = vpop.permute.xlu1 %4846  ;;  %v2694_v20 = vpack.c.bf16 %v2680_v18, %v2679_v41  ;;  %v1087_v63 = vld [vmem:[#allocation2 + $0x107] ss:$2 sm:$0xf]  ;;  %v1469_v1 = vld [vmem:[#allocation2 + $0x106] ss:$2 sm:$0xff]  ;;  %v4778_v35 = vunpack.i.l.bf16 %v6284_v39 }
 0x1e5   : > { %v6409_v38 = vpop.permute.xlu0 %4806  ;;  %v1472_v42 = vld [vmem:[#allocation2 + $0x107] ss:$2 sm:$0xff]  ;;  %v1474_v21 = vld [vmem:[#allocation2 + $0x117] ss:$2 sm:$0xf]  ;;  %v5115_v43 = vpack.i.bf16 %v1467_v33, %v6287_v55  ;;  %v4788_v33 = vunpack.i.l.bf16 %v6339_v13 }
 0x1e6   : > { %4452 = vmatmul.mubr.bf16.gmra.mxu1 %v2694_v20  ;;  %5066 = vrot.lane.b32.xlu1 %v5065_v31, %s7222_s16  ;;  %v1466_v41 = vld [vmem:[#allocation2 + $0x115] ss:$2 sm:$0xf]  ;;  %v1104_v20 = vmax.f32 %v1053_v62, %v1087_v63  ;;  %v1471_v31 = vld [vmem:[#allocation2 + $0x116] ss:$2 sm:$0xf]  ;;  %v1475_v40 = vmax.f32 %v1469_v1, %v1472_v42  ;;  %v4789_v63 = vunpack.i.h.bf16 %v6339_v13 }
 0x1e7   : > { %5101 = vrot.lane.b32.xlu0 %v5100_v56, %s7220_s22  ;;  %4455 = vmatprep.mubr.msk.bf16.mxu1 %vm5429_vm0, %v7226_v4  ;;  %v1483_v56 = vmax.f32 %v1477_v26, %v1480_v53  ;;  %v1468_v52 = vmax.f32 %v1463_v27, %v1466_v41  ;;  %v6444_v37 = vld [vmem:[#allocation2 + $0x11c] ss:$2 sm:$0xf]  ;;  %v1498_v17 = vld [vmem:[#allocation2 + $0x11d] ss:$2 sm:$0xf]  ;;  %v1476_v55 = vmax.f32 %v1471_v31, %v1474_v21  ;;  %v4784_v26 = vunpack.i.h.bf16 %v6307_v24 }
 0x1e8   : > { %v6418_v59 = vpop.permute.xlu1 %4851  ;;  %v5120_v1 = vpack.i.bf16 %v1475_v40, %v6295_v34  ;;  %v1500_v42 = vmax.f32 %v6444_v37, %v1498_v17  ;;  %v4794_v41 = vunpack.i.h.bf16 %v6359_v16  ;;  %v4799_v34 = vunpack.i.h.bf16 %v6377_v58 }
 0x1e9   : > { %v6420_v7 = vpop.permute.xlu0 %4811  ;;  %v5125_v62 = vpack.i.bf16 %v1483_v56, %v6301_v6  ;;  %v4798_v31 = vunpack.i.l.bf16 %v6377_v58  ;;  %v4804_v21 = vunpack.i.h.bf16 %v6398_v49  ;;  %v4808_v58 = vunpack.i.l.bf16 %v6409_v38 }
 0x1ea   : > { %1558 = vrot.lane.b32.xlu1 %v934_v60, %s7215_s14  ;;  %v4774_v60 = vunpack.i.h.bf16 %v6271_v10  ;;  %v4813_v37 = vunpack.i.l.bf16 %v6420_v7 }
 0x1eb   : > { %5106 = vrot.lane.b32.xlu0 %v5105_v11, %s7216_s27  ;;  %v4773_v11 = vunpack.i.l.bf16 %v6271_v10  ;;  %v4783_v10 = vunpack.i.l.bf16 %v6307_v24 }
 0x1ec   : > { %v6425_v61 = vpop.permute.xlu1 %4856  ;;  %v2431_v27 = vsel %vm732_vm2, %v5923_v45, %v4774_v60 }
 0x1ed   : > { %v6427_v54 = vpop.permute.xlu0 %4816  ;;  %v2430_v24 = vsel %vm732_vm2, %v5849_v44, %v4773_v11  ;;  %v2449_v13 = vsel %vm2441_vm3, %v2431_v27, %v4779_v3 }
 0x1ee   : > { %1626 = vrot.lane.b32.xlu1 %v1019_v5, %s7212_s24  ;;  %v1491_v5 = vmax.f32 %v6431_v9, %v6433_v25  ;;  %v2448_v6 = vsel %vm2441_vm3, %v2430_v24, %v4778_v35  ;;  %v2467_v44 = vsel %vm2459_vm4, %v2449_v13, %v4784_v26  ;;  %v4819_v3 = vunpack.i.h.bf16 %v6427_v54  ;;  %v1496_v13 = vld [vmem:[#allocation2 + $0x10d] ss:$2 sm:$0xff] }
 0x1ef   : > { %5111 = vrot.lane.b32.xlu0 %v5110_v36, %s7218_s23  ;;  %v1484_v36 = vmax.f32 %v1479_v48, %v1482_v29  ;;  %v2466_v45 = vsel %vm2459_vm4, %v2448_v6, %v4783_v10  ;;  %v2485_v40 = vsel %vm2477_vm5, %v2467_v44, %v4789_v63  ;;  %v4809_v48 = vunpack.i.h.bf16 %v6409_v38  ;;  %v1493_v6 = vld [vmem:[#allocation2 + $0x10c] ss:$2 sm:$0xff] }
 0x1f0   : > { %v6436_v18 = vpop.permute.xlu1 %4861  ;;  %v2503_v60 = vsel %vm2495_vm6, %v2485_v40, %v4794_v41  ;;  %v4818_v35 = vunpack.i.l.bf16 %v6427_v54 }
 0x1f1   : > { %v6438_v8 = vpop.permute.xlu0 %4821  ;;  %v2520_v17 = vsel %vm479_vm1, %v2503_v60, %v4799_v34 }
 0x1f2   : > { %1694 = vrot.lane.b32.xlu1 %v1104_v20, %s7213_s25  ;;  %v4793_v20 = vunpack.i.l.bf16 %v6359_v16  ;;  %v4803_v16 = vunpack.i.l.bf16 %v6398_v49  ;;  %v4824_v26 = vunpack.i.h.bf16 %v6438_v8 }
 0x1f3   : > { %5116 = vrot.lane.b32.xlu0 %v5115_v43, %s7209_s26  ;;  %v2484_v43 = vsel %vm2477_vm5, %v2466_v45, %v4788_v33 }
 0x1f4   : > { %v6453_v53 = vpop.permute.xlu1 %4866  ;;  %v2502_v11 = vsel %vm2495_vm6, %v2484_v43, %v4793_v20 }
 0x1f5   : > { %v4827_v39 = vpop.permute.xlu0 %4826  ;;  %v2519_v49 = vsel %vm479_vm1, %v2502_v11, %v4798_v31  ;;  %v1501_v11 = vld [vmem:[#allocation2 + $0x10e] ss:$2 sm:$0xff] }
 0x1f6   : > { %2140 = vrot.lane.b32.xlu1 %v1468_v52, %s7209_s26  ;;  %v4814_v52 = vunpack.i.h.bf16 %v6420_v7  ;;  %v2537_v38 = vsel %vm2530_vm7, %v2519_v49, %v4803_v16  ;;  %v4823_v7 = vunpack.i.l.bf16 %v6438_v8  ;;  %v4829_v33 = vunpack.i.h.bf16 %v4827_v39 }
 0x1f7   : > { %2193 = vrot.lane.b32.xlu0 %v1476_v55, %s7210_s28  ;;  %v2538_v55 = vsel %vm2530_vm7, %v2520_v17, %v4804_v21  ;;  %v2555_v63 = vsel %vm2548_vm8, %v2537_v38, %v4808_v58  ;;  %v4828_v27 = vunpack.i.l.bf16 %v4827_v39 }
 0x1f8   : > { %v6476_v56 = vpop.permute.xlu1 %4871 }
 0x1f9   : > { %v4832_v29 = vpop.permute.xlu0 %4831 }
 0x1fa   : > { %2246 = vrot.lane.b32.xlu1 %v1484_v36, %s7211_s17  ;;  %v2556_v36 = vsel %vm2548_vm8, %v2538_v55, %v4809_v48  ;;  %v4834_v41 = vunpack.i.h.bf16 %v4832_v29  ;;  %v4833_v20 = vunpack.i.l.bf16 %v4832_v29  ;;  %v1499_v48 = vmax.f32 %v1493_v6, %v1496_v13  ;;  %v1487_v55 = vld [vmem:[#allocation2 + $0x11a] ss:$2 sm:$0xf] }
 0x1fb   : > { %5121 = vrot.lane.b32.xlu0 %v5120_v1, %s7210_s28  ;;  %v2574_v54 = vsel %vm2566_vm9, %v2556_v36, %v4814_v52  ;;  %v2573_v1 = vsel %vm2566_vm9, %v2555_v63, %v4813_v37  ;;  %v1504_v52 = vld [vmem:[#allocation2 + $0x10f] ss:$2 sm:$0xff]  ;;  %v4859_v6 = vunpack.i.h.bf16 %v6425_v61 }
 0x1fc   : > { %v6496_v10 = vpop.permute.xlu1 %4876  ;;  %v2591_v8 = vsel %vm2584_vm10, %v2573_v1, %v4818_v35  ;;  %v2592_v34 = vsel %vm2584_vm10, %v2574_v54, %v4819_v3  ;;  %v5135_v3 = vpack.i.bf16 %v1499_v48, %v6323_v51  ;;  %v1507_v35 = vmax.f32 %v1501_v11, %v1504_v52  ;;  %v1503_v51 = vld [vmem:[#allocation2 + $0x11e] ss:$2 sm:$0xf] }
 0x1fd   : > { %v4837_v24 = vpop.permute.xlu0 %4836  ;;  %v2609_v39 = vsel %vm2602_vm11, %v2591_v8, %v4823_v7  ;;  %v2610_v44 = vsel %vm2602_vm11, %v2592_v34, %v4824_v26  ;;  %v1490_v26 = vld [vmem:[#allocation2 + $0x11b] ss:$2 sm:$0xf]  ;;  %v4848_v54 = vunpack.i.l.bf16 %v6406_v50  ;;  %v4864_v8 = vunpack.i.h.bf16 %v6436_v18 }
 0x1fe   : > { %2352 = vrot.lane.b32.xlu1 %v1500_v42, %s7221_s21  ;;  %v4839_v31 = vunpack.i.h.bf16 %v4837_v24  ;;  %v4838_v45 = vunpack.i.l.bf16 %v4837_v24  ;;  %v2627_v16 = vsel %vm2620_vm12, %v2609_v39, %v4828_v27  ;;  %v2628_v43 = vsel %vm2620_vm12, %v2610_v44, %v4829_v33  ;;  %v1506_v27 = vld [vmem:[#allocation2 + $0x11f] ss:$2 sm:$0xf] }
 0x1ff   : > { %5126 = vrot.lane.b32.xlu0 %v5125_v62, %s7211_s17  ;;  %v5130_v42 = vpack.i.bf16 %v1491_v5, %v6303_v22  ;;  %v2646_v58 = vsel %vm2638_vm13, %v2628_v43, %v4834_v41  ;;  %v2645_v62 = vsel %vm2638_vm13, %v2627_v16, %v4833_v20  ;;  %v5140_v36 = vpack.i.bf16 %v1507_v35, %v6394_v47 }
 0x200   : > { %v6508_v21 = vpop.permute.xlu1 %4881  ;;  %v2663_v37 = vsel %vm2656_vm14, %v2645_v62, %v4838_v45  ;;  %v2664_v49 = vsel %vm2656_vm14, %v2646_v58, %v4839_v31  ;;  %v1492_v63 = vmax.f32 %v1487_v55, %v1490_v26  ;;  %v4849_v24 = vunpack.i.h.bf16 %v6406_v50 }
 0x201   : > { %v4842_v40 = vpop.permute.xlu0 %4841  ;;  %v4854_v41 = vunpack.i.h.bf16 %v6418_v59  ;;  %v4853_v20 = vunpack.i.l.bf16 %v6418_v59  ;;  %v4858_v47 = vunpack.i.l.bf16 %v6425_v61  ;;  %v1508_v13 = vmax.f32 %v1503_v51, %v1506_v27 }
 0x202   : > { %v4844_v29 = vunpack.i.h.bf16 %v4842_v40  ;;  %v4843_v60 = vunpack.i.l.bf16 %v4842_v40  ;;  %v4863_v34 = vunpack.i.l.bf16 %v6436_v18  ;;  %v2433_v50 = vsel %vm732_vm2, %v5986_v12, %v4849_v24 }
 0x203   : > { %5131 = vrot.lane.b32.xlu0 %v5130_v42, %s7223_s0  ;;  %v2432_v45 = vsel %vm732_vm2, %v5925_v46, %v4848_v54  ;;  %v4869_v59 = vunpack.i.h.bf16 %v6453_v53  ;;  %v4868_v39 = vunpack.i.l.bf16 %v6453_v53  ;;  %v2451_v16 = vsel %vm2441_vm3, %v2433_v50, %v4854_v41 }
 0x204   : > { %v6521_v17 = vpop.permute.xlu1 %4886  ;;  %v2681_v9 = vsel %vm2674_vm15, %v2663_v37, %v4843_v60  ;;  %v2682_v22 = vsel %vm2674_vm15, %v2664_v49, %v4844_v29  ;;  %v2450_v61 = vsel %vm2441_vm3, %v2432_v45, %v4853_v20  ;;  %v4874_v43 = vunpack.i.h.bf16 %v6476_v56 }
 0x205   : > { %v6525_v25 = vpop.permute.xlu0 %4921  ;;  %v2695_v5 = vpack.c.bf16 %v2682_v22, %v2681_v9  ;;  %v4873_v18 = vunpack.i.l.bf16 %v6476_v56  ;;  %v2468_v40 = vsel %vm2459_vm4, %v2450_v61, %v4858_v47  ;;  %v2469_v12 = vsel %vm2459_vm4, %v2451_v16, %v4859_v6 }
 0x206   : > { %v4879_v46 = vunpack.i.h.bf16 %v6496_v10  ;;  %v4878_v42 = vunpack.i.l.bf16 %v6496_v10  ;;  %v2486_v53 = vsel %vm2477_vm5, %v2468_v40, %v4863_v34  ;;  %v2487_v48 = vsel %vm2477_vm5, %v2469_v12, %v4864_v8 }
 0x207   : > { %4456 = vmatmul.mubr.bf16.gmra.mxu1 %v2695_v5  ;;  %5136 = vrot.lane.b32.xlu0 %v5135_v3, %s7221_s21  ;;  %v4884_v58 = vunpack.i.h.bf16 %v6508_v21  ;;  %v4883_v62 = vunpack.i.l.bf16 %v6508_v21  ;;  %v2505_v56 = vsel %vm2495_vm6, %v2487_v48, %v4869_v59  ;;  %v2504_v60 = vsel %vm2495_vm6, %v2486_v53, %v4868_v39 }
 0x208   : > { %v6529_v38 = vpop.permute.xlu1 %4891  ;;  %4459 = vmatprep.mubr.msk.bf16.mxu1 %vm5429_vm0, %v7226_v4  ;;  %v4889_v11 = vunpack.i.h.bf16 %v6521_v17  ;;  %v4888_v52 = vunpack.i.l.bf16 %v6521_v17  ;;  %v2521_v37 = vsel %vm479_vm1, %v2504_v60, %v4873_v18  ;;  %v2522_v49 = vsel %vm479_vm1, %v2505_v56, %v4874_v43 }
 0x209   : > { %v6533_v7 = vpop.permute.xlu0 %4926  ;;  %v4894_v9 = vunpack.i.h.bf16 %v6529_v38  ;;  %v4893_v22 = vunpack.i.l.bf16 %v6529_v38  ;;  %v2539_v21 = vsel %vm2530_vm7, %v2521_v37, %v4878_v42  ;;  %v2540_v5 = vsel %vm2530_vm7, %v2522_v49, %v4879_v46 }
 0x20a   : > { %v2558_v17 = vsel %vm2548_vm8, %v2540_v5, %v4884_v58  ;;  %v2557_v55 = vsel %vm2548_vm8, %v2539_v21, %v4883_v62  ;;  %v4924_v60 = vunpack.i.h.bf16 %v6525_v25  ;;  %v4928_v37 = vunpack.i.l.bf16 %v6533_v7 }
 0x20b   : > { %5141 = vrot.lane.b32.xlu0 %v5140_v36, %s7222_s16  ;;  %v2576_v51 = vsel %vm2566_vm9, %v2558_v17, %v4889_v11  ;;  %v2575_v27 = vsel %vm2566_vm9, %v2557_v55, %v4888_v52  ;;  %v4923_v11 = vunpack.i.l.bf16 %v6525_v25  ;;  %v4929_v52 = vunpack.i.h.bf16 %v6533_v7 }
 0x20c   : > { %v6537_v33 = vpop.permute.xlu1 %4896  ;;  %v2593_v41 = vsel %vm2584_vm10, %v2575_v27, %v4893_v22  ;;  %v2594_v20 = vsel %vm2584_vm10, %v2576_v51, %v4894_v9 }
 0x20d   : > { %v6541_v1 = vpop.permute.xlu0 %4931  ;;  %v4899_v3 = vunpack.i.h.bf16 %v6537_v33  ;;  %v4898_v35 = vunpack.i.l.bf16 %v6537_v33  ;;  %v2434_v25 = vsel %vm732_vm2, %v5988_v14, %v4923_v11 }
 0x20e   : > { %v4934_v49 = vunpack.i.h.bf16 %v6541_v1  ;;  %v4933_v9 = vunpack.i.l.bf16 %v6541_v1  ;;  %v2452_v55 = vsel %vm2441_vm3, %v2434_v25, %v4928_v37 }
 0x20f   : > { %2299 = vrot.lane.b32.xlu0 %v1492_v63, %s7223_s0  ;;  %v2611_v47 = vsel %vm2602_vm11, %v2593_v41, %v4898_v35  ;;  %v2435_v35 = vsel %vm732_vm2, %v6121_v23, %v4924_v60 }
 0x210   : > { %v4902_v31 = vpop.permute.xlu1 %4901  ;;  %v2453_v1 = vsel %vm2441_vm3, %v2435_v35, %v4929_v52 }
 0x211   : > { %v6556_v44 = vpop.permute.xlu0 %4936  ;;  %v4904_v26 = vunpack.i.h.bf16 %v4902_v31  ;;  %v4903_v36 = vunpack.i.l.bf16 %v4902_v31 }
 0x212   : > { %v4939_v21 = vunpack.i.h.bf16 %v6556_v44  ;;  %v4938_v5 = vunpack.i.l.bf16 %v6556_v44  ;;  %v2470_v44 = vsel %vm2459_vm4, %v2452_v55, %v4933_v9 }
 0x213   : > { %2405 = vrot.lane.b32.xlu0 %v1508_v13, %s7222_s16  ;;  %v2612_v13 = vsel %vm2602_vm11, %v2594_v20, %v4899_v3  ;;  %v2629_v8 = vsel %vm2620_vm12, %v2611_v47, %v4903_v36  ;;  %s323_s16 = sand.u32 1, %s5418_s10  }
 0x214   : > { %v4907_v29 = vpop.permute.xlu1 %4906  ;;  %v2630_v34 = vsel %vm2620_vm12, %v2612_v13, %v4904_v26  ;;  %v2488_v14 = vsel %vm2477_vm5, %v2470_v44, %v4938_v5 }
 0x215   : > { %v6575_v10 = vpop.permute.xlu0 %4941  ;;  %v4909_v38 = vunpack.i.h.bf16 %v4907_v29  ;;  %v4908_v24 = vunpack.i.l.bf16 %v4907_v29 }
 0x216   : > { %v4944_v17 = vunpack.i.h.bf16 %v6575_v10  ;;  %v4943_v7 = vunpack.i.l.bf16 %v6575_v10 }
 0x217   : > { %v2648_v50 = vsel %vm2638_vm13, %v2630_v34, %v4909_v38  ;;  %v2647_v45 = vsel %vm2638_vm13, %v2629_v8, %v4908_v24 }
 0x218   : > { %v4912_v63 = vpop.permute.xlu1 %4911 }
 0x219   : > { %v6589_v54 = vpop.permute.xlu0 %4946  ;;  %v4914_v33 = vunpack.i.h.bf16 %v4912_v63  ;;  %v4913_v6 = vunpack.i.l.bf16 %v4912_v63  ;;  %v2471_v63 = vsel %vm2459_vm4, %v2453_v1, %v4934_v49 }
 0x21a   : > { %v4949_v26 = vunpack.i.h.bf16 %v6589_v54  ;;  %v4948_v36 = vunpack.i.l.bf16 %v6589_v54  ;;  %v2489_v10 = vsel %vm2477_vm5, %v2471_v63, %v4939_v21 }
 0x21b   : > { %v2665_v16 = vsel %vm2656_vm14, %v2647_v45, %v4913_v6  ;;  %v2666_v43 = vsel %vm2656_vm14, %v2648_v50, %v4914_v33  ;;  %v2507_v20 = vsel %vm2495_vm6, %v2489_v10, %v4944_v17  ;;  %v2506_v33 = vsel %vm2495_vm6, %v2488_v14, %v4943_v7 }
 0x21c   : > { %v4917_v31 = vpop.permute.xlu1 %4916  ;;  %v2523_v47 = vsel %vm479_vm1, %v2506_v33, %v4948_v36  ;;  %v2524_v13 = vsel %vm479_vm1, %v2507_v20, %v4949_v26 }
 0x21d   : > { %v4919_v59 = vunpack.i.h.bf16 %v4917_v31  ;;  %v4918_v39 = vunpack.i.l.bf16 %v4917_v31  ;;  %v4952_v61 = vpop.permute.xlu0 %4951 }
 0x21e   : > { %v4954_v23 = vunpack.i.h.bf16 %v4952_v61  ;;  %v4953_v51 = vunpack.i.l.bf16 %v4952_v61 }
 0x21f   : > { %v2683_v18 = vsel %vm2674_vm15, %v2665_v16, %v4918_v39  ;;  %v2684_v40 = vsel %vm2674_vm15, %v2666_v43, %v4919_v59 }
 0x220   : > { %v6603_v12 = vpop.permute.xlu1 %4996  ;;  %v2696_v46 = vpack.c.bf16 %v2684_v40, %v2683_v18  ;;  %v2541_v31 = vsel %vm2530_vm7, %v2523_v47, %v4953_v51  ;;  %v2542_v50 = vsel %vm2530_vm7, %v2524_v13, %v4954_v23 }
 0x221   : > { %v4957_v42 = vpop.permute.xlu0 %4956  ;;  %v4998_v10 = vunpack.i.l.bf16 %v6603_v12 }
 0x222   : > { %4460 = vmatmul.mubr.bf16.gmra.mxu1 %v2696_v46  ;;  %v4959_v38 = vunpack.i.h.bf16 %v4957_v42  ;;  %v4958_v24 = vunpack.i.l.bf16 %v4957_v42 }
 0x223   : > { %4463 = vmatprep.mubr.msk.bf16.mxu1 %vm5429_vm0, %v7226_v4  ;;  %v2436_v47 = vsel %vm732_vm2, %v6123_v15, %v4998_v10 }
 0x224   : > { %v6607_v53 = vpop.permute.xlu1 %5001  ;;  %v2560_v61 = vsel %vm2548_vm8, %v2542_v50, %v4959_v38  ;;  %v2559_v16 = vsel %vm2548_vm8, %v2541_v31, %v4958_v24  ;;  %v4999_v38 = vunpack.i.h.bf16 %v6603_v12  ;;  %v3294_v50 = vld [vmem:[#allocation3 + $0x86] ss:$2 sm:$0xff] }
 0x225   : > { %v4962_v48 = vpop.permute.xlu0 %4961  ;;  %v5003_v24 = vunpack.i.l.bf16 %v6607_v53  ;;  %v5004_v20 = vunpack.i.h.bf16 %v6607_v53 }
 0x226   : > { %v4964_v54 = vunpack.i.h.bf16 %v4962_v48  ;;  %v4963_v6 = vunpack.i.l.bf16 %v4962_v48  ;;  %v2437_v12 = vsel %vm732_vm2, %v6181_v19, %v4999_v38 }
 0x228   : > { %v6609_v58 = vpop.permute.xlu1 %5006  ;;  %v2578_v46 = vsel %vm2566_vm9, %v2560_v61, %v4964_v54  ;;  %v2577_v42 = vsel %vm2566_vm9, %v2559_v16, %v4963_v6 }
 0x229   : > { %v4967_v62 = vpop.permute.xlu0 %4966  ;;  %v5008_v33 = vunpack.i.l.bf16 %v6609_v58  ;;  %v5009_v6 = vunpack.i.h.bf16 %v6609_v58 }
 0x22a   : > { %v4969_v8 = vunpack.i.h.bf16 %v4967_v62  ;;  %v4968_v34 = vunpack.i.l.bf16 %v4967_v62 }
 0x22c   : > { %v6611_v29 = vpop.permute.xlu1 %5011  ;;  %v2595_v60 = vsel %vm2584_vm10, %v2577_v42, %v4968_v34  ;;  %v2596_v11 = vsel %vm2584_vm10, %v2578_v46, %v4969_v8  ;;  %v2454_v34 = vsel %vm2441_vm3, %v2436_v47, %v5003_v24 }
 0x22d   : > { %v4972_v56 = vpop.permute.xlu0 %4971  ;;  %v5014_v13 = vunpack.i.h.bf16 %v6611_v29  ;;  %v5013_v8 = vunpack.i.l.bf16 %v6611_v29  ;;  %v2472_v58 = vsel %vm2459_vm4, %v2454_v34, %v5008_v33  ;;  %v3297_v29 = vld [vmem:[#allocation3 + $0x87] ss:$2 sm:$0xff] }
 0x22e   : > { %v4974_v45 = vunpack.i.h.bf16 %v4972_v56  ;;  %v4973_v59 = vunpack.i.l.bf16 %v4972_v56 }
 0x22f   : > { %v2490_v42 = vsel %vm2477_vm5, %v2472_v58, %v5013_v8 }
 0x230   : > { %v6619_v22 = vpop.permute.xlu1 %5016  ;;  %v2613_v37 = vsel %vm2602_vm11, %v2595_v60, %v4973_v59  ;;  %v2614_v49 = vsel %vm2602_vm11, %v2596_v11, %v4974_v45  ;;  %v3296_v45 = vld [vmem:[#allocation3 + $0x96] ss:$2 sm:$0x3]  ;;  %v2455_v59 = vsel %vm2441_vm3, %v2437_v12, %v5004_v20 }
 0x231   : > { %v4977_v3 = vpop.permute.xlu0 %4976  ;;  %v5018_v53 = vunpack.i.l.bf16 %v6619_v22  ;;  %v5019_v15 = vunpack.i.h.bf16 %v6619_v22  ;;  %v2473_v19 = vsel %vm2459_vm4, %v2455_v59, %v5009_v6 }
 0x232   : > { %v4979_v43 = vunpack.i.h.bf16 %v4977_v3  ;;  %v4978_v18 = vunpack.i.l.bf16 %v4977_v3 }
 0x233   : > { %v2508_v60 = vsel %vm2495_vm6, %v2490_v42, %v5018_v53 }
 0x234   : > { %v6635_v27 = vpop.permute.xlu1 %5021  ;;  %v2631_v21 = vsel %vm2620_vm12, %v2613_v37, %v4978_v18  ;;  %v2632_v5 = vsel %vm2620_vm12, %v2614_v49, %v4979_v43  ;;  %v3299_v43 = vld [vmem:[#allocation3 + $0x97] ss:$2 sm:$0x3]  ;;  %v3310_v49 = vld [vmem:[#allocation3 + $0x8a] ss:$2 sm:$0xff] }
 0x235   : > { %v4982_v41 = vpop.permute.xlu0 %4981  ;;  %v5023_v61 = vunpack.i.l.bf16 %v6635_v27  ;;  %v5024_v18 = vunpack.i.h.bf16 %v6635_v27  ;;  %v3301_v46 = vmax.f32 %v3296_v45, %v3299_v43  ;;  %v3313_v27 = vld [vmem:[#allocation3 + $0x8b] ss:$2 sm:$0xff] }
 0x236   : > { %v4984_v48 = vunpack.i.h.bf16 %v4982_v41  ;;  %v4983_v62 = vunpack.i.l.bf16 %v4982_v41 }
 0x238   : > { %v6645_v39 = vpop.permute.xlu1 %5026  ;;  %v2650_v35 = vsel %vm2638_vm13, %v2632_v5, %v4984_v48  ;;  %v2649_v25 = vsel %vm2638_vm13, %v2631_v21, %v4983_v62  ;;  %v2491_v48 = vsel %vm2477_vm5, %v2473_v19, %v5014_v13  ;;  %v2525_v5 = vsel %vm479_vm1, %v2508_v60, %v5023_v61 }
 0x239   : > { %v4987_v40 = vpop.permute.xlu0 %4986  ;;  %v5029_v62 = vunpack.i.h.bf16 %v6645_v39  ;;  %v5028_v22 = vunpack.i.l.bf16 %v6645_v39  ;;  %v2509_v21 = vsel %vm2495_vm6, %v2491_v48, %v5019_v15 }
 0x23a   : > { %v4989_v56 = vunpack.i.h.bf16 %v4987_v40  ;;  %v4988_v52 = vunpack.i.l.bf16 %v4987_v40  ;;  %v3300_v40 = vmax.f32 %v3294_v50, %v3297_v29  ;;  %v2526_v39 = vsel %vm479_vm1, %v2509_v21, %v5024_v18 }
 0x23c   : > { %v6655_v9 = vpop.permute.xlu1 %5031  ;;  %v2667_v55 = vsel %vm2656_vm14, %v2649_v25, %v4988_v52  ;;  %v2668_v1 = vsel %vm2656_vm14, %v2650_v35, %v4989_v56  ;;  %v5150_v37 = vpack.i.bf16 %v3301_v46, %v3300_v40 }
 0x23d   : > { %v4992_v3 = vpop.permute.xlu0 %4991  ;;  %v5034_v11 = vunpack.i.h.bf16 %v6655_v9  ;;  %v5033_v56 = vunpack.i.l.bf16 %v6655_v9 }
 0x23e   : > { %v4994_v17 = vunpack.i.h.bf16 %v4992_v3  ;;  %v4993_v7 = vunpack.i.l.bf16 %v4992_v3  ;;  %5151 = vrot.lane.b32.xlu1 %v5150_v37, %s7225_s2 }
 0x240   : > { %v6663_v26 = vpop.permute.xlu1 %5036  ;;  %v2685_v36 = vsel %vm2674_vm15, %v2667_v55, %v4993_v7  ;;  %v2686_v44 = vsel %vm2674_vm15, %v2668_v1, %v4994_v17  ;;  %v3316_v7 = vmax.f32 %v3310_v49, %v3313_v27  ;;  %v2543_v55 = vsel %vm2530_vm7, %v2525_v5, %v5028_v22  ;;  %v832_v22 = vld [vmem:[#allocation2 + $0x101] ss:$2 sm:$0xf] }
 0x241   : > { %v6667_v63 = vpop.permute.xlu0 %5071  ;;  %v2697_v23 = vpack.c.bf16 %v2686_v44, %v2685_v36  ;;  %v5039_v3 = vunpack.i.h.bf16 %v6663_v26  ;;  %v5038_v35 = vunpack.i.l.bf16 %v6663_v26  ;;  %v2544_v1 = vsel %vm2530_vm7, %v2526_v39, %v5029_v62  ;;  %v798_v62 = vld [vmem:[#allocation2 + $0x100] ss:$2 sm:$0xf] }
 0x242   : > { %v2562_v26 = vsel %vm2548_vm8, %v2544_v1, %v5034_v11  ;;  %3620 = vrot.lane.b32.xlu1 %v3316_v7, %s7209_s26  ;;  %v849_v11 = vmax.f32 %v798_v62, %v832_v22  ;;  %v3291_v1 = vld [vmem:[#allocation3 + $0x95] ss:$2 sm:$0x3] }
 0x243   : > { %4464 = vmatmul.mubr.bf16.gmra.mxu1 %v2697_v23  ;;  %v2561_v23 = vsel %vm2548_vm8, %v2543_v55, %v5033_v56  ;;  %v3289_v55 = vld [vmem:[#allocation3 + $0x85] ss:$2 sm:$0xff] }
 0x244   : > { %v6669_v51 = vpop.permute.xlu1 %5041  ;;  %4467 = vmatprep.mubr.msk.bf16.mxu1 %vm5429_vm0, %v7226_v4  ;;  %v2579_v20 = vsel %vm2566_vm9, %v2561_v23, %v5038_v35  ;;  %v5073_v35 = vunpack.i.l.bf16 %v6667_v63  ;;  %v5074_v23 = vunpack.i.h.bf16 %v6667_v63 }
 0x245   : > { %v6673_v14 = vpop.permute.xlu0 %5076  ;;  %v5044_v17 = vunpack.i.h.bf16 %v6669_v51  ;;  %v5043_v9 = vunpack.i.l.bf16 %v6669_v51  ;;  %v2580_v51 = vsel %vm2566_vm9, %v2562_v26, %v5039_v3  ;;  %v6759_v3 = vld [vmem:[%s7163_s4] ss:$0 sm:$0xff] }
 0x247   : > { %v2597_v13 = vsel %vm2584_vm10, %v2579_v20, %v5043_v9  ;;  %v2598_v8 = vsel %vm2584_vm10, %v2580_v51, %v5044_v17  ;;  %v3286_v17 = vld [vmem:[#allocation3 + $0x84] ss:$2 sm:$0xff]  ;;  %v3288_v9 = vld [vmem:[#allocation3 + $0x94] ss:$2 sm:$0x3] }
 0x248   : > { %v6678_v41 = vpop.permute.xlu1 %5046  ;;  %v3293_v26 = vmax.f32 %v3288_v9, %v3291_v1  ;;  %v7228_v1 = vld [vmem:[#allocation10_spill] sm:$0xff] }
 0x249   : > { %v6682_v54 = vpop.permute.xlu0 %5081  ;;  %v5049_v36 = vunpack.i.h.bf16 %v6678_v41  ;;  %v5048_v44 = vunpack.i.l.bf16 %v6678_v41 }
 0x24b   : > { %v2615_v34 = vsel %vm2602_vm11, %v2597_v13, %v5048_v44  ;;  %v2616_v53 = vsel %vm2602_vm11, %v2598_v8, %v5049_v36  ;;  %v3304_v13 = vld [vmem:[#allocation3 + $0x98] ss:$2 sm:$0x3]  ;;  %v5084_v8 = vunpack.i.h.bf16 %v6682_v54 }
 0x24c   : > { %v5052_v31 = vpop.permute.xlu1 %5051 }
 0x24d   : > { %v6697_v16 = vpop.permute.xlu0 %5086  ;;  %v5054_v10 = vunpack.i.h.bf16 %v5052_v31  ;;  %v5053_v38 = vunpack.i.l.bf16 %v5052_v31 }
 0x24f   : > { %v2633_v31 = vsel %vm2620_vm12, %v2615_v34, %v5053_v38  ;;  %v2634_v50 = vsel %vm2620_vm12, %v2616_v53, %v5054_v10  ;;  %v5078_v10 = vunpack.i.l.bf16 %v6673_v14  ;;  %v3305_v34 = vld [vmem:[#allocation3 + $0x89] ss:$2 sm:$0xff]  ;;  %v3307_v53 = vld [vmem:[#allocation3 + $0x99] ss:$2 sm:$0x3] }
 0x250   : > { %v5057_v52 = vpop.permute.xlu1 %5056 }
 0x251   : > { %v6712_v25 = vpop.permute.xlu0 %5091  ;;  %v5059_v33 = vunpack.i.h.bf16 %v5057_v52  ;;  %v5058_v6 = vunpack.i.l.bf16 %v5057_v52 }
 0x253   : > { %v2652_v59 = vsel %vm2638_vm13, %v2634_v50, %v5059_v33  ;;  %v2651_v58 = vsel %vm2638_vm13, %v2633_v31, %v5058_v6  ;;  %v3302_v6 = vld [vmem:[#allocation3 + $0x88] ss:$2 sm:$0xff] }
 0x254   : > { %v5062_v24 = vpop.permute.xlu1 %5061  ;;  %v3308_v50 = vmax.f32 %v3302_v6, %v3305_v34 }
 0x255   : > { %v6726_v47 = vpop.permute.xlu0 %5096  ;;  %v5064_v41 = vunpack.i.h.bf16 %v5062_v24  ;;  %v5063_v12 = vunpack.i.l.bf16 %v5062_v24  ;;  %v2438_v24 = vsel %vm732_vm2, %v6253_v32, %v5073_v35  ;;  %v5088_v32 = vunpack.i.l.bf16 %v6697_v16 }
 0x257   : > { %v2669_v43 = vsel %vm2656_vm14, %v2651_v58, %v5063_v12  ;;  %v2670_v19 = vsel %vm2656_vm14, %v2652_v59, %v5064_v41  ;;  %v5083_v41 = vunpack.i.l.bf16 %v6682_v54  ;;  %v2456_v54 = vsel %vm2441_vm3, %v2438_v24, %v5078_v10 }
 0x258   : > { %v5067_v45 = vpop.permute.xlu1 %5066  ;;  %v5094_v59 = vunpack.i.h.bf16 %v6712_v25 }
 0x259   : > { %v5069_v15 = vunpack.i.h.bf16 %v5067_v45  ;;  %v5068_v61 = vunpack.i.l.bf16 %v5067_v45  ;;  %v6737_v29 = vpop.permute.xlu0 %5101  ;;  %v2439_v45 = vsel %vm732_vm2, %v6412_v2, %v5074_v23  ;;  %v5099_v2 = vunpack.i.h.bf16 %v6726_v47 }
 0x25a   : > { %v5104_v22 = vunpack.i.h.bf16 %v6737_v29 }
 0x25b   : > { %v2687_v18 = vsel %vm2674_vm15, %v2669_v43, %v5068_v61  ;;  %v2688_v40 = vsel %vm2674_vm15, %v2670_v19, %v5069_v15  ;;  %v5093_v15 = vunpack.i.l.bf16 %v6712_v25  ;;  %v5103_v25 = vunpack.i.l.bf16 %v6737_v29 }
 0x25c   : > { %v1559_v46 = vpop.permute.xlu1 %1558  ;;  %v2698_v42 = vpack.c.bf16 %v2688_v40, %v2687_v18 }
 0x25d   : > { %v6743_v48 = vpop.permute.xlu0 %5106  ;;  %v2440_v52 = vsel %vm732_vm2, %v849_v11, %v1559_v46  ;;  %v2474_v46 = vsel %vm2459_vm4, %v2456_v54, %v5083_v41  ;;  %v7227_v11 = vld [vmem:[#allocation9_spill] sm:$0xff]  ;;  %vm2909_vm2 = vcmask 125952  }
 0x25e   : > { %4468 = vmatmul.mubr.bf16.gmra.mxu1 %v2698_v42  ;;  %v5098_v42 = vunpack.i.l.bf16 %v6726_v47  ;;  %v2492_v62 = vsel %vm2477_vm5, %v2474_v46, %v5088_v32 }
 0x25f   : > { %4471 = vmatprep.mubr.msk.bf16.mxu1 %vm5429_vm0, %v7226_v4  ;;  %v2510_v47 = vsel %vm2495_vm6, %v2492_v62, %v5093_v15 }
 0x260   : > { %v1627_v60 = vpop.permute.xlu1 %1626  ;;  %v2527_v35 = vsel %vm479_vm1, %v2510_v47, %v5098_v42 }
 0x261   : > { %v6747_v56 = vpop.permute.xlu0 %5111  ;;  %v2458_v37 = vsel %vm2441_vm3, %v2440_v52, %v1627_v60  ;;  %v5108_v60 = vunpack.i.l.bf16 %v6743_v48  ;;  %v2545_v9 = vsel %vm2530_vm7, %v2527_v35, %v5103_v25 }
 0x262   : > { %v5114_v29 = vunpack.i.h.bf16 %v6747_v56 }
 0x264   : > { %v1695_v49 = vpop.permute.xlu1 %1694 }
 0x265   : > { %v2476_v27 = vsel %vm2459_vm4, %v2458_v37, %v1695_v49  ;;  %v6752_v21 = vpop.permute.xlu0 %5116  ;;  %v5109_v49 = vunpack.i.h.bf16 %v6743_v48 }
 0x266   : > { %v2494_v5 = vsel %vm2477_vm5, %v2476_v27, %v5886_v30  ;;  %v3292_v30 = vmax.f32 %v3286_v17, %v3289_v55  ;;  %v5113_v27 = vunpack.i.l.bf16 %v6747_v56  ;;  %v5118_v55 = vunpack.i.l.bf16 %v6752_v21 }
 0x267   : > { %v2512_v36 = vsel %vm2495_vm6, %v2494_v5, %v5900_v0  ;;  %v5079_v0 = vunpack.i.h.bf16 %v6673_v14  ;;  %v3309_v14 = vmax.f32 %v3304_v13, %v3307_v53 }
 0x268   : > { %v5145_v33 = vpack.i.bf16 %v3293_v26, %v3292_v30  ;;  %v2529_v63 = vsel %vm479_vm1, %v2512_v36, %v5914_v28  ;;  %v5089_v28 = vunpack.i.h.bf16 %v6697_v16  ;;  %v2141_v30 = vpop.permute.xlu1 %2140 }
 0x269   : > { %v6762_v39 = vpop.permute.xlu0 %2193  ;;  %v2547_v61 = vsel %vm2530_vm7, %v2529_v63, %v5931_v57  ;;  %v5155_v18 = vpack.i.bf16 %v3309_v14, %v3308_v50  ;;  %v2457_v40 = vsel %vm2441_vm3, %v2439_v45, %v5079_v0 }
 0x26a   : > { %v2806_v7 = vpop.f32.mrf.mxu1  ;;  %5146 = vrot.lane.b32.xlu0 %v5145_v33, %s7214_s29  ;;  %v2475_v16 = vsel %vm2459_vm4, %v2457_v40, %v5084_v8  ;;  %v2565_v52 = vsel %vm2548_vm8, %v2547_v61, %v7227_v11 }
 0x26b   : > { %v2807_v44 = vadd.f32 %v6759_v3, %v2806_v7  ;;  %v2493_v57 = vsel %vm2477_vm5, %v2475_v16, %v5089_v28  ;;  %v5119_v7 = vunpack.i.h.bf16 %v6752_v21  ;;  %v2583_v36 = vsel %vm2566_vm9, %v2565_v52, %v7228_v1 }
 0x26c   : > { %v4445_v38 = vpop.f32.mrf.mxu1  ;;  %v2511_v37 = vsel %vm2495_vm6, %v2493_v57, %v5094_v59  ;;  %v2601_v33 = vsel %vm2584_vm10, %v2583_v36, %v2141_v30  ;;  %v2247_v50 = vpop.permute.xlu1 %2246 }
 0x26d   : > { %v2876_v51 = vmax.f32 %v2807_v44, 0.0  ;;  %v6771_v20 = vpop.permute.xlu0 %5121  ;;  %v2528_v17 = vsel %vm479_vm1, %v2511_v37, %v5099_v2  ;;  %v2563_v44 = vsel %vm2548_vm8, %v2545_v9, %v5108_v60  ;;  %v2619_v34 = vsel %vm2602_vm11, %v2601_v33, %v6762_v39 }
 0x26e   : > { %v2809_v12 = vpop.f32.mrf.mxu1  ;;  %5156 = vrot.lane.b32.xlu0 %v5155_v18, %s7216_s27  ;;  %v2546_v48 = vsel %vm2530_vm7, %v2528_v17, %v5104_v22  ;;  %v5124_v26 = vunpack.i.h.bf16 %v6771_v20  ;;  %v5123_v23 = vunpack.i.l.bf16 %v6771_v20  ;;  %v2581_v10 = vsel %vm2566_vm9, %v2563_v44, %v5113_v27 }
 0x26f   : > { %2893 = vst.msk [vmem:[#allocation3] sm:$0xff] %vm2441_vm3, %v2876_v51  ;;  %v2810_v31 = vadd.f32 %v6759_v3, %v2809_v12  ;;  %v2564_v56 = vsel %vm2548_vm8, %v2546_v48, %v5109_v49  ;;  %v2599_v0 = vsel %vm2584_vm10, %v2581_v10, %v5118_v55  ;;  %v2637_v61 = vsel %vm2620_vm12, %v2619_v34, %v2247_v50 }
 0x270   : > { %v4446_v58 = vpop.f32.mrf.mxu1  ;;  %v2582_v21 = vsel %vm2566_vm9, %v2564_v56, %v5114_v29  ;;  %v2617_v20 = vsel %vm2602_vm11, %v2599_v0, %v5123_v23  ;;  %v2353_v40 = vpop.permute.xlu1 %2352 }
 0x271   : > { %v2877_v43 = vmax.f32 %v2810_v31, 0.0  ;;  %v5127_v19 = vpop.permute.xlu0 %5126  ;;  %v2600_v8 = vsel %vm2584_vm10, %v2582_v21, %v5119_v7 }
 0x272   : > { %v5129_v38 = vunpack.i.h.bf16 %v5127_v19  ;;  %v5128_v24 = vunpack.i.l.bf16 %v5127_v19  ;;  %v2618_v12 = vsel %vm2602_vm11, %v2600_v8, %v5124_v26 }
 0x273   : > { %2894 = vst.msk [vmem:[#allocation3 + $0x8] sm:$0xff] %vm2441_vm3, %v2877_v43 }
 0x274   : > { %v2635_v53 = vsel %vm2620_vm12, %v2617_v20, %v5128_v24  ;;  %v2636_v32 = vsel %vm2620_vm12, %v2618_v12, %v5129_v38 }
 0x275   : > { %v5132_v5 = vpop.permute.xlu0 %5131 }
 0x276   : > { %v5134_v6 = vunpack.i.h.bf16 %v5132_v5  ;;  %v5133_v13 = vunpack.i.l.bf16 %v5132_v5 }
 0x278   : > { %v2653_v14 = vsel %vm2638_vm13, %v2635_v53, %v5133_v13  ;;  %v2654_v45 = vsel %vm2638_vm13, %v2636_v32, %v5134_v6 }
 0x279   : > { %v5137_v51 = vpop.permute.xlu0 %5136 }
 0x27a   : > { %v5139_v41 = vunpack.i.h.bf16 %v5137_v51  ;;  %v5138_v63 = vunpack.i.l.bf16 %v5137_v51 }
 0x27c   : > { %v2671_v59 = vsel %vm2656_vm14, %v2653_v14, %v5138_v63  ;;  %v2672_v58 = vsel %vm2656_vm14, %v2654_v45, %v5139_v41 }
 0x27d   : > { %v5142_v31 = vpop.permute.xlu0 %5141 }
 0x27e   : > { %v5144_v54 = vunpack.i.h.bf16 %v5142_v31  ;;  %v5143_v28 = vunpack.i.l.bf16 %v5142_v31 }
 0x280   : > { %v2689_v15 = vsel %vm2674_vm15, %v2671_v59, %v5143_v28  ;;  %v2690_v39 = vsel %vm2674_vm15, %v2672_v58, %v5144_v54 }
 0x281   : > { %v2300_v43 = vpop.permute.xlu0 %2299  ;;  %v2699_v19 = vpack.c.bf16 %v2690_v39, %v2689_v15 }
 0x282   : > { %v2655_v18 = vsel %vm2638_vm13, %v2637_v61, %v2300_v43 }
 0x283   : > { %4472 = vmatmul.mubr.bf16.gmra.mxu1 %v2699_v19  ;;  %v2673_v46 = vsel %vm2656_vm14, %v2655_v18, %v2353_v40 }
 0x284   : > { %4475 = vmatprep.mubr.msk.bf16.mxu1 %vm5429_vm0, %v7226_v4 }
 0x285   : > { %v2406_v2 = vpop.permute.xlu0 %2405 }
 0x286   : > { %v2691_v42 = vsel %vm2674_vm15, %v2673_v46, %v2406_v2 }
 0x287   : > { %v2700_v16 = vpack.c.bf16 %v2691_v42, %v2691_v42 }
 0x28b   : > { %v2814_v62 = vpop.f32.mrf.mxu1  ;;  %4476 = vmatmul.mubr.bf16.gmra.mxu1 %v2700_v16  ;;  %v5348_v16 = vld [vmem:[%s7164_s5 + $0x78] sm:$0xff]  }
 0x28c   : > { %v2815_v25 = vadd.f32 %v6759_v3, %v2814_v62  ;;  %4304 = vmatprep.subr.bf16.mxu1 %v5348_v16 }
 0x28d   : > { %v4449_v57 = vpop.f32.mrf.mxu1 }
 0x28e   : > { %v2878_v22 = vmax.f32 %v2815_v25, 0.0 }
 0x28f   : > { %v2817_v60 = vpop.f32.mrf.mxu1 }
 0x290   : > { %2895 = vst.msk [vmem:[#allocation3 + $0x10] sm:$0xff] %vm2441_vm3, %v2878_v22  ;;  %v2818_v11 = vadd.f32 %v6759_v3, %v2817_v60 }
 0x291   : > { %v4450_v52 = vpop.f32.mrf.mxu1 }
 0x292   : > { %v2879_v47 = vmax.f32 %v2818_v11, 0.0  ;;  %v5349_v11 = vld [vmem:[%s7164_s5 + $0x38] sm:$0xff]  }
 0x293   : > { %4305 = vmatpush3.bf16.msra.mxu1 %v5349_v11  ;;  %v5361_v11 = vld [vmem:[%s7164_s5 + $0x8] sm:$0xff]  }
 0x294   : > { %2896 = vst.msk [vmem:[#allocation3 + $0x18] sm:$0xff] %vm2441_vm3, %v2879_v47 }
 0x29b   : > { %v3154_v16 = vld [vmem:[#allocation3 + $0xb] ss:$2 sm:$0xff] }
 0x2a6   : > { %v2822_v37 = vpop.f32.mrf.mxu1 }
 0x2a7   : > { %v2823_v49 = vadd.f32 %v6759_v3, %v2822_v37 }
 0x2a8   : > { %v4453_v27 = vpop.f32.mrf.mxu1 }
 0x2a9   : > { %v2880_v5 = vmax.f32 %v2823_v49, 0.0 }
 0x2aa   : > { %v2825_v35 = vpop.f32.mrf.mxu1 }
 0x2ab   : > { %2897 = vst.msk [vmem:[#allocation3 + $0x20] sm:$0xff] %vm2441_vm3, %v2880_v5  ;;  %v2826_v17 = vadd.f32 %v6759_v3, %v2825_v35 }
 0x2ac   : > { %v4454_v29 = vpop.f32.mrf.mxu1 }
 0x2ad   : > { %v2881_v9 = vmax.f32 %v2826_v17, 0.0  ;;  %v5350_v29 = vld [vmem:[%s7164_s5 + $0x70] sm:$0xff]  }
 0x2ae   : > { %4306 = vmatprep.subr.bf16.mxu1 %v5350_v29  ;;  %v5363_v29 = vld [vmem:[%s7164_s5] sm:$0xff]  }
 0x2af   : > { %2898 = vst.msk [vmem:[#allocation3 + $0x28] sm:$0xff] %vm2441_vm3, %v2881_v9 }
 0x2b2   : > { %v2958_v23 = vld [vmem:[#allocation3 + $0x12] ss:$2 sm:$0xff]  ;;  %v2976_v56 = vld [vmem:[#allocation3 + $0x13] ss:$2 sm:$0xff] }
 0x2b3   : > { %v2992_v51 = vmax.f32 %v2958_v23, %v2976_v56  ;;  %v3003_v6 = vld [vmem:[#allocation3 + $0x14] ss:$2 sm:$0xff]  ;;  %v3021_v13 = vld [vmem:[#allocation3 + $0x15] ss:$2 sm:$0xff] }
 0x2b4   : > { %v3037_v20 = vmax.f32 %v3003_v6, %v3021_v13  ;;  %v3048_v12 = vld [vmem:[#allocation3 + $0x16] ss:$2 sm:$0xff]  ;;  %v3066_v34 = vld [vmem:[#allocation3 + $0x17] ss:$2 sm:$0xff] }
 0x2b5   : > { %v3082_v14 = vmax.f32 %v3048_v12, %v3066_v34  ;;  %v3093_v45 = vld [vmem:[#allocation3 + $0x18] ss:$2 sm:$0xff]  ;;  %v3111_v54 = vld [vmem:[#allocation3 + $0x19] ss:$2 sm:$0xff] }
 0x2b6   : > { %v3127_v39 = vmax.f32 %v3093_v45, %v3111_v54  ;;  %v3138_v61 = vld [vmem:[#allocation3 + $0x1a] ss:$2 sm:$0xff]  ;;  %v3156_v43 = vld [vmem:[#allocation3 + $0x1b] ss:$2 sm:$0xff] }
 0x2b7   : > { %v3172_v25 = vmax.f32 %v3138_v61, %v3156_v43  ;;  %v3183_v22 = vld [vmem:[#allocation3 + $0x1c] ss:$2 sm:$0xff]  ;;  %v3201_v60 = vld [vmem:[#allocation3 + $0x1d] ss:$2 sm:$0xff] }
 0x2b8   : > { %v3217_v17 = vmax.f32 %v3183_v22, %v3201_v60  ;;  %v5352_v23 = vld [vmem:[%s7164_s5 + $0x68] sm:$0xff]   ;;  %v5358_v61 = vld [vmem:[%s7164_s5 + $0x50] sm:$0xff]  }
 0x2b9   : > { %v5353_v56 = vld [vmem:[%s7164_s5 + $0x28] sm:$0xff]  }
 0x2ba   : > { %v3001_v13 = vld [vmem:[#allocation3 + $0x4] ss:$2 sm:$0xff] }
 0x2c7   : > { %v2830_v7 = vpop.f32.mrf.mxu1 }
 0x2c8   : > { %v2831_v55 = vadd.f32 %v6759_v3, %v2830_v7  ;;  %v3228_v7 = vld [vmem:[#allocation3 + $0x1e] ss:$2 sm:$0xff] }
 0x2c9   : > { %v4457_v1 = vpop.f32.mrf.mxu1 }
 0x2ca   : > { %v2882_v36 = vmax.f32 %v2831_v55, 0.0  ;;  %v3246_v55 = vld [vmem:[#allocation3 + $0x1f] ss:$2 sm:$0xff] }
 0x2cb   : > { %v2833_v48 = vpop.f32.mrf.mxu1  ;;  %v5351_v1 = vld [vmem:[%s7164_s5 + $0x30] sm:$0xff]  }
 0x2cc   : > { %2899 = vst.msk [vmem:[#allocation3 + $0x30] sm:$0xff] %vm2441_vm3, %v2882_v36  ;;  %v2834_v44 = vadd.f32 %v6759_v3, %v2833_v48  ;;  %4307 = vmatpush3.bf16.msra.mxu1 %v5351_v1  ;;  %v3226_v1 = vld [vmem:[#allocation3 + $0xe] ss:$2 sm:$0xff] }
 0x2cd   : > { %v4458_v30 = vpop.f32.mrf.mxu1  ;;  %4308 = vmatprep.subr.bf16.mxu1 %v5352_v23 }
 0x2ce   : > { %v2883_v26 = vmax.f32 %v2834_v44, 0.0  ;;  %v3262_v44 = vmax.f32 %v3228_v7, %v3246_v55  ;;  %v2956_v30 = vld [vmem:[#allocation3 + $0x2] ss:$2 sm:$0xff] }
 0x2d0   : > { %2900 = vst.msk [vmem:[#allocation3 + $0x38] sm:$0xff] %vm2441_vm3, %v2883_v26  ;;  %v2974_v26 = vld [vmem:[#allocation3 + $0x3] ss:$2 sm:$0xff]  ;;  %4309 = vmatpush3.bf16.msra.mxu1 %v5353_v56 }
 0x2d3   : > { %v2960_v10 = vld [vmem:[#allocation3 + $0x22] ss:$2 sm:$0xff]  ;;  %v2978_v38 = vld [vmem:[#allocation3 + $0x23] ss:$2 sm:$0xff] }
 0x2d4   : > { %v3005_v24 = vld [vmem:[#allocation3 + $0x24] ss:$2 sm:$0xff]  ;;  %v2993_v21 = vmax.f32 %v2960_v10, %v2978_v38  ;;  %v3023_v33 = vld [vmem:[#allocation3 + $0x25] ss:$2 sm:$0xff] }
 0x2d5   : > { %v3038_v8 = vmax.f32 %v3005_v24, %v3023_v33  ;;  %v3050_v41 = vld [vmem:[#allocation3 + $0x26] ss:$2 sm:$0xff]  ;;  %v3068_v63 = vld [vmem:[#allocation3 + $0x27] ss:$2 sm:$0xff] }
 0x2d6   : > { %v5160_v0 = vpack.i.bf16 %v2993_v21, %v2992_v51  ;;  %v3083_v32 = vmax.f32 %v3050_v41, %v3068_v63  ;;  %v3095_v31 = vld [vmem:[#allocation3 + $0x28] ss:$2 sm:$0xff]  ;;  %v3113_v50 = vld [vmem:[#allocation3 + $0x29] ss:$2 sm:$0xff]  ;;  %v2991_v21 = vmax.f32 %v2956_v30, %v2974_v26 }
 0x2d7   : > { %v5165_v53 = vpack.i.bf16 %v3038_v8, %v3037_v20  ;;  %v3128_v59 = vmax.f32 %v3095_v31, %v3113_v50  ;;  %v3140_v58 = vld [vmem:[#allocation3 + $0x2a] ss:$2 sm:$0xff]  ;;  %v3158_v15 = vld [vmem:[#allocation3 + $0x2b] ss:$2 sm:$0xff] }
 0x2d8   : > { %5161 = vrot.lane.b32.xlu1 %v5160_v0, %s7212_s24  ;;  %v5170_v28 = vpack.i.bf16 %v3083_v32, %v3082_v14  ;;  %v3173_v40 = vmax.f32 %v3140_v58, %v3158_v15  ;;  %v3185_v2 = vld [vmem:[#allocation3 + $0x2c] ss:$2 sm:$0xff]  ;;  %v3203_v42 = vld [vmem:[#allocation3 + $0x2d] ss:$2 sm:$0xff] }
 0x2d9   : > { %v5175_v18 = vpack.i.bf16 %v3128_v59, %v3127_v39  ;;  %v3218_v37 = vmax.f32 %v3185_v2, %v3203_v42  ;;  %v3230_v27 = vld [vmem:[#allocation3 + $0x2e] ss:$2 sm:$0xff]  ;;  %v3248_v5 = vld [vmem:[#allocation3 + $0x2f] ss:$2 sm:$0xff] }
 0x2da   : > { %v5180_v47 = vpack.i.bf16 %v3173_v40, %v3172_v25  ;;  %v3263_v48 = vmax.f32 %v3230_v27, %v3248_v5  ;;  %v3019_v0 = vld [vmem:[#allocation3 + $0x5] ss:$2 sm:$0xff]  ;;  %v5354_v8 = vld [vmem:[%s7164_s5 + $0x60] sm:$0xff]   ;;  %v3091_v15 = vld [vmem:[#allocation3 + $0x8] ss:$2 sm:$0xff] }
 0x2db   : > { %v5185_v36 = vpack.i.bf16 %v3218_v37, %v3217_v17  ;;  %4310 = vmatprep.subr.bf16.mxu1 %v5354_v8  ;;  %v3036_v34 = vmax.f32 %v3001_v13, %v3019_v0  ;;  %v3064_v32 = vld [vmem:[#allocation3 + $0x7] ss:$2 sm:$0xff]  ;;  %v5355_v31 = vld [vmem:[%s7164_s5 + $0x20] sm:$0xff]  }
 0x2dc   : > { %5166 = vrot.lane.b32.xlu1 %v5165_v53, %s7214_s29  ;;  %v5190_v10 = vpack.i.bf16 %v3263_v48, %v3262_v44  ;;  %v3046_v53 = vld [vmem:[#allocation3 + $0x6] ss:$2 sm:$0xff]  ;;  %4311 = vmatpush3.bf16.msra.mxu1 %v5355_v31  ;;  %v3109_v39 = vld [vmem:[#allocation3 + $0x9] ss:$2 sm:$0xff]  ;;  %v5362_v5 = vld [vmem:[%s7164_s5 + $0x40] sm:$0xff]  }
 0x2dd   : > { %v5356_v50 = vld [vmem:[%s7164_s5 + $0x58] sm:$0xff]   ;;  %v3081_v58 = vmax.f32 %v3046_v53, %v3064_v32  ;;  %v3126_v2 = vmax.f32 %v3091_v15, %v3109_v39 }
 0x2de   : > { %v5357_v59 = vld [vmem:[%s7164_s5 + $0x18] sm:$0xff]   ;;  %4312 = vmatprep.subr.bf16.mxu1 %v5356_v50 }
 0x2df   : > { %v3136_v42 = vld [vmem:[#allocation3 + $0xa] ss:$2 sm:$0xff]  ;;  %v3199_v37 = vld [vmem:[#allocation3 + $0xd] ss:$2 sm:$0xff] }
 0x2e0   : > { %5171 = vrot.lane.b32.xlu1 %v5170_v28, %s7225_s2  ;;  %4313 = vmatpush3.bf16.msra.mxu1 %v5357_v59 }
 0x2e1   : > { %4314 = vmatprep.subr.bf16.mxu1 %v5358_v61 }
 0x2e2   : > { %v2838_v19 = vpop.f32.mrf.mxu1 }
 0x2e3   : > { %v2839_v46 = vadd.f32 %v6759_v3, %v2838_v19 }
 0x2e4   : > { %5176 = vrot.lane.b32.xlu1 %v5175_v18, %s7216_s27  ;;  %v4461_v62 = vpop.f32.mrf.mxu1 }
 0x2e5   : > { %v2884_v57 = vmax.f32 %v2839_v46, 0.0  ;;  %v5359_v46 = vld [vmem:[%s7164_s5 + $0x10] sm:$0xff]  }
 0x2e6   : > { %v2841_v52 = vpop.f32.mrf.mxu1  ;;  %4315 = vmatpush3.bf16.msra.mxu1 %v5359_v46 }
 0x2e7   : > { %2901 = vst.msk [vmem:[#allocation3 + $0x40] sm:$0xff] %vm2441_vm3, %v2884_v57  ;;  %v2842_v49 = vadd.f32 %v6759_v3, %v2841_v52  ;;  %v5360_v57 = vld [vmem:[%s7164_s5 + $0x48] sm:$0xff]   ;;  %v3171_v52 = vmax.f32 %v3136_v42, %v3154_v16 }
 0x2e8   : > { %5181 = vrot.lane.b32.xlu1 %v5180_v47, %s7209_s26  ;;  %v4462_v35 = vpop.f32.mrf.mxu1  ;;  %4316 = vmatprep.subr.bf16.mxu1 %v5360_v57  ;;  %v3181_v47 = vld [vmem:[#allocation3 + $0xc] ss:$2 sm:$0xff] }
 0x2e9   : > { %v2885_v9 = vmax.f32 %v2842_v49, 0.0  ;;  %v3216_v7 = vmax.f32 %v3181_v47, %v3199_v37 }
 0x2ea   : > { %4317 = vmatpush3.bf16.msra.mxu1 %v5361_v11 }
 0x2eb   : > { %2902 = vst.msk [vmem:[#allocation3 + $0x48] sm:$0xff] %vm2441_vm3, %v2885_v9  ;;  %4318 = vmatprep.subr.bf16.mxu1 %v5362_v5 }
 0x2ec   : > { %5186 = vrot.lane.b32.xlu1 %v5185_v36, %s7211_s17  ;;  %v3244_v36 = vld [vmem:[#allocation3 + $0xf] ss:$2 sm:$0xff] }
 0x2ed   : > { %v3261_v56 = vmax.f32 %v3226_v1, %v3244_v36 }
 0x2ee   : > { %v2962_v38 = vld [vmem:[#allocation3 + $0x32] ss:$2 sm:$0xff]  ;;  %v2980_v24 = vld [vmem:[#allocation3 + $0x33] ss:$2 sm:$0xff]  ;;  %4319 = vmatpush3.bf16.msra.mxu1 %v5363_v29 }
 0x2ef   : > { %v3007_v51 = vld [vmem:[#allocation3 + $0x34] ss:$2 sm:$0xff]  ;;  %v2994_v33 = vmax.f32 %v2962_v38, %v2980_v24  ;;  %v3025_v6 = vld [vmem:[#allocation3 + $0x35] ss:$2 sm:$0xff]  ;;  %4479 = vmatprep.subr.bf16.mxu1 %v7226_v4 }
 0x2f0   : > { %5191 = vrot.lane.b32.xlu1 %v5190_v10, %s7221_s21  ;;  %v3039_v63 = vmax.f32 %v3007_v51, %v3025_v6  ;;  %v3052_v20 = vld [vmem:[#allocation3 + $0x36] ss:$2 sm:$0xff]  ;;  %v3070_v12 = vld [vmem:[#allocation3 + $0x37] ss:$2 sm:$0xff] }
 0x2f1   : > { %v5195_v41 = vpack.i.bf16 %v2994_v33, %v2991_v21  ;;  %v3084_v45 = vmax.f32 %v3052_v20, %v3070_v12  ;;  %v3097_v54 = vld [vmem:[#allocation3 + $0x38] ss:$2 sm:$0xff]  ;;  %v3115_v28 = vld [vmem:[#allocation3 + $0x39] ss:$2 sm:$0xff] }
 0x2f2   : > { %v5200_v14 = vpack.i.bf16 %v3039_v63, %v3036_v34  ;;  %v3129_v19 = vmax.f32 %v3097_v54, %v3115_v28  ;;  %v3142_v18 = vld [vmem:[#allocation3 + $0x3a] ss:$2 sm:$0xff]  ;;  %v3160_v40 = vld [vmem:[#allocation3 + $0x3b] ss:$2 sm:$0xff] }
 0x2f3   : > { %5196 = vrot.lane.b32.xlu0 %v5195_v41, %s7212_s24  ;;  %v5205_v43 = vpack.i.bf16 %v3084_v45, %v3081_v58  ;;  %v3174_v25 = vmax.f32 %v3142_v18, %v3160_v40  ;;  %v3187_v22 = vld [vmem:[#allocation3 + $0x3c] ss:$2 sm:$0xff]  ;;  %v3205_v60 = vld [vmem:[#allocation3 + $0x3d] ss:$2 sm:$0xff] }
 0x2f4   : > { %v5210_v62 = vpack.i.bf16 %v3129_v19, %v3126_v2  ;;  %v3219_v27 = vmax.f32 %v3187_v22, %v3205_v60  ;;  %v3232_v35 = vld [vmem:[#allocation3 + $0x3e] ss:$2 sm:$0xff]  ;;  %v3250_v17 = vld [vmem:[#allocation3 + $0x3f] ss:$2 sm:$0xff] }
 0x2f5   : > { %v5215_v49 = vpack.i.bf16 %v3174_v25, %v3171_v52  ;;  %v3264_v30 = vmax.f32 %v3232_v35, %v3250_v17 }
 0x2f6   : > { %v5220_v44 = vpack.i.bf16 %v3219_v27, %v3216_v7 }
 0x2f7   : > { %5201 = vrot.lane.b32.xlu0 %v5200_v14, %s7214_s29  ;;  %v5225_v24 = vpack.i.bf16 %v3264_v30, %v3261_v56  ;;  %v6938_v56 = vpop.permute.xlu1 %5151 }
 0x2fb   : > { %5206 = vrot.lane.b32.xlu0 %v5205_v43, %s7225_s2 }
 0x2ff   : > { %5211 = vrot.lane.b32.xlu0 %v5210_v62, %s7216_s27 }
 0x303   : > { %v2846_v9 = vpop.f32.mrf.mxu1  ;;  %5216 = vrot.lane.b32.xlu0 %v5215_v49, %s7209_s26 }
 0x304   : > { %v2847_v55 = vadd.f32 %v6759_v3, %v2846_v9 }
 0x305   : > { %v4465_v48 = vpop.f32.mrf.mxu1 }
 0x306   : > { %v2886_v26 = vmax.f32 %v2847_v55, 0.0 }
 0x307   : > { %v2849_v23 = vpop.f32.mrf.mxu1  ;;  %5221 = vrot.lane.b32.xlu0 %v5220_v44, %s7211_s17 }
 0x308   : > { %2903 = vst.msk [vmem:[#allocation3 + $0x50] sm:$0xff] %vm2441_vm3, %v2886_v26  ;;  %v2850_v10 = vadd.f32 %v6759_v3, %v2849_v23 }
 0x309   : > { %v4466_v38 = vpop.f32.mrf.mxu1 }
 0x30a   : > { %v2887_v51 = vmax.f32 %v2850_v10, 0.0 }
 0x30b   : > { %5226 = vrot.lane.b32.xlu0 %v5225_v24, %s7221_s21  ;;  %v6941_v24 = vpop.permute.xlu1 %3620 }
 0x30c   : > { %2904 = vst.msk [vmem:[#allocation3 + $0x58] sm:$0xff] %vm2441_vm3, %v2887_v51 }
 0x30f   : > { %v2964_v20 = vld [vmem:[#allocation3 + $0x42] ss:$2 sm:$0xff]  ;;  %v2982_v12 = vld [vmem:[#allocation3 + $0x43] ss:$2 sm:$0xff] }
 0x310   : > { %v3009_v34 = vld [vmem:[#allocation3 + $0x44] ss:$2 sm:$0xff]  ;;  %v3027_v53 = vld [vmem:[#allocation3 + $0x45] ss:$2 sm:$0xff]  ;;  %v2995_v45 = vmax.f32 %v2964_v20, %v2982_v12 }
 0x311   : > { %v3054_v14 = vld [vmem:[#allocation3 + $0x46] ss:$2 sm:$0xff]  ;;  %v3040_v15 = vmax.f32 %v3009_v34, %v3027_v53  ;;  %v3072_v61 = vld [vmem:[#allocation3 + $0x47] ss:$2 sm:$0xff] }
 0x312   : > { %v3099_v46 = vld [vmem:[#allocation3 + $0x48] ss:$2 sm:$0xff]  ;;  %v3117_v2 = vld [vmem:[#allocation3 + $0x49] ss:$2 sm:$0xff]  ;;  %v3085_v57 = vmax.f32 %v3054_v14, %v3072_v61 }
 0x313   : > { %v3130_v11 = vmax.f32 %v3099_v46, %v3117_v2  ;;  %v3144_v52 = vld [vmem:[#allocation3 + $0x4a] ss:$2 sm:$0xff]  ;;  %v3162_v47 = vld [vmem:[#allocation3 + $0x4b] ss:$2 sm:$0xff] }
 0x314   : > { %v3189_v27 = vld [vmem:[#allocation3 + $0x4c] ss:$2 sm:$0xff]  ;;  %v3207_v5 = vld [vmem:[#allocation3 + $0x4d] ss:$2 sm:$0xff]  ;;  %v3175_v7 = vmax.f32 %v3144_v52, %v3162_v47 }
 0x315   : > { %v3220_v55 = vmax.f32 %v3189_v27, %v3207_v5  ;;  %v3234_v1 = vld [vmem:[#allocation3 + $0x4e] ss:$2 sm:$0xff]  ;;  %v3252_v36 = vld [vmem:[#allocation3 + $0x4f] ss:$2 sm:$0xff] }
 0x316   : > { %v3265_v26 = vmax.f32 %v3234_v1, %v3252_v36  ;;  %v2915_v14 = vld [vmem:[#allocation3 + $0x20] ss:$2 sm:$0xff] }
 0x31e   : > { %v2854_v21 = vpop.f32.mrf.mxu1 }
 0x31f   : > { %v2855_v33 = vadd.f32 %v6759_v3, %v2854_v21 }
 0x320   : > { %v4469_v6 = vpop.f32.mrf.mxu1 }
 0x321   : > { %v2888_v13 = vmax.f32 %v2855_v33, 0.0 }
 0x322   : > { %v2857_v0 = vpop.f32.mrf.mxu1 }
 0x323   : > { %2905 = vst.msk [vmem:[#allocation3 + $0x60] sm:$0xff] %vm2441_vm3, %v2888_v13  ;;  %v2858_v8 = vadd.f32 %v6759_v3, %v2857_v0 }
 0x324   : > { %v4470_v41 = vpop.f32.mrf.mxu1 }
 0x325   : > { %v2889_v63 = vmax.f32 %v2858_v8, 0.0 }
 0x327   : > { %2906 = vst.msk [vmem:[#allocation3 + $0x68] sm:$0xff] %vm2441_vm3, %v2889_v63 }
 0x32a   : > { %v2966_v32 = vld [vmem:[#allocation3 + $0x52] ss:$2 sm:$0xff]  ;;  %v2984_v31 = vld [vmem:[#allocation3 + $0x53] ss:$2 sm:$0xff] }
 0x32b   : > { %v3011_v50 = vld [vmem:[#allocation3 + $0x54] ss:$2 sm:$0xff]  ;;  %v2996_v54 = vmax.f32 %v2966_v32, %v2984_v31  ;;  %v3029_v28 = vld [vmem:[#allocation3 + $0x55] ss:$2 sm:$0xff] }
 0x32c   : > { %v3056_v59 = vld [vmem:[#allocation3 + $0x56] ss:$2 sm:$0xff]  ;;  %v3074_v58 = vld [vmem:[#allocation3 + $0x57] ss:$2 sm:$0xff]  ;;  %v3041_v39 = vmax.f32 %v3011_v50, %v3029_v28 }
 0x32d   : > { %v3101_v43 = vld [vmem:[#allocation3 + $0x58] ss:$2 sm:$0xff]  ;;  %v3119_v19 = vld [vmem:[#allocation3 + $0x59] ss:$2 sm:$0xff]  ;;  %v5230_v18 = vpack.i.bf16 %v2996_v54, %v2995_v45  ;;  %v3086_v40 = vmax.f32 %v3056_v59, %v3074_v58 }
 0x32e   : > { %v5235_v42 = vpack.i.bf16 %v3041_v39, %v3040_v15  ;;  %v3131_v16 = vmax.f32 %v3101_v43, %v3119_v19  ;;  %v3146_v62 = vld [vmem:[#allocation3 + $0x5a] ss:$2 sm:$0xff]  ;;  %v3164_v25 = vld [vmem:[#allocation3 + $0x5b] ss:$2 sm:$0xff] }
 0x32f   : > { %5231 = vrot.lane.b32.xlu1 %v5230_v18, %s7212_s24  ;;  %v3191_v22 = vld [vmem:[#allocation3 + $0x5c] ss:$2 sm:$0xff]  ;;  %v3209_v60 = vld [vmem:[#allocation3 + $0x5d] ss:$2 sm:$0xff]  ;;  %v5240_v37 = vpack.i.bf16 %v3086_v40, %v3085_v57  ;;  %v3176_v49 = vmax.f32 %v3146_v62, %v3164_v25 }
 0x330   : > { %5236 = vrot.lane.b32.xlu0 %v5235_v42, %s7214_s29  ;;  %v5245_v35 = vpack.i.bf16 %v3131_v16, %v3130_v11  ;;  %v3221_v17 = vmax.f32 %v3191_v22, %v3209_v60  ;;  %v3236_v29 = vld [vmem:[#allocation3 + $0x5e] ss:$2 sm:$0xff]  ;;  %v3254_v9 = vld [vmem:[#allocation3 + $0x5f] ss:$2 sm:$0xff]  ;;  %v6954_v11 = vpop.permute.xlu0 %5146 }
 0x331   : > { %v5250_v48 = vpack.i.bf16 %v3176_v49, %v3175_v7  ;;  %v3266_v44 = vmax.f32 %v3236_v29, %v3254_v9  ;;  %v2913_v50 = vld [vmem:[#allocation3 + $0x10] ss:$2 sm:$0xff]  ;;  %v2931_v45 = vld [vmem:[#allocation3 + $0x11] ss:$2 sm:$0xff]  ;;  %v2933_v59 = vld [vmem:[#allocation3 + $0x21] ss:$2 sm:$0xff] }
 0x332   : > { %v5255_v30 = vpack.i.bf16 %v3221_v17, %v3220_v55  ;;  %v2948_v25 = vmax.f32 %v2915_v14, %v2933_v59  ;;  %v2947_v49 = vmax.f32 %v2913_v50, %v2931_v45 }
 0x333   : > { %5241 = vrot.lane.b32.xlu1 %v5240_v37, %s7225_s2  ;;  %v5260_v23 = vpack.i.bf16 %v3266_v44, %v3265_v26 }
 0x334   : > { %5246 = vrot.lane.b32.xlu0 %v5245_v35, %s7216_s27  ;;  %v6967_v45 = vpop.permute.xlu0 %5156 }
 0x337   : > { %5251 = vrot.lane.b32.xlu1 %v5250_v48, %s7209_s26 }
 0x338   : > { %5256 = vrot.lane.b32.xlu0 %v5255_v30, %s7211_s17 }
 0x33b   : > { %5261 = vrot.lane.b32.xlu1 %v5260_v23, %s7221_s21 }
 0x343   : > { %v2862_v10 = vpop.f32.mrf.mxu1 }
 0x344   : > { %v2863_v38 = vadd.f32 %v6759_v3, %v2862_v10 }
 0x345   : > { %v4473_v51 = vpop.f32.mrf.mxu1 }
 0x346   : > { %v2890_v21 = vmax.f32 %v2863_v38, 0.0 }
 0x347   : > { %v2865_v33 = vpop.f32.mrf.mxu1 }
 0x348   : > { %2907 = vst.msk [vmem:[#allocation3 + $0x70] sm:$0xff] %vm2441_vm3, %v2890_v21  ;;  %v2866_v6 = vadd.f32 %v6759_v3, %v2865_v33 }
 0x349   : > { %v4474_v13 = vpop.f32.mrf.mxu1 }
 0x34a   : > { %v2891_v0 = vmax.f32 %v2866_v6, 0.0  ;;  %v5162_v8 = vpop.permute.xlu1 %5161 }
 0x34b   : > { %v2870_v41 = vpop.f32.mrf.mxu1  ;;  %v5164_v39 = vunpack.i.h.bf16 %v5162_v8  ;;  %v5163_v40 = vunpack.i.l.bf16 %v5162_v8  ;;  %v3280_v8 = vld [vmem:[#allocation3 + $0x92] ss:$2 sm:$0x3] }
 0x34c   : > { %2908 = vst.msk [vmem:[#allocation3 + $0x78] sm:$0xff] %vm2441_vm3, %v2891_v0  ;;  %v2871_v63 = vadd.f32 %v6759_v3, %v2870_v41  ;;  %v3283_v41 = vld [vmem:[#allocation3 + $0x93] ss:$2 sm:$0x3] }
 0x34d   : > { %v4477_v20 = vpop.f32.mrf.mxu1  ;;  %v3644_v9 = vsel %vm2441_vm3, %v2948_v25, %v5164_v39  ;;  %v3643_v30 = vsel %vm2441_vm3, %v2947_v49, %v5163_v40 }
 0x34e   : > { %v2892_v12 = vmax.f32 %v2871_v63, 0.0  ;;  %v6947_v34 = vpop.permute.xlu1 %5166 }
 0x34f   : > { %v2873_v53 = vpop.f32.mrf.mxu1  ;;  %v3013_v54 = vld [vmem:[#allocation3 + $0x64] ss:$2 sm:$0xff]  ;;  %v3031_v28 = vld [vmem:[#allocation3 + $0x65] ss:$2 sm:$0xff]  ;;  %v5168_v57 = vunpack.i.l.bf16 %v6947_v34  ;;  %v5169_v7 = vunpack.i.h.bf16 %v6947_v34 }
 0x350   : > { %2910 = vst.msk [vmem:[#allocation3 + $0x80] sm:$0xf] %vm2909_vm2, %v2892_v12  ;;  %v2968_v15 = vld [vmem:[#allocation3 + $0x62] ss:$2 sm:$0xff]  ;;  %v2986_v3 = vld [vmem:[#allocation3 + $0x63] ss:$2 sm:$0xff]  ;;  %v3042_v46 = vmax.f32 %v3013_v54, %v3031_v28 }
 0x351   : > { %v4478_v32 = vpop.f32.mrf.mxu1  ;;  %v3103_v18 = vld [vmem:[#allocation3 + $0x68] ss:$2 sm:$0xff]  ;;  %v2997_v22 = vmax.f32 %v2968_v15, %v2986_v3  ;;  %v3121_v52 = vld [vmem:[#allocation3 + $0x69] ss:$2 sm:$0xff]  ;;  %v3652_v33 = vsel %vm2477_vm5, %v3643_v30, %v5168_v57  ;;  %v3653_v50 = vsel %vm2477_vm5, %v3644_v9, %v5169_v7 }
 0x352   : > { %v6949_v31 = vpop.permute.xlu1 %5171  ;;  %v3058_v17 = vld [vmem:[#allocation3 + $0x66] ss:$2 sm:$0xff]  ;;  %v3076_v29 = vld [vmem:[#allocation3 + $0x67] ss:$2 sm:$0xff]  ;;  %v3132_v10 = vmax.f32 %v3103_v18, %v3121_v52 }
 0x353   : > { %v3193_v36 = vld [vmem:[#allocation3 + $0x6c] ss:$2 sm:$0xff]  ;;  %v5174_v26 = vunpack.i.h.bf16 %v6949_v31  ;;  %v5173_v23 = vunpack.i.l.bf16 %v6949_v31  ;;  %v3211_v38 = vld [vmem:[#allocation3 + $0x6d] ss:$2 sm:$0xff]  ;;  %v3087_v0 = vmax.f32 %v3058_v17, %v3076_v29 }
 0x354   : > { %v3148_v32 = vld [vmem:[#allocation3 + $0x6a] ss:$2 sm:$0xff]  ;;  %v3166_v31 = vld [vmem:[#allocation3 + $0x6b] ss:$2 sm:$0xff]  ;;  %v3222_v54 = vmax.f32 %v3193_v36, %v3211_v38 }
 0x355   : > { %v3661_v15 = vsel %vm479_vm1, %v3652_v33, %v5173_v23  ;;  %v3662_v3 = vsel %vm479_vm1, %v3653_v50, %v5174_v26  ;;  %v3326_v7 = vld [vmem:[#allocation3 + $0x8e] ss:$2 sm:$0xff]  ;;  %v3017_v38 = vld [vmem:[#allocation3 + $0x84] ss:$2 sm:$0x3] }
 0x356   : > { %v6951_v58 = vpop.permute.xlu1 %5176  ;;  %v3080_v33 = vld [vmem:[#allocation3 + $0x87] ss:$2 sm:$0x3]  ;;  %v3315_v50 = vld [vmem:[#allocation3 + $0x9b] ss:$2 sm:$0x3] }
 0x357   : > { %v3015_v61 = vld [vmem:[#allocation3 + $0x74] ss:$2 sm:$0xff]  ;;  %v3033_v43 = vld [vmem:[#allocation3 + $0x75] ss:$2 sm:$0xff]  ;;  %v5179_v6 = vunpack.i.h.bf16 %v6951_v58  ;;  %v5178_v13 = vunpack.i.l.bf16 %v6951_v58 }
 0x358   : > { %v2970_v19 = vld [vmem:[#allocation3 + $0x72] ss:$2 sm:$0xff]  ;;  %v3043_v2 = vmax.f32 %v3015_v61, %v3033_v43  ;;  %v2988_v42 = vld [vmem:[#allocation3 + $0x73] ss:$2 sm:$0xff]  ;;  %v3278_v59 = vld [vmem:[#allocation3 + $0x82] ss:$2 sm:$0xff] }
 0x359   : > { %v3105_v16 = vld [vmem:[#allocation3 + $0x78] ss:$2 sm:$0xff]  ;;  %v3123_v62 = vld [vmem:[#allocation3 + $0x79] ss:$2 sm:$0xff]  ;;  %v2998_v60 = vmax.f32 %v2970_v19, %v2988_v42  ;;  %v3670_v18 = vsel %vm2548_vm8, %v3661_v15, %v5178_v13  ;;  %v3671_v40 = vsel %vm2548_vm8, %v3662_v3, %v5179_v6 }
 0x35a   : > { %v3060_v47 = vld [vmem:[#allocation3 + $0x76] ss:$2 sm:$0xff]  ;;  %v3078_v37 = vld [vmem:[#allocation3 + $0x77] ss:$2 sm:$0xff]  ;;  %v5182_v27 = vpop.permute.xlu1 %5181  ;;  %v5270_v5 = vpack.i.bf16 %v3043_v2, %v3042_v46  ;;  %v3133_v35 = vmax.f32 %v3105_v16, %v3123_v62  ;;  %v3177_v46 = vmax.f32 %v3148_v32, %v3166_v31  ;;  %v3285_v2 = vmax.f32 %v3280_v8, %v3283_v41 }
 0x35b   : > { %v5265_v55 = vpack.i.bf16 %v2998_v60, %v2997_v22  ;;  %v3088_v1 = vmax.f32 %v3060_v47, %v3078_v37  ;;  %v3195_v48 = vld [vmem:[#allocation3 + $0x7c] ss:$2 sm:$0xff]  ;;  %v3213_v44 = vld [vmem:[#allocation3 + $0x7d] ss:$2 sm:$0xff]  ;;  %v5184_v63 = vunpack.i.h.bf16 %v5182_v27  ;;  %v5183_v20 = vunpack.i.l.bf16 %v5182_v27 }
 0x35c   : > { %5271 = vrot.lane.b32.xlu1 %v5270_v5, %s7214_s29  ;;  %v3150_v51 = vld [vmem:[#allocation3 + $0x7a] ss:$2 sm:$0xff]  ;;  %v3168_v21 = vld [vmem:[#allocation3 + $0x7b] ss:$2 sm:$0xff]  ;;  %v5280_v34 = vpack.i.bf16 %v3133_v35, %v3132_v10  ;;  %v3223_v53 = vmax.f32 %v3195_v48, %v3213_v44 }
 0x35d   : > { %5266 = vrot.lane.b32.xlu0 %v5265_v55, %s7212_s24  ;;  %v5275_v14 = vpack.i.bf16 %v3088_v1, %v3087_v0  ;;  %v3178_v28 = vmax.f32 %v3150_v51, %v3168_v21  ;;  %v3281_v58 = vld [vmem:[#allocation3 + $0x83] ss:$2 sm:$0xff]  ;;  %v3240_v43 = vld [vmem:[#allocation3 + $0x7e] ss:$2 sm:$0xff]  ;;  %v3679_v42 = vsel %vm2584_vm10, %v3670_v18, %v5183_v20  ;;  %v3680_v16 = vsel %vm2584_vm10, %v3671_v40, %v5184_v63  ;;  %v3238_v22 = vld [vmem:[#allocation3 + $0x6e] ss:$2 sm:$0xff] }
 0x35e   : > { %v5187_v12 = vpop.permute.xlu1 %5186  ;;  %v3258_v19 = vld [vmem:[#allocation3 + $0x7f] ss:$2 sm:$0xff]  ;;  %v5290_v25 = vpack.i.bf16 %v3223_v53, %v3222_v54  ;;  %v3284_v57 = vmax.f32 %v3278_v59, %v3281_v58  ;;  %v3256_v60 = vld [vmem:[#allocation3 + $0x6f] ss:$2 sm:$0xff]  ;;  %v3318_v48 = vld [vmem:[#allocation3 + $0x8c] ss:$2 sm:$0xff] }
 0x35f   : > { %v5189_v39 = vunpack.i.h.bf16 %v5187_v12  ;;  %v5188_v61 = vunpack.i.l.bf16 %v5187_v12  ;;  %v5285_v37 = vpack.i.bf16 %v3178_v28, %v3177_v46  ;;  %v3268_v49 = vmax.f32 %v3240_v43, %v3258_v19  ;;  %v3329_v55 = vld [vmem:[#allocation3 + $0x8f] ss:$2 sm:$0xff]  ;;  %v3035_v51 = vld [vmem:[#allocation3 + $0x85] ss:$2 sm:$0x3] }
 0x360   : > { %5281 = vrot.lane.b32.xlu1 %v5280_v34, %s7216_s27  ;;  %v3267_v9 = vmax.f32 %v3238_v22, %v3256_v60  ;;  %v5300_v36 = vpack.i.bf16 %v3285_v2, %v3284_v57  ;;  %v3321_v44 = vld [vmem:[#allocation3 + $0x8d] ss:$2 sm:$0xff]  ;;  %v3332_v26 = vmax.f32 %v3326_v7, %v3329_v55  ;;  %v3062_v21 = vld [vmem:[#allocation3 + $0x86] ss:$2 sm:$0x3]  ;;  %v3044_v0 = vmax.f32 %v3017_v38, %v3035_v51 }
 0x361   : > { %5276 = vrot.lane.b32.xlu0 %v5275_v14, %s7225_s2  ;;  %v3688_v27 = vsel %vm2620_vm12, %v3679_v42, %v5188_v61  ;;  %v3689_v5 = vsel %vm2620_vm12, %v3680_v16, %v5189_v39  ;;  %v3324_v10 = vmax.f32 %v3318_v48, %v3321_v44  ;;  %v3107_v6 = vld [vmem:[#allocation3 + $0x88] ss:$2 sm:$0x3]  ;;  %v3125_v13 = vld [vmem:[#allocation3 + $0x89] ss:$2 sm:$0x3]  ;;  %v3089_v34 = vmax.f32 %v3062_v21, %v3080_v33 }
 0x362   : > { %v5192_v62 = vpop.permute.xlu1 %5191  ;;  %v5295_v30 = vpack.i.bf16 %v3268_v49, %v3267_v9  ;;  %v3152_v8 = vld [vmem:[#allocation3 + $0x8a] ss:$2 sm:$0x3]  ;;  %v3170_v41 = vld [vmem:[#allocation3 + $0x8b] ss:$2 sm:$0x3]  ;;  %v3134_v28 = vmax.f32 %v3107_v6, %v3125_v13 }
 0x363   : > { %v5194_v52 = vunpack.i.h.bf16 %v5192_v62  ;;  %v5193_v47 = vunpack.i.l.bf16 %v5192_v62  ;;  %v3197_v63 = vld [vmem:[#allocation3 + $0x8c] ss:$2 sm:$0x3]  ;;  %v3215_v20 = vld [vmem:[#allocation3 + $0x8d] ss:$2 sm:$0x3]  ;;  %v3179_v3 = vmax.f32 %v3152_v8, %v3170_v41 }
 0x364   : > { %5291 = vrot.lane.b32.xlu1 %v5290_v25, %s7211_s17  ;;  %v3320_v53 = vld [vmem:[#allocation3 + $0x9c] ss:$2 sm:$0x3]  ;;  %v3323_v32 = vld [vmem:[#allocation3 + $0x9d] ss:$2 sm:$0x3]  ;;  %v3224_v59 = vmax.f32 %v3197_v63, %v3215_v20 }
 0x365   : > { %5286 = vrot.lane.b32.xlu0 %v5285_v37, %s7209_s26  ;;  %v6981_v35 = vpop.permute.xlu0 %5196  ;;  %v6984_v17 = vsel %vm2656_vm14, %v3688_v27, %v5193_v47  ;;  %v6987_v29 = vsel %vm2656_vm14, %v3689_v5, %v5194_v52  ;;  %v3312_v31 = vld [vmem:[#allocation3 + $0x9a] ss:$2 sm:$0x3]  ;;  %v2972_v14 = vld [vmem:[#allocation3 + $0x82] ss:$2 sm:$0x3]  ;;  %v3325_v58 = vmax.f32 %v3320_v53, %v3323_v32 }
 0x366   : > { %v3720_v1 = vpack.c.bf16 %v6987_v29, %v6984_v17  ;;  %v2990_v54 = vld [vmem:[#allocation3 + $0x83] ss:$2 sm:$0x3]  ;;  %v3317_v39 = vmax.f32 %v3312_v31, %v3315_v50  ;;  %v3242_v61 = vld [vmem:[#allocation3 + $0x8e] ss:$2 sm:$0x3]  ;;  %v5199_v52 = vunpack.i.h.bf16 %v6981_v35  ;;  %v5198_v47 = vunpack.i.l.bf16 %v6981_v35 }
 0x367   : > { %v3260_v43 = vld [vmem:[#allocation3 + $0x8f] ss:$2 sm:$0x3]  ;;  %v3328_v19 = vld [vmem:[#allocation3 + $0x9e] ss:$2 sm:$0x3]  ;;  %v2999_v40 = vmax.f32 %v2972_v14, %v2990_v54  ;;  %v5310_v2 = vpack.i.bf16 %v3224_v59, %v3325_v58 }
 0x368   : > { %3896 = vmatprep.mubr.bf16.mxu1 %v3720_v1  ;;  %5301 = vrot.lane.b32.xlu1 %v5300_v36, %s7212_s24  ;;  %v3331_v18 = vld [vmem:[#allocation3 + $0x9f] ss:$2 sm:$0x3]  ;;  %v2911_v46 = vld [vmem:[#allocation3] ss:$2 sm:$0xff]  ;;  %v5305_v57 = vpack.i.bf16 %v3179_v3, %v3317_v39  ;;  %v3269_v22 = vmax.f32 %v3242_v61, %v3260_v43 }
 0x369   : > { %5296 = vrot.lane.b32.xlu0 %v5295_v30, %s7221_s21  ;;  %v6993_v23 = vpop.permute.xlu0 %5201  ;;  %v2917_v42 = vld [vmem:[#allocation3 + $0x30] ss:$2 sm:$0xff]  ;;  %v2929_v16 = vld [vmem:[#allocation3 + $0x1] ss:$2 sm:$0xff]  ;;  %v2935_v62 = vld [vmem:[#allocation3 + $0x31] ss:$2 sm:$0xff]  ;;  %v3333_v60 = vmax.f32 %v3328_v19, %v3331_v18 }
 0x36a   : > { %v5204_v37 = vunpack.i.h.bf16 %v6993_v23  ;;  %v5203_v49 = vunpack.i.l.bf16 %v6993_v23  ;;  %v2946_v27 = vmax.f32 %v2911_v46, %v2929_v16  ;;  %v2949_v5 = vmax.f32 %v2917_v42, %v2935_v62  ;;  %v2919_v14 = vld [vmem:[#allocation3 + $0x40] ss:$2 sm:$0xff]  ;;  %v2937_v54 = vld [vmem:[#allocation3 + $0x41] ss:$2 sm:$0xff] }
 0x36b   : > { %v5315_v48 = vpack.i.bf16 %v3269_v22, %v3333_v60  ;;  %v2950_v59 = vmax.f32 %v2919_v14, %v2937_v54 }
 0x36c   : > { %3636 = vrot.lane.b32.xlu1 %v3332_v26, %s7221_s21  ;;  %v3645_v44 = vsel %vm2441_vm3, %v2949_v5, %v5199_v52  ;;  %v3642_v35 = vsel %vm2441_vm3, %v2946_v27, %v5198_v47  ;;  %v2921_v47 = vld [vmem:[#allocation3 + $0x50] ss:$2 sm:$0xff]  ;;  %v2923_v27 = vld [vmem:[#allocation3 + $0x60] ss:$2 sm:$0xff]  ;;  %v2941_v5 = vld [vmem:[#allocation3 + $0x61] ss:$2 sm:$0xff] }
 0x36d   : > { %3628 = vrot.lane.b32.xlu0 %v3324_v10, %s7211_s17  ;;  %v5207_v12 = vpop.permute.xlu0 %5206  ;;  %v3651_v23 = vsel %vm2477_vm5, %v3642_v35, %v5203_v49  ;;  %v3654_v10 = vsel %vm2477_vm5, %v3645_v44, %v5204_v37  ;;  %v2939_v37 = vld [vmem:[#allocation3 + $0x51] ss:$2 sm:$0xff]  ;;  %v2952_v44 = vmax.f32 %v2923_v27, %v2941_v5 }
 0x36e   : > { %v5209_v9 = vunpack.i.h.bf16 %v5207_v12  ;;  %v5208_v7 = vunpack.i.l.bf16 %v5207_v12 }
 0x370   : > { %3395 = vrot.lane.b32.xlu1 %v3044_v0, %s7214_s29  ;;  %v3660_v21 = vsel %vm479_vm1, %v3651_v23, %v5208_v7  ;;  %v3663_v33 = vsel %vm479_vm1, %v3654_v10, %v5209_v9  ;;  %v2951_v9 = vmax.f32 %v2921_v47, %v2939_v37  ;;  %v2943_v23 = vld [vmem:[#allocation3 + $0x71] ss:$2 sm:$0xff] }
 0x371   : > { %3431 = vrot.lane.b32.xlu0 %v3089_v34, %s7225_s2  ;;  %v5212_v15 = vpop.permute.xlu0 %5211 }
 0x372   : > { %v5214_v55 = vunpack.i.h.bf16 %v5212_v15  ;;  %v5213_v1 = vunpack.i.l.bf16 %v5212_v15 }
 0x374   : > { %3467 = vrot.lane.b32.xlu1 %v3134_v28, %s7216_s27  ;;  %v3669_v6 = vsel %vm2548_vm8, %v3660_v21, %v5213_v1  ;;  %v3672_v13 = vsel %vm2548_vm8, %v3663_v33, %v5214_v55 }
 0x375   : > { %3359 = vrot.lane.b32.xlu0 %v2999_v40, %s7212_s24  ;;  %v5217_v25 = vpop.permute.xlu0 %5216 }
 0x376   : > { %v5219_v30 = vunpack.i.h.bf16 %v5217_v25  ;;  %v5218_v26 = vunpack.i.l.bf16 %v5217_v25 }
 0x378   : > { %5311 = vrot.lane.b32.xlu1 %v5310_v2, %s7211_s17  ;;  %v3678_v8 = vsel %vm2584_vm10, %v3669_v6, %v5218_v26  ;;  %v3681_v41 = vsel %vm2584_vm10, %v3672_v13, %v5219_v30  ;;  %v2925_v26 = vld [vmem:[#allocation3 + $0x70] ss:$2 sm:$0xff] }
 0x379   : > { %5306 = vrot.lane.b32.xlu0 %v5305_v57, %s7209_s26  ;;  %v5222_v36 = vpop.permute.xlu0 %5221  ;;  %s5446_s26 = smov [#allocation6]  }
 0x37a   : > { %v5224_v38 = vunpack.i.h.bf16 %v5222_v36  ;;  %v5223_v51 = vunpack.i.l.bf16 %v5222_v36  ;;  %s5370_s22 = sshll.u32 %s5446_s26, 4  ;;  %s5371_s22 = int_to_ptr.vmem [resolvable:$false] %s5370_s22 }
 0x37c   : > { %v3687_v12 = vsel %vm2620_vm12, %v3678_v8, %v5223_v51  ;;  %v3690_v34 = vsel %vm2620_vm12, %v3681_v41, %v5224_v38  ;;  %v2953_v8 = vmax.f32 %v2925_v26, %v2943_v23 }
 0x37d   : > { %5316 = vrot.lane.b32.xlu0 %v5315_v48, %s7221_s21  ;;  %v5227_v0 = vpop.permute.xlu0 %5226  ;;  %s4114_s21 = scalar_lea.sflag [#allocation7], %s323_s16 }
 0x37e   : > { %v5229_v63 = vunpack.i.h.bf16 %v5227_v0  ;;  %v5228_v20 = vunpack.i.l.bf16 %v5227_v0 }
 0x380   : > { %v3696_v53 = vsel %vm2656_vm14, %v3687_v12, %v5228_v20  ;;  %v3699_v32 = vsel %vm2656_vm14, %v3690_v34, %v5229_v63  ;;  %v3272_v34 = vld [vmem:[#allocation3 + $0x90] ss:$2 sm:$0x3] }
 0x381   : > { %v3719_v31 = vpack.c.bf16 %v6984_v17, %v3696_v53  ;;  %v3721_v50 = vpack.c.bf16 %v3699_v32, %v6987_v29  ;;  %v3275_v53 = vld [vmem:[#allocation3 + $0x91] ss:$2 sm:$0x3] }
 0x383   : > { %3897 = vmatmul.mubr.bf16.vlgmr.msra.gmra.mxu1 %v3719_v31 }
 0x3a1   : > { %v5232_v28 = vpop.permute.xlu1 %5231 }
 0x3a2   : > { %v5233_v58 = vunpack.i.l.bf16 %v5232_v28  ;;  %v5237_v15 = vpop.permute.xlu0 %5236  ;;  %v5234_v49 = vunpack.i.h.bf16 %v5232_v28  ;;  %v5153_v28 = vunpack.i.l.bf16 %v6938_v56 }
 0x3a3   : > { %v5238_v3 = vunpack.i.l.bf16 %v5237_v15  ;;  %v5239_v55 = vunpack.i.h.bf16 %v5237_v15 }
 0x3a4   : > { %v3646_v39 = vsel %vm2441_vm3, %v2950_v59, %v5233_v58  ;;  %v3647_v36 = vsel %vm2441_vm3, %v2951_v9, %v5234_v49  ;;  %v5149_v59 = vunpack.i.h.bf16 %v6954_v11  ;;  %v5158_v49 = vunpack.i.l.bf16 %v6967_v45 }
 0x3a5   : > { %v5242_v61 = vpop.permute.xlu1 %5241  ;;  %v3655_v18 = vsel %vm2477_vm5, %v3646_v39, %v5238_v3  ;;  %v3656_v21 = vsel %vm2477_vm5, %v3647_v36, %v5239_v55 }
 0x3a6   : > { %v5243_v43 = vunpack.i.l.bf16 %v5242_v61  ;;  %v5247_v19 = vpop.permute.xlu0 %5246  ;;  %v5244_v48 = vunpack.i.h.bf16 %v5242_v61 }
 0x3a7   : > { %v5248_v40 = vunpack.i.l.bf16 %v5247_v19  ;;  %v5249_v33 = vunpack.i.h.bf16 %v5247_v19  ;;  %v3270_v19 = vld [vmem:[#allocation3 + $0x80] ss:$2 sm:$0xff] }
 0x3a8   : > { %v3664_v17 = vsel %vm479_vm1, %v3655_v18, %v5243_v43  ;;  %v3665_v13 = vsel %vm479_vm1, %v3656_v21, %v5244_v48  ;;  %v3273_v18 = vld [vmem:[#allocation3 + $0x81] ss:$2 sm:$0xff] }
 0x3a9   : > { %v5252_v46 = vpop.permute.xlu1 %5251  ;;  %v3673_v42 = vsel %vm2548_vm8, %v3664_v17, %v5248_v40  ;;  %v3674_v58 = vsel %vm2548_vm8, %v3665_v13, %v5249_v33  ;;  %v3277_v40 = vmax.f32 %v3272_v34, %v3275_v53  ;;  %v2945_v34 = vld [vmem:[#allocation3 + $0x81] ss:$2 sm:$0x3] }
 0x3aa   : > { %v5253_v29 = vunpack.i.l.bf16 %v5252_v46  ;;  %v7027_v2 = vpop.permute.xlu0 %5256  ;;  %v5254_v0 = vunpack.i.h.bf16 %v5252_v46 }
 0x3ab   : > { %v5258_v16 = vunpack.i.l.bf16 %v7027_v2  ;;  %v5259_v15 = vunpack.i.h.bf16 %v7027_v2 }
 0x3ac   : > { %v3682_v62 = vsel %vm2584_vm10, %v3673_v42, %v5253_v29  ;;  %v3683_v39 = vsel %vm2584_vm10, %v3674_v58, %v5254_v0  ;;  %v5148_v42 = vunpack.i.l.bf16 %v6954_v11 }
 0x3ad   : > { %v7032_v25 = vpop.permute.xlu1 %5261  ;;  %v3691_v22 = vsel %vm2620_vm12, %v3682_v62, %v5258_v16 }
 0x3ae   : > { %v5263_v57 = vunpack.i.l.bf16 %v7032_v25  ;;  %v5264_v61 = vunpack.i.h.bf16 %v7032_v25  ;;  %v3692_v25 = vsel %vm2620_vm12, %v3683_v39, %v5259_v15 }
 0x3b0   : > { %v7037_v60 = vsel %vm2656_vm14, %v3691_v22, %v5263_v57  ;;  %v3276_v22 = vmax.f32 %v3270_v19, %v3273_v18  ;;  %v3701_v9 = vsel %vm2656_vm14, %v3692_v25, %v5264_v61  ;;  %v5365_v25 = vld [vmem:[%s7166_s7] sm:$0xff]  }
 0x3b1   : > { %v3722_v52 = vpack.c.bf16 %v7037_v60, %v3699_v32  ;;  %v5154_v32 = vunpack.i.h.bf16 %v6938_v56  ;;  %v3723_v33 = vpack.c.bf16 %v3701_v9, %v7037_v60 }
 0x3b3   : > { %3904 = vmatprep.mubr.bf16.mxu1 %v3722_v52 }
 0x3b4   : > { %3905 = vmatmul.mubr.bf16.gmra.mxu1 %v3721_v50 }
 0x3ce   : > { %v5272_v7 = vpop.permute.xlu1 %5271 }
 0x3cf   : > { %v5267_v1 = vpop.permute.xlu0 %5266  ;;  %v5273_v30 = vunpack.i.l.bf16 %v5272_v7  ;;  %v5274_v63 = vunpack.i.h.bf16 %v5272_v7 }
 0x3d0   : > { %v5268_v35 = vunpack.i.l.bf16 %v5267_v1  ;;  %v5269_v10 = vunpack.i.h.bf16 %v5267_v1 }
 0x3d2   : > { %v3648_v38 = vsel %vm2441_vm3, %v2952_v44, %v5268_v35  ;;  %v5282_v51 = vpop.permute.xlu1 %5281  ;;  %v3649_v31 = vsel %vm2441_vm3, %v2953_v8, %v5269_v10 }
 0x3d3   : > { %v5277_v6 = vpop.permute.xlu0 %5276  ;;  %v5283_v20 = vunpack.i.l.bf16 %v5282_v51  ;;  %v3657_v12 = vsel %vm2477_vm5, %v3648_v38, %v5273_v30  ;;  %v5284_v17 = vunpack.i.h.bf16 %v5282_v51  ;;  %v3658_v46 = vsel %vm2477_vm5, %v3649_v31, %v5274_v63 }
 0x3d4   : > { %v5278_v41 = vunpack.i.l.bf16 %v5277_v6  ;;  %v5279_v50 = vunpack.i.h.bf16 %v5277_v6 }
 0x3d6   : > { %v3666_v14 = vsel %vm479_vm1, %v3657_v12, %v5278_v41  ;;  %v5292_v54 = vpop.permute.xlu1 %5291  ;;  %v3667_v16 = vsel %vm479_vm1, %v3658_v46, %v5279_v50  ;;  %v2927_v12 = vld [vmem:[#allocation3 + $0x80] ss:$2 sm:$0x3] }
 0x3d7   : > { %v5287_v3 = vpop.permute.xlu0 %5286  ;;  %v5293_v29 = vunpack.i.l.bf16 %v5292_v54  ;;  %v3675_v56 = vsel %vm2548_vm8, %v3666_v14, %v5283_v20  ;;  %v5294_v27 = vunpack.i.h.bf16 %v5292_v54  ;;  %v3676_v11 = vsel %vm2548_vm8, %v3667_v16, %v5284_v17 }
 0x3d8   : > { %v5288_v43 = vunpack.i.l.bf16 %v5287_v3  ;;  %v5289_v2 = vunpack.i.h.bf16 %v5287_v3 }
 0x3da   : > { %v3684_v62 = vsel %vm2584_vm10, %v3675_v56, %v5288_v43  ;;  %v5302_v57 = vpop.permute.xlu1 %5301  ;;  %v3685_v36 = vsel %vm2584_vm10, %v3676_v11, %v5289_v2 }
 0x3db   : > { %v5304_v52 = vunpack.i.h.bf16 %v5302_v57  ;;  %v5303_v47 = vunpack.i.l.bf16 %v5302_v57  ;;  %v5297_v37 = vpop.permute.xlu0 %5296  ;;  %v3693_v1 = vsel %vm2620_vm12, %v3684_v62, %v5293_v29  ;;  %v3694_v0 = vsel %vm2620_vm12, %v3685_v36, %v5294_v27  ;;  %v5364_v57 = vld [vmem:[%s7166_s7 + $0x8] sm:$0xff]  }
 0x3dc   : > { %v5298_v5 = vunpack.i.l.bf16 %v5297_v37  ;;  %v5299_v26 = vunpack.i.h.bf16 %v5297_v37  ;;  %4480 = vmatpush3.bf16.msra.mxu1 %v5364_v57 }
 0x3dd   : > { %v3706_v7 = vsel %vm2441_vm3, %v3277_v40, %v5304_v52  ;;  %v3705_v55 = vsel %vm2441_vm3, %v3276_v22, %v5303_v47  ;;  %4481 = vmatprep.subr.bf16.mxu1 %v7226_v4  ;;  %v4240_v52 = vld [vmem:[%s7165_s6] ss:$0 sm:$0xff] }
 0x3de   : > { %v3708_v48 = vsel %vm2477_vm5, %v3706_v7, %v5149_v59  ;;  %v3707_v44 = vsel %vm2477_vm5, %v3705_v55, %v5148_v42  ;;  %v3637_v35 = vpop.permute.xlu1 %3636  ;;  %v3702_v30 = vsel %vm2656_vm14, %v3693_v1, %v5298_v5  ;;  %v3703_v41 = vsel %vm2656_vm14, %v3694_v0, %v5299_v26 }
 0x3df   : > { %v3709_v23 = vsel %vm479_vm1, %v3707_v44, %v5153_v28  ;;  %v3629_v10 = vpop.permute.xlu0 %3628  ;;  %v3724_v38 = vpack.c.bf16 %v3702_v30, %v3701_v9  ;;  %v3710_v51 = vsel %vm479_vm1, %v3708_v48, %v5154_v32  ;;  %v2954_v32 = vmax.f32 %v2927_v12, %v2945_v34 }
 0x3e0   : > { %v3711_v21 = vsel %vm2548_vm8, %v3709_v23, %v5158_v49  ;;  %v3725_v50 = vpack.c.bf16 %v3703_v41, %v3702_v30  ;;  %v5159_v59 = vunpack.i.h.bf16 %v6967_v45  ;;  %4482 = vmatpush3.bf16.msra.mxu1 %v5365_v25 }
 0x3e1   : > { %v3713_v6 = vsel %vm2584_vm10, %v3711_v21, %v6941_v24  ;;  %3912 = vmatprep.mubr.bf16.mxu1 %v3724_v38 }
 0x3e2   : > { %v3715_v13 = vsel %vm2620_vm12, %v3713_v6, %v3629_v10  ;;  %3913 = vmatmul.mubr.bf16.gmra.mxu1 %v3723_v33  ;;  %v3396_v8 = vpop.permute.xlu1 %3395  ;;  %v3712_v61 = vsel %vm2548_vm8, %v3710_v51, %v5159_v59 }
 0x3e3   : > { %v3717_v63 = vsel %vm2656_vm14, %v3715_v13, %v3637_v35  ;;  %v3432_v20 = vpop.permute.xlu0 %3431 }
 0x3e4   : > { %v3726_v53 = vpack.c.bf16 %v3717_v63, %v3703_v41 }
 0x3e6   : > { %3920 = vmatprep.mubr.bf16.mxu1 %v3726_v53  ;;  %v3468_v60 = vpop.permute.xlu1 %3467 }
 0x3e7   : > { %v3360_v31 = vpop.permute.xlu0 %3359 }
 0x3e8   : > { %v3650_v24 = vsel %vm2441_vm3, %v2954_v32, %v3360_v31 }
 0x3e9   : > { %v3659_v14 = vsel %vm2477_vm5, %v3650_v24, %v3396_v8 }
 0x3ea   : > { %v3668_v54 = vsel %vm479_vm1, %v3659_v14, %v3432_v20  ;;  %3921 = vmatmul.mubr.bf16.gmra.mxu1 %v3725_v50  ;;  %v5312_v28 = vpop.permute.xlu1 %5311 }
 0x3eb   : > { %v5307_v58 = vpop.permute.xlu0 %5306  ;;  %v3677_v39 = vsel %vm2548_vm8, %v3668_v54, %v3468_v60  ;;  %v5314_v43 = vunpack.i.h.bf16 %v5312_v28  ;;  %v5313_v19 = vunpack.i.l.bf16 %v5312_v28 }
 0x3ec   : > { %v5309_v15 = vunpack.i.h.bf16 %v5307_v58  ;;  %v5308_v3 = vunpack.i.l.bf16 %v5307_v58 }
 0x3ee   : > { %v3686_v18 = vsel %vm2584_vm10, %v3677_v39, %v5309_v15  ;;  %v3714_v40 = vsel %vm2584_vm10, %v3712_v61, %v5308_v3 }
 0x3ef   : > { %v5317_v17 = vpop.permute.xlu0 %5316  ;;  %v3695_v56 = vsel %vm2620_vm12, %v3686_v18, %v5314_v43  ;;  %v3716_v45 = vsel %vm2620_vm12, %v3714_v40, %v5313_v19 }
 0x3f0   : > { %v5319_v46 = vunpack.i.h.bf16 %v5317_v17  ;;  %v5318_v29 = vunpack.i.l.bf16 %v5317_v17 }
 0x3f2   : > { %v3718_v42 = vsel %vm2656_vm14, %v3716_v45, %v5318_v29  ;;  %v3704_v16 = vsel %vm2656_vm14, %v3695_v56, %v5319_v46 }
 0x3f3   : > { %v3728_v2 = vpack.c.bf16 %v3718_v42, %v3718_v42  ;;  %v3727_v62 = vpack.c.bf16 %v3704_v16, %v3704_v16 }
 0x3f5   : > { %3928 = vmatprep.mubr.bf16.mxu1 %v3728_v2 }
 0x3f6   : > { %3929 = vmatmul.mubr.bf16.gmra.mxu1 %v3727_v62 }
 0x3f7   : > { %4483 = vmatprep.mubr.msk.bf16.mxu1 %vm5429_vm0, %v7226_v4  ;;  %vm3953_vm0 = vcmask 254976  }
 0x443   : > { %v4320_v22 = vpop.f32.mrf.mxu1 }
 0x445   : > { %v4321_v47 = vpop.f32.mrf.mxu1 }
 0x446   : > { %v4322_v37 = vadd.f32 %v4321_v47, %v4320_v22 }
 0x447   : > { %v4323_v49 = vpop.f32.mrf.mxu1 }
 0x448   : > { %v3899_v27 = vadd.f32 %v4322_v37, %v4240_v52 }
 0x449   : > { %v4324_v5 = vpop.f32.mrf.mxu1 }
 0x44a   : > { %v3936_v9 = vmax.f32 %v3899_v27, 0.0  ;;  %v4325_v11 = vadd.f32 %v4324_v5, %v4323_v49 }
 0x44c   : > { %3945 = vst.msk [vmem:[#allocation4] sm:$0xff] %vm2477_vm5, %v3936_v9  ;;  %v3902_v4 = vadd.f32 %v4325_v11, %v4240_v52  ;;  %v4257_v9 = vld [vmem:[%s7167_s8] ss:$0 sm:$0xff] }
 0x44e   : > { %v3937_v7 = vmax.f32 %v3902_v4, 0.0 }
 0x450   : > { %3946 = vst.msk [vmem:[#allocation4 + $0x8] sm:$0xff] %vm2477_vm5, %v3937_v7 }
 0x474   : > { %v4326_v55 = vpop.f32.mrf.mxu1 }
 0x476   : > { %v4327_v1 = vpop.f32.mrf.mxu1 }
 0x477   : > { %v4328_v36 = vadd.f32 %v4327_v1, %v4326_v55 }
 0x478   : > { %v4329_v48 = vpop.f32.mrf.mxu1 }
 0x479   : > { %v3907_v44 = vadd.f32 %v4328_v36, %v4240_v52 }
 0x47a   : > { %v4330_v35 = vpop.f32.mrf.mxu1 }
 0x47b   : > { %v3938_v30 = vmax.f32 %v3907_v44, 0.0  ;;  %v4331_v26 = vadd.f32 %v4330_v35, %v4329_v48 }
 0x47d   : > { %3947 = vst.msk [vmem:[#allocation4 + $0x10] sm:$0xff] %vm2477_vm5, %v3938_v30  ;;  %v3910_v23 = vadd.f32 %v4331_v26, %v4240_v52  ;;  %v5445_v30 = vmov 1966171168  }
 0x47e   : > { %v4094_v26 = vunpack.c.l.s4 %v5445_v30 }
 0x47f   : > { %v3939_v10 = vmax.f32 %v3910_v23, 0.0  ;;  %v4096_v23 = vlaneseq }
 0x481   : > { %3948 = vst.msk [vmem:[#allocation4 + $0x18] sm:$0xff] %vm2477_vm5, %v3939_v10  ;;  %vm4110_vm1 = vcmp.lt.s32.totalorder %v4096_v23, 192 }
 0x4a2   : > { %v4332_v38 = vpop.f32.mrf.mxu1 }
 0x4a4   : > { %v4333_v51 = vpop.f32.mrf.mxu1 }
 0x4a5   : > { %v4334_v21 = vadd.f32 %v4333_v51, %v4332_v38 }
 0x4a6   : > { %v4335_v33 = vpop.f32.mrf.mxu1 }
 0x4a7   : > { %v3915_v6 = vadd.f32 %v4334_v21, %v4240_v52  ;;  %v4095_v21 = vunpack.c.0.s8 %v4094_v26 }
 0x4a8   : > { %v4336_v13 = vpop.f32.mrf.mxu1 }
 0x4a9   : > { %v3940_v0 = vmax.f32 %v3915_v6, 0.0  ;;  %v4337_v8 = vadd.f32 %v4336_v13, %v4335_v33  ;;  %v4097_v33 = vshrl.u32 %v4096_v23, 7 }
 0x4aa   : > { %v4338_v41 = vpop.f32.mrf.mxu1 }
 0x4ab   : > { %3949 = vst.msk [vmem:[#allocation4 + $0x20] sm:$0xff] %vm2477_vm5, %v3940_v0  ;;  %v3918_v63 = vadd.f32 %v4337_v8, %v4240_v52  ;;  %v4098_v8 = vsub.s32 %v4095_v21, %v4097_v33 }
 0x4ac   : > { %v4339_v20 = vpop.f32.mrf.mxu1 }
 0x4ad   : > { %v3941_v12 = vmax.f32 %v3918_v63, 0.0  ;;  %v4340_v34 = vadd.f32 %v4339_v20, %v4338_v41 }
 0x4ae   : > { %v4341_v53 = vpop.f32.mrf.mxu1 }
 0x4af   : > { %3950 = vst.msk [vmem:[#allocation4 + $0x28] sm:$0xff] %vm2477_vm5, %v3941_v12  ;;  %v3923_v32 = vadd.f32 %v4340_v34, %v4240_v52 }
 0x4b0   : > { %v4342_v60 = vpop.f32.mrf.mxu1 }
 0x4b1   : > { %v3942_v31 = vmax.f32 %v3923_v32, 0.0  ;;  %v4343_v24 = vadd.f32 %v4342_v60, %v4341_v53 }
 0x4b3   : > { %3951 = vst.msk [vmem:[#allocation4 + $0x30] sm:$0xff] %vm2477_vm5, %v3942_v31  ;;  %v3926_v50 = vadd.f32 %v4343_v24, %v4240_v52 }
 0x4b5   : > { %v3943_v14 = vmax.f32 %v3926_v50, 0.0 }
 0x4b6   : > { %v4344_v54 = vpop.f32.mrf.mxu1  ;;  %v3955_v28 = vld [vmem:[#allocation4] ss:$6 sm:$0xff]  ;;  %v3959_v59 = vld [vmem:[#allocation4 + $0x1] ss:$6 sm:$0xff] }
 0x4b7   : > { %3952 = vst.msk [vmem:[#allocation4 + $0x38] sm:$0xff] %vm2477_vm5, %v3943_v14  ;;  %v3962_v3 = vmax.f32 %v3955_v28, %v3959_v59  ;;  %v3965_v19 = vld [vmem:[#allocation4 + $0x2] ss:$6 sm:$0xff]  ;;  %v3971_v45 = vld [vmem:[#allocation4 + $0x3] ss:$6 sm:$0xff] }
 0x4b8   : > { %v4345_v58 = vpop.f32.mrf.mxu1  ;;  %v3977_v62 = vld [vmem:[#allocation4 + $0x4] ss:$6 sm:$0xff] }
 0x4b9   : > { %v4346_v15 = vadd.f32 %v4345_v58, %v4344_v54  ;;  %v3968_v40 = vmax.f32 %v3962_v3, %v3965_v19 }
 0x4ba   : > { %v4347_v39 = vpop.f32.mrf.mxu1 }
 0x4bb   : > { %v3931_v61 = vadd.f32 %v4346_v15, %v4240_v52  ;;  %v3974_v16 = vmax.f32 %v3968_v40, %v3971_v45  ;;  %v3983_v52 = vld [vmem:[#allocation4 + $0x5] ss:$6 sm:$0xff] }
 0x4bc   : > { %v4348_v43 = vpop.f32.mrf.mxu1 }
 0x4bd   : > { %v3944_v18 = vmax.f32 %v3931_v61, 0.0  ;;  %v3980_v25 = vmax.f32 %v3974_v16, %v3977_v62 }
 0x4be   : > { %v3957_v17 = vld [vmem:[#allocation4 + $0x30] ss:$6 sm:$0x7]  ;;  %v3961_v46 = vld [vmem:[#allocation4 + $0x31] ss:$6 sm:$0x7] }
 0x4bf   : > { %3954 = vst.msk [vmem:[#allocation4 + $0x40] sm:$0x3] %vm3953_vm0, %v3944_v18  ;;  %v3963_v29 = vmax.f32 %v3957_v17, %v3961_v46  ;;  %v3967_v56 = vld [vmem:[#allocation4 + $0x32] ss:$6 sm:$0x7]  ;;  %v3986_v49 = vmax.f32 %v3980_v25, %v3983_v52 }
 0x4c0   : > { %v3973_v2 = vld [vmem:[#allocation4 + $0x33] ss:$6 sm:$0x7] }
 0x4c1   : > { %v3969_v42 = vmax.f32 %v3963_v29, %v3967_v56 }
 0x4c3   : > { %v3975_v57 = vmax.f32 %v3969_v42, %v3973_v2 }
 0x4c6   : > { %v3979_v22 = vld [vmem:[#allocation4 + $0x34] ss:$6 sm:$0x7]  ;;  %v3985_v37 = vld [vmem:[#allocation4 + $0x35] ss:$6 sm:$0x7] }
 0x4c7   : > { %v3981_v47 = vmax.f32 %v3975_v57, %v3979_v22 }
 0x4c9   : > { %v3987_v27 = vmax.f32 %v3981_v47, %v3985_v37 }
 0x4cb   : > { %v3988_v5 = vpack.c.bf16 %v3987_v27, %v3986_v49 }
 0x4cd   : > { %4484 = vmatmul.mubr.msk.bf16.vlgmr.msra.gmra.mxu1 %vm2477_vm5, %v3988_v5 }
 0x58d   : > { %v4049_v11 = vpop.f32.mrf.mxu1 }
 0x58e   : > { %v4050_v4 = vadd.f32 %v4257_v9, %v4049_v11 }
 0x58f   : > { %v4485_v7 = vpop.f32.mrf.mxu1 }
 0x590   : > { %4056 = vst.msk [vmem:[#allocation5] sm:$0xff] %vm2477_vm5, %v4050_v4 }
 0x591   : > { %v4052_v55 = vpop.f32.mrf.mxu1 }
 0x593   : > { %v4486_v1 = vpop.f32.mrf.mxu1 }
 0x597   : > { %v4063_v36 = vld [vmem:[#allocation5 + $0x2] ss:$11 sm:$0x1]  ;;  %v4061_v48 = vld [vmem:[#allocation5 + $0x1] ss:$11 sm:$0x1] }
 0x598   : > { %4075 = vrot.lane.b32.xlu0 %v4063_v36, %s7216_s27  ;;  %4071 = vrot.lane.b32.xlu1 %v4061_v48, %s7214_s29  ;;  %v4069_v44 = vld [vmem:[#allocation5 + $0x5] ss:$11 sm:$0x1]  ;;  %v4065_v35 = vld [vmem:[#allocation5 + $0x3] ss:$11 sm:$0x1] }
 0x599   : > { %v4059_v51 = vld [vmem:[#allocation5] ss:$11 sm:$0x1]  ;;  %s4191_s27 = sshll.u32 %s323_s16, 1 }
 0x59a   : > { %v4067_v13 = vld [vmem:[#allocation5 + $0x4] ss:$11 sm:$0x1] }
 0x59c   : > { %4083 = vrot.lane.b32.xlu0 %v4069_v44, %s7214_s29  ;;  %4079 = vrot.lane.b32.xlu1 %v4065_v35, %s7211_s17  ;;  %s4266_s17 = sshll.u32 %s5518_s13, 5  ;;  %s325_s29 = scalar_lea.vmem [#allocation6], %s4191_s27 }
 0x59d   : > { %s4128_s14 = sshll.u32 %s325_s29, 4  ;;  %s4126_s2 = scalar_lea.hbm %s7168_s9, %s4266_s17  ;;  %s4129_s14 = int_to_ptr.vmem [resolvable:$true] %s4128_s14 }
 0x59e   : > { %s5366_s24 = scalar_lea.vmem %s4129_s14, 32  ;;  %s5372_s13 = scalar_lea.vmem %s5371_s22, 64 }
 0x59f   : > { %p5367_p11 = scmp.ne.s32.totalorder %s4129_s14, %s5366_s24  ;;  %p5373_p0 = scmp.lt.s32.totalorder %s4129_s14, %s5371_s22 }
 0x5a0   : > { %p5374_p1 = scmp.lt.s32.totalorder %s5372_s13, %s5366_s24 }
 0x5a1   : > { %p5368_p12 = pnand %p5367_p11, %p5535_p5 }
 0x5a2   : > { %p5375_p2 = por %p5374_p1, %p5373_p0 }
 0x5a3   : > { %p5369_p13 = pneg %p5368_p12 }
 0x5a5   : > { %p5376_p3 = pnand %p5375_p2, %p5369_p13 }
 0x60a   : > { %v4076_v10 = vpop.permute.xlu0 %4075  ;;  %v4072_v38 = vpop.permute.xlu1 %4071 }
 0x60b   : > { %v4086_v6 = vsel %vm2477_vm5, %v4059_v51, %v4072_v38 }
 0x60c   : > { %v4087_v63 = vsel %vm2548_vm8, %v4086_v6, %v4076_v10 }
 0x60e   : > { %v4084_v0 = vpop.permute.xlu0 %4083  ;;  %v4080_v41 = vpop.permute.xlu1 %4079 }
 0x60f   : > { %v4089_v20 = vsel %vm2477_vm5, %v4067_v13, %v4084_v0  ;;  %v4088_v12 = vsel %vm2620_vm12, %v4087_v63, %v4080_v41 }
 0x610   : > { %v4092_v34 = vcombine.low %v4088_v12, %v4089_v20 }
 0x612   : > { %v4099_v53 = vrot.slane %v4092_v34, %v4098_v8 }
 0x614   : > { %v4106_v32 = vrot.slane %v4099_v53, %v4098_v8 }
 0x616   : > { %4112 = vst.msk [vmem:[%s325_s29] sm:$0x3] %vm4110_vm1, %v4106_v32 }
 0x617   : > { %5379 = shalt.err (!%p5376_p3)
}
 0x618   : > { %s5380_s23 = scalar_lea.hbm %s4126_s2, 32  ;;  %s5384_s16 = scalar_lea.hbm %s7168_s9, 64 }
 0x619   : > { %p5381_p4 = scmp.ne.s32.totalorder %s4126_s2, %s5380_s23  ;;  %p5385_p9 = scmp.lt.s32.totalorder %s4126_s2, %s7168_s9 }
 0x61a   : > { %p5386_p10 = scmp.lt.s32.totalorder %s5384_s16, %s5380_s23 }
 0x61b   : > { %p5382_p7 = pnand %p5381_p4, %p5535_p5 }
 0x61c   : > { %p5387_p11 = por %p5386_p10, %p5385_p9 }
 0x61d   : > { %p5383_p8 = pneg %p5382_p7 }
 0x61f   : > { %p5388_p12 = pnand %p5387_p11, %p5383_p8 }
 0x621   : > { %5391 = shalt.err (!%p5388_p12)
}
 0x622   : > { %4488 = dma.vmem_to_hbm [thread:$0]  (%p5535_p5), %s4129_s14, 32, %s4126_s2, %s4114_s21  }
 0x623 PF: > { %p4494_p13 = scmp.ge.s32.totalorder %s5426_s12, 2  ;;  %s4140_s29 = sand.u32 1, %s5414_s30  }
 0x624   : > { %s4141_s0 = scalar_lea.sflag [#allocation7], %s4140_s29 }
 0x625   : > { %p4491_p0 = pnand %p4494_p13, %p5539_p6 }
 0x627   : > { %p4492_p1 = pneg %p4491_p0 }
 0x629   : > { %5409 = dma.done.wait (%p4492_p1), %s4141_s0, 32  }
 0x62a   : > { %5411 = vsyncadd (%p4492_p1), %s4141_s0, 4294967264  ;;  %p19_p2 = scmp.ge.s32.totalorder %s5522_s15, 4   ;;  %s7229_s30 = smov %s5418_s10 }
 0x62b   : > { %s7230_s10 = smov %s5422_s11  ;;  %s7231_s11 = smov %s5533_s18 }
 0x62c   : > { %s7232_s12 = smov %s5522_s15  ;;  %21 = sbr.rel (!%p19_p2) target bundleno = 7 (0x7), region = 553 }
 0x631   :  { %4146 = vsyncpa [#allocation7], 1 }
 0x632   :  { %4148 = vsyncpa [#allocation7 + $0x1], 1 }

</bundles_post_ra>
